<compile_context>
chip_gen: v7x
topology: tpu7x:2x2x1
jax: 0.10.0
libtpu: 0.0.40
codegen_flags: <defaults>
</compile_context>

<pallas_src>
import types

import numpy as np
import jax
import jax.numpy as jnp
from jax.experimental import pallas as pl
from jax.experimental.pallas import tpu as pltpu

NPAD = 128  # lane padding for every layer's (tap x channel) / unit / class dimension
_VMEM = pl.BlockSpec(memory_space=pltpu.MemorySpace.VMEM)


# ----------------------------------------------------------------------------
# Static plan of the fused forward pass (layouts, tap offsets, scratch sizes)
# ----------------------------------------------------------------------------
def _build_plan(config, input_shp, batch):
    C, H, W = input_shp
    stages, scratch_rows, conv_meta = [], [], []
    hc, wc, gs = H, W, W          # valid spatial extent / row stride of current layout
    stride_b = H * W              # per-batch row stride of current layout
    cc = C
    src = ('input', None)
    n_conv = 0
    for level in range(config.num_conv_outer):
        for _block in range(config.num_conv_inner):
            cout = config.nchannel_base * 2 ** level
            ho, wo = hc - 2, wc - 2
            s_out = (ho - 1) * gs + wo                       # valid flat extent per batch
            win_rows = (batch - 1) * stride_b + s_out        # one contiguous slab, all batches
            sidx = len(scratch_rows)
            scratch_rows.append(win_rows)
            stages.append(dict(kind='conv', win_rows=win_rows,
                               offsets=[dy * gs + dx for dy in range(3) for dx in range(3)],
                               cin=cc, src=src, sidx=sidx))
            conv_meta.append((cc, cout))
            n_conv += 1
            src = ('scratch', sidx)
            hc, wc, cc = ho, wo, cout
            s_valid = s_out
        hp, wp = hc // 2, wc // 2
        # pool never reads the garbage (wrap / inter-batch) rows of the conv scratch:
        assert (2 * hp - 1) * gs + (2 * wp - 1) < s_valid
        sidx = len(scratch_rows)
        scratch_rows.append(batch * hp * wp)
        stages.append(dict(kind='pool', hp=hp, wp=wp, gs=gs,
                           src_stride_b=stride_b, src=src, sidx=sidx))
        src = ('scratch', sidx)
        hc, wc, gs, stride_b = hp, wp, wp, hp * wp
    sp = hc * wc
    return dict(stages=stages, scratch_rows=scratch_rows, sp=sp, c_last=cc,
                final_src=src, n_conv=n_conv, conv_meta=conv_meta,
                n_fc=config.num_hidden + 1)


# ----------------------------------------------------------------------------
# Fused kernel
# ----------------------------------------------------------------------------
def _make_kernel(plan, batch):
    stages, sp, c_last = plan['stages'], plan['sp'], plan['c_last']
    n_conv, n_fc = plan['n_conv'], plan['n_fc']

    def kernel(*refs):
        x_ref = refs[0]
        conv_w = [refs[1 + 2 * i] for i in range(n_conv)]
        conv_b = [refs[2 + 2 * i] for i in range(n_conv)]
        base = 1 + 2 * n_conv
        fc_w = [refs[base + 2 * i] for i in range(n_fc)]
        fc_b = [refs[base + 2 * i + 1] for i in range(n_fc)]
        out_ref = refs[base + 2 * n_fc]
        scr = list(refs[base + 2 * n_fc + 1:])

        lane = jax.lax.broadcasted_iota(jnp.int32, (1, NPAD), 1)

        def lane_group(val, g, width):
            # keep lanes [g*width, (g+1)*width), zero elsewhere (full-width VPU select)
            return jnp.where((lane >= g * width) & (lane < (g + 1) * width), val, 0.0)

        ci = 0
        for st in stages:
            if st['kind'] == 'conv':
                src = x_ref if st['src'][0] == 'input' else scr[st['src'][1]]
                rows, cin = st['win_rows'], st['cin']
                # Build im2col-in-lanes LHS: tap t's channels land at lanes [t*cin,(t+1)*cin)
                # because the source already carries channels replicated per lane group.
                packed = None
                for t, off in enumerate(st['offsets']):
                    sel = lane_group(src[pl.ds(off, rows), :], t, cin)
                    packed = sel if packed is None else packed + sel
                acc = jnp.dot(packed.astype(jnp.bfloat16), conv_w[ci][...],
                              preferred_element_type=jnp.float32)
                scr[st['sidx']][...] = jnp.maximum(acc + conv_b[ci][...], 0.0)
                ci += 1
            else:
                # 2x2 max-pool, stride 2 (elementwise -> lane replication is preserved)
                src = scr[st['src'][1]]
                gs, hp, wp, sb = st['gs'], st['hp'], st['wp'], st['src_stride_b']
                dst = scr[st['sidx']]
                for b in range(batch):
                    for r in range(hp):
                        o = b * sb + 2 * r * gs
                        c00 = src[pl.ds(o, wp, stride=2), :]
                        c01 = src[pl.ds(o + 1, wp, stride=2), :]
                        c10 = src[pl.ds(o + gs, wp, stride=2), :]
                        c11 = src[pl.ds(o + gs + 1, wp, stride=2), :]
                        dst[pl.ds((b * hp + r) * wp, wp), :] = jnp.maximum(
                            jnp.maximum(c00, c01), jnp.maximum(c10, c11))

        # ---- FC stack: lane-pack the pooled features (lane = spatial*C + c) so the
        # whole batch goes through ONE matmul per FC layer.
        feat = scr[plan['final_src'][1]]
        packed = None
        for s in range(sp):
            sel = lane_group(feat[pl.ds(s, batch, stride=sp), :], s, c_last)
            packed = sel if packed is None else packed + sel
        vec = packed
        for i in range(n_fc):
            vec = jnp.dot(vec.astype(jnp.bfloat16), fc_w[i][...],
                          preferred_element_type=jnp.float32) + fc_b[i][...]
            if i < n_fc - 1:
                vec = jnp.maximum(vec, 0.0)
        out_ref[...] = vec

    return kernel


# ----------------------------------------------------------------------------
# One-time weight re-layout (init time)
# ----------------------------------------------------------------------------
def prepare_params(params, config, input_shp, batch, npad=NPAD):
    conv_params, fc_params, (wo, bo) = params
    plan = _build_plan(config, input_shp, batch)
    sp, c_last, n_conv = plan['sp'], plan['c_last'], plan['n_conv']
    flat = []

    conv_flat = [wb for level in conv_params for wb in level]
    for i, (w, b) in enumerate(conv_flat):
        O, I = int(w.shape[0]), int(w.shape[1])
        # output channels are replicated into the lane groups the consumer reads:
        groups = 9 if i + 1 < n_conv else sp
        assert 9 * I <= npad and groups * O <= npad
        taps = jnp.transpose(w, (2, 3, 1, 0)).reshape(9 * I, O)   # row = (ky*3+kx)*I + c
        b_eff = b
        if i == 0:
            # fold (x-128)/128 normalization into conv1
            taps = taps / 128.0
            b_eff = b - jnp.sum(w, axis=(1, 2, 3))
        wt = jnp.zeros((npad, npad), jnp.float32)
        bt = jnp.zeros((1, npad), jnp.float32)
        for g in range(groups):
            wt = wt.at[:9 * I, g * O:(g + 1) * O].set(taps)
            bt = bt.at[0, g * O:(g + 1) * O].set(b_eff)
        flat += [wt.astype(jnp.bfloat16), bt]

    fcs = list(fc_params) + [(wo, bo)]
    for i, (w, b) in enumerate(fcs):
        out_d, in_d = int(w.shape[0]), int(w.shape[1])
        assert out_d <= npad and in_d <= npad
        wt = jnp.zeros((npad, npad), jnp.float32)
        bt = jnp.zeros((1, npad), jnp.float32).at[0, :out_d].set(b)
        if i == 0:
            # torch x.view(B,-1) on NCHW flattens as idx = c*sp + s; our lanes are s*C + c
            assert in_d == c_last * sp
            wperm = jnp.transpose(w.reshape(out_d, c_last, sp), (2, 1, 0))  # (s, c, out)
            wt = wt.at[:sp * c_last, :out_d].set(wperm.reshape(sp * c_last, out_d))
        else:
            wt = wt.at[:in_d, :out_d].set(w.T)
        flat += [wt.astype(jnp.bfloat16), bt]
    return flat


def make_pallas_forward(config, input_shp, batch, npad=NPAD):
    assert config.activation == 'ReLU' and config.pool2d == 'MaxPool2d'
    C, H, W = input_shp
    assert 9 * C <= npad
    plan = _build_plan(config, input_shp, batch)
    kernel = _make_kernel(plan, batch)
    n_inputs = 1 + 2 * plan['n_conv'] + 2 * plan['n_fc']
    call = pl.pallas_call(
        kernel,
        out_shape=jax.ShapeDtypeStruct((batch, npad), jnp.float32),
        in_specs=[_VMEM] * n_inputs,
        out_specs=_VMEM,
        scratch_shapes=[pltpu.VMEM((rows, npad), jnp.float32)
                        for rows in plan['scratch_rows']],
    )

    def forward(flat_params, x_nchw):
        # Boundary layout plumbing only: NCHW -> flat (B*H*W, C) rows with the channels
        # replicated into the 9 per-tap lane groups conv1 reads.  Raw (unnormalized)
        # values go in; normalization is folded into conv1's weights.
        x = jnp.transpose(x_nchw, (0, 2, 3, 1)).reshape(batch * H * W, C)
        x = jnp.tile(x.astype(jnp.float32), (1, 9))
        x = jnp.pad(x, ((0, 0), (0, npad - 9 * C)))
        out = call(x, *flat_params)
        return out[:, :config.num_class]

    return jax.jit(forward)


# ----------------------------------------------------------------------------
# Parameter init (torch conventions) and pure-JAX reference forward
# ----------------------------------------------------------------------------
def init_params(key, config, input_shp):
    keys = iter(jax.random.split(key, 128))
    indim = input_shp[0]
    channel = config.nchannel_base

    conv_params = []
    outdim = indim
    for level in range(config.num_conv_outer):
        blocks = []
        for _block in range(config.num_conv_inner):
            outdim = channel * 2 ** level
            w = jax.random.normal(next(keys), (outdim, indim, 3, 3), jnp.float32)
            b = jax.random.normal(next(keys), (outdim,), jnp.float32)
            blocks.append((w, b))
            indim = outdim
        conv_params.append(blocks)

    indim = outdim * 2 * 2
    fc_params = []
    for _i in range(config.num_hidden):
        outdim = config.num_unit
        bound = 1.0 / np.sqrt(indim)
        w = jax.random.uniform(next(keys), (outdim, indim), jnp.float32, -bound, bound)
        b = jax.random.uniform(next(keys), (outdim,), jnp.float32, -bound, bound)
        fc_params.append((w, b))
        indim = outdim

    bound = 1.0 / np.sqrt(indim)
    wo = jax.random.uniform(next(keys), (config.num_class, indim), jnp.float32, -bound, bound)
    bo = jax.random.uniform(next(keys), (config.num_class,), jnp.float32, -bound, bound)
    return conv_params, fc_params, (wo, bo)


def forward_reference(params, x_nchw, config):
    """Pure-JAX f32 reference of the PyTorch forward (numeric sanity check)."""
    conv_params, fc_params, (wo, bo) = params
    x = (x_nchw - 128.0) / 128.0
    for level in range(config.num_conv_outer):
        for block in range(config.num_conv_inner):
            w, b = conv_params[level][block]
            x = jax.lax.conv_general_dilated(
                x, w, window_strides=(1, 1), padding="VALID",
                dimension_numbers=("NCHW", "OIHW", "NCHW"))
            x = jnp.maximum(x + b[None, :, None, None], 0.0)
        x = jax.lax.reduce_window(
            x, -jnp.inf, jax.lax.max, (1, 1, 2, 2), (1, 1, 2, 2), "VALID")
    x = x.reshape(x.shape[0], -1)
    for w, b in fc_params:
        x = jnp.maximum(x @ w.T + b, 0.0)
    return x @ wo.T + bo


# ----------------------------------------------------------------------------
if __name__ == "__main__":
    config = types.SimpleNamespace(
        conv2d="custom", activation="ReLU", pool2d="MaxPool2d",
        nchannel_base=4, num_conv_outer=2, num_conv_inner=1,
        num_hidden=1, num_unit=32, num_class=10,
    )
    input_shp = (4, 14, 14)   # (C, H, W): 14 ->conv-> 12 ->pool-> 6 ->conv-> 4 ->pool-> 2
    batch = 2

    key = jax.random.PRNGKey(0)
    k_param, k_x = jax.random.split(key)
    params = init_params(k_param, config, input_shp)
    flat_params = prepare_params(params, config, input_shp, batch)  # one-time re-layout
    forward = make_pallas_forward(config, input_shp, batch)

    # image-like uint8-range input, NCHW as in the PyTorch module
    x = jax.random.randint(k_x, (batch,) + input_shp, 0, 256, jnp.int32).astype(jnp.float32)

    out = forward(flat_params, x)
    out = jax.block_until_ready(out)
    assert out.shape == (batch, config.num_class), out.shape

    ref = jax.block_until_ready(forward_reference(params, x, config))
    scale = float(jnp.max(jnp.abs(ref))) + 1e-6
    if not np.allclose(np.asarray(out), np.asarray(ref), rtol=5e-2, atol=5e-2 * scale):
        raise AssertionError("Pallas output does not match JAX reference")

    print("KERNEL_OK")
</pallas_src>

<mosaic_0001>
module attributes {stable_mosaic.version = 11 : i64} {
  func.func @kernel(%arg0: memref<392x128xf32, #tpu.memory_space<vmem>>, %arg1: memref<128x128xbf16, #tpu.memory_space<vmem>>, %arg2: memref<1x128xf32, #tpu.memory_space<vmem>>, %arg3: memref<128x128xbf16, #tpu.memory_space<vmem>>, %arg4: memref<1x128xf32, #tpu.memory_space<vmem>>, %arg5: memref<128x128xbf16, #tpu.memory_space<vmem>>, %arg6: memref<1x128xf32, #tpu.memory_space<vmem>>, %arg7: memref<128x128xbf16, #tpu.memory_space<vmem>>, %arg8: memref<1x128xf32, #tpu.memory_space<vmem>>, %arg9: memref<2x128xf32, #tpu.memory_space<vmem>>, %arg10: memref<362x128xf32, #tpu.memory_space<vmem>>, %arg11: memref<72x128xf32, #tpu.memory_space<vmem>>, %arg12: memref<58x128xf32, #tpu.memory_space<vmem>>, %arg13: memref<8x128xf32, #tpu.memory_space<vmem>>) attributes {dimension_semantics = [], scalar_prefetch = 0 : i64, scratch_operands = 4 : i64, tpu.core_type = #tpu.core_type<tc>} {
    %0 = tpu.iota {dimensions = array<i32: 1>} : vector<1x128xi32>
    %c0 = arith.constant 0 : index
    %c0_0 = arith.constant 0 : index
    %1 = vector.load %arg0[%c0, %c0_0] : memref<392x128xf32, #tpu.memory_space<vmem>>, vector<362x128xf32>
    %c0_i32 = arith.constant 0 : i32
    %2 = vector.broadcast %c0_i32 : i32 to vector<1x128xi32>
    %3 = arith.cmpi sge, %0, %2 : vector<1x128xi32>
    %c4_i32 = arith.constant 4 : i32
    %4 = vector.broadcast %c4_i32 : i32 to vector<1x128xi32>
    %5 = arith.cmpi slt, %0, %4 : vector<1x128xi32>
    %6 = arith.andi %3, %5 : vector<1x128xi1>
    %cst = arith.constant 0.000000e+00 : f32
    %7 = vector.shape_cast %6 : vector<1x128xi1> to vector<1x128xi1>
    %8 = vector.broadcast %7 : vector<1x128xi1> to vector<362x128xi1>
    %9 = vector.broadcast %cst : f32 to vector<362x128xf32>
    %10 = arith.select %8, %1, %9 : vector<362x128xi1>, vector<362x128xf32>
    %c1 = arith.constant 1 : index
    %c0_1 = arith.constant 0 : index
    %11 = vector.load %arg0[%c1, %c0_1] : memref<392x128xf32, #tpu.memory_space<vmem>>, vector<362x128xf32>
    %c4_i32_2 = arith.constant 4 : i32
    %12 = vector.broadcast %c4_i32_2 : i32 to vector<1x128xi32>
    %13 = arith.cmpi sge, %0, %12 : vector<1x128xi32>
    %c8_i32 = arith.constant 8 : i32
    %14 = vector.broadcast %c8_i32 : i32 to vector<1x128xi32>
    %15 = arith.cmpi slt, %0, %14 : vector<1x128xi32>
    %16 = arith.andi %13, %15 : vector<1x128xi1>
    %cst_3 = arith.constant 0.000000e+00 : f32
    %17 = vector.shape_cast %16 : vector<1x128xi1> to vector<1x128xi1>
    %18 = vector.broadcast %17 : vector<1x128xi1> to vector<362x128xi1>
    %19 = vector.broadcast %cst_3 : f32 to vector<362x128xf32>
    %20 = arith.select %18, %11, %19 : vector<362x128xi1>, vector<362x128xf32>
    %21 = arith.addf %10, %20 : vector<362x128xf32>
    %c2 = arith.constant 2 : index
    %c0_4 = arith.constant 0 : index
    %22 = vector.load %arg0[%c2, %c0_4] : memref<392x128xf32, #tpu.memory_space<vmem>>, vector<362x128xf32>
    %c8_i32_5 = arith.constant 8 : i32
    %23 = vector.broadcast %c8_i32_5 : i32 to vector<1x128xi32>
    %24 = arith.cmpi sge, %0, %23 : vector<1x128xi32>
    %c12_i32 = arith.constant 12 : i32
    %25 = vector.broadcast %c12_i32 : i32 to vector<1x128xi32>
    %26 = arith.cmpi slt, %0, %25 : vector<1x128xi32>
    %27 = arith.andi %24, %26 : vector<1x128xi1>
    %cst_6 = arith.constant 0.000000e+00 : f32
    %28 = vector.shape_cast %27 : vector<1x128xi1> to vector<1x128xi1>
    %29 = vector.broadcast %28 : vector<1x128xi1> to vector<362x128xi1>
    %30 = vector.broadcast %cst_6 : f32 to vector<362x128xf32>
    %31 = arith.select %29, %22, %30 : vector<362x128xi1>, vector<362x128xf32>
    %32 = arith.addf %21, %31 : vector<362x128xf32>
    %c14 = arith.constant 14 : index
    %c0_7 = arith.constant 0 : index
    %33 = vector.load %arg0[%c14, %c0_7] : memref<392x128xf32, #tpu.memory_space<vmem>>, vector<362x128xf32>
    %c12_i32_8 = arith.constant 12 : i32
    %34 = vector.broadcast %c12_i32_8 : i32 to vector<1x128xi32>
    %35 = arith.cmpi sge, %0, %34 : vector<1x128xi32>
    %c16_i32 = arith.constant 16 : i32
    %36 = vector.broadcast %c16_i32 : i32 to vector<1x128xi32>
    %37 = arith.cmpi slt, %0, %36 : vector<1x128xi32>
    %38 = arith.andi %35, %37 : vector<1x128xi1>
    %cst_9 = arith.constant 0.000000e+00 : f32
    %39 = vector.shape_cast %38 : vector<1x128xi1> to vector<1x128xi1>
    %40 = vector.broadcast %39 : vector<1x128xi1> to vector<362x128xi1>
    %41 = vector.broadcast %cst_9 : f32 to vector<362x128xf32>
    %42 = arith.select %40, %33, %41 : vector<362x128xi1>, vector<362x128xf32>
    %43 = arith.addf %32, %42 : vector<362x128xf32>
    %c15 = arith.constant 15 : index
    %c0_10 = arith.constant 0 : index
    %44 = vector.load %arg0[%c15, %c0_10] : memref<392x128xf32, #tpu.memory_space<vmem>>, vector<362x128xf32>
    %c16_i32_11 = arith.constant 16 : i32
    %45 = vector.broadcast %c16_i32_11 : i32 to vector<1x128xi32>
    %46 = arith.cmpi sge, %0, %45 : vector<1x128xi32>
    %c20_i32 = arith.constant 20 : i32
    %47 = vector.broadcast %c20_i32 : i32 to vector<1x128xi32>
    %48 = arith.cmpi slt, %0, %47 : vector<1x128xi32>
    %49 = arith.andi %46, %48 : vector<1x128xi1>
    %cst_12 = arith.constant 0.000000e+00 : f32
    %50 = vector.shape_cast %49 : vector<1x128xi1> to vector<1x128xi1>
    %51 = vector.broadcast %50 : vector<1x128xi1> to vector<362x128xi1>
    %52 = vector.broadcast %cst_12 : f32 to vector<362x128xf32>
    %53 = arith.select %51, %44, %52 : vector<362x128xi1>, vector<362x128xf32>
    %54 = arith.addf %43, %53 : vector<362x128xf32>
    %c16 = arith.constant 16 : index
    %c0_13 = arith.constant 0 : index
    %55 = vector.load %arg0[%c16, %c0_13] : memref<392x128xf32, #tpu.memory_space<vmem>>, vector<362x128xf32>
    %c20_i32_14 = arith.constant 20 : i32
    %56 = vector.broadcast %c20_i32_14 : i32 to vector<1x128xi32>
    %57 = arith.cmpi sge, %0, %56 : vector<1x128xi32>
    %c24_i32 = arith.constant 24 : i32
    %58 = vector.broadcast %c24_i32 : i32 to vector<1x128xi32>
    %59 = arith.cmpi slt, %0, %58 : vector<1x128xi32>
    %60 = arith.andi %57, %59 : vector<1x128xi1>
    %cst_15 = arith.constant 0.000000e+00 : f32
    %61 = vector.shape_cast %60 : vector<1x128xi1> to vector<1x128xi1>
    %62 = vector.broadcast %61 : vector<1x128xi1> to vector<362x128xi1>
    %63 = vector.broadcast %cst_15 : f32 to vector<362x128xf32>
    %64 = arith.select %62, %55, %63 : vector<362x128xi1>, vector<362x128xf32>
    %65 = arith.addf %54, %64 : vector<362x128xf32>
    %c28 = arith.constant 28 : index
    %c0_16 = arith.constant 0 : index
    %66 = vector.load %arg0[%c28, %c0_16] : memref<392x128xf32, #tpu.memory_space<vmem>>, vector<362x128xf32>
    %c24_i32_17 = arith.constant 24 : i32
    %67 = vector.broadcast %c24_i32_17 : i32 to vector<1x128xi32>
    %68 = arith.cmpi sge, %0, %67 : vector<1x128xi32>
    %c28_i32 = arith.constant 28 : i32
    %69 = vector.broadcast %c28_i32 : i32 to vector<1x128xi32>
    %70 = arith.cmpi slt, %0, %69 : vector<1x128xi32>
    %71 = arith.andi %68, %70 : vector<1x128xi1>
    %cst_18 = arith.constant 0.000000e+00 : f32
    %72 = vector.shape_cast %71 : vector<1x128xi1> to vector<1x128xi1>
    %73 = vector.broadcast %72 : vector<1x128xi1> to vector<362x128xi1>
    %74 = vector.broadcast %cst_18 : f32 to vector<362x128xf32>
    %75 = arith.select %73, %66, %74 : vector<362x128xi1>, vector<362x128xf32>
    %76 = arith.addf %65, %75 : vector<362x128xf32>
    %c29 = arith.constant 29 : index
    %c0_19 = arith.constant 0 : index
    %77 = vector.load %arg0[%c29, %c0_19] : memref<392x128xf32, #tpu.memory_space<vmem>>, vector<362x128xf32>
    %c28_i32_20 = arith.constant 28 : i32
    %78 = vector.broadcast %c28_i32_20 : i32 to vector<1x128xi32>
    %79 = arith.cmpi sge, %0, %78 : vector<1x128xi32>
    %c32_i32 = arith.constant 32 : i32
    %80 = vector.broadcast %c32_i32 : i32 to vector<1x128xi32>
    %81 = arith.cmpi slt, %0, %80 : vector<1x128xi32>
    %82 = arith.andi %79, %81 : vector<1x128xi1>
    %cst_21 = arith.constant 0.000000e+00 : f32
    %83 = vector.shape_cast %82 : vector<1x128xi1> to vector<1x128xi1>
    %84 = vector.broadcast %83 : vector<1x128xi1> to vector<362x128xi1>
    %85 = vector.broadcast %cst_21 : f32 to vector<362x128xf32>
    %86 = arith.select %84, %77, %85 : vector<362x128xi1>, vector<362x128xf32>
    %87 = arith.addf %76, %86 : vector<362x128xf32>
    %c30 = arith.constant 30 : index
    %c0_22 = arith.constant 0 : index
    %88 = vector.load %arg0[%c30, %c0_22] : memref<392x128xf32, #tpu.memory_space<vmem>>, vector<362x128xf32>
    %c32_i32_23 = arith.constant 32 : i32
    %89 = vector.broadcast %c32_i32_23 : i32 to vector<1x128xi32>
    %90 = arith.cmpi sge, %0, %89 : vector<1x128xi32>
    %c36_i32 = arith.constant 36 : i32
    %91 = vector.broadcast %c36_i32 : i32 to vector<1x128xi32>
    %92 = arith.cmpi slt, %0, %91 : vector<1x128xi32>
    %93 = arith.andi %90, %92 : vector<1x128xi1>
    %cst_24 = arith.constant 0.000000e+00 : f32
    %94 = vector.shape_cast %93 : vector<1x128xi1> to vector<1x128xi1>
    %95 = vector.broadcast %94 : vector<1x128xi1> to vector<362x128xi1>
    %96 = vector.broadcast %cst_24 : f32 to vector<362x128xf32>
    %97 = arith.select %95, %88, %96 : vector<362x128xi1>, vector<362x128xf32>
    %98 = arith.addf %87, %97 : vector<362x128xf32>
    %99 = arith.truncf %98 : vector<362x128xf32> to vector<362x128xbf16>
    %c0_25 = arith.constant 0 : index
    %c0_26 = arith.constant 0 : index
    %100 = vector.load %arg1[%c0_25, %c0_26] : memref<128x128xbf16, #tpu.memory_space<vmem>>, vector<128x128xbf16>
    %cst_27 = arith.constant dense<0.000000e+00> : vector<362x128xf32>
    %101 = tpu.matmul %99, %100, %cst_27 {dimension_numbers = #tpu.dot_dimension_numbers<[1], [0], [0], [1], [0, 0, 1, 1], [], []>} : vector<362x128xbf16>, vector<128x128xbf16>, vector<362x128xf32> -> vector<362x128xf32>
    %c0_28 = arith.constant 0 : index
    %c0_29 = arith.constant 0 : index
    %102 = vector.load %arg2[%c0_28, %c0_29] : memref<1x128xf32, #tpu.memory_space<vmem>>, vector<1x128xf32>
    %103 = vector.broadcast %102 : vector<1x128xf32> to vector<362x128xf32>
    %104 = arith.addf %101, %103 : vector<362x128xf32>
    %cst_30 = arith.constant 0.000000e+00 : f32
    %105 = vector.broadcast %cst_30 : f32 to vector<362x128xf32>
    %106 = arith.maximumf %104, %105 : vector<362x128xf32>
    %c0_31 = arith.constant 0 : index
    %c0_32 = arith.constant 0 : index
    %107 = vector.load %arg10[%c0_31, %c0_32] : memref<362x128xf32, #tpu.memory_space<vmem>>, vector<362x128xf32>
    tpu.vector_store %arg10[%c0_31, %c0_32], %106 {strides = array<i32>} : memref<362x128xf32, #tpu.memory_space<vmem>>, vector<362x128xf32>,
    %c0_33 = arith.constant 0 : index
    %c0_34 = arith.constant 0 : index
    %108 = tpu.strided_load %arg10[%c0_33, %c0_34] {strides = array<i32: 2, 1>} : memref<362x128xf32, #tpu.memory_space<vmem>>, vector<6x128xf32>
    %c1_35 = arith.constant 1 : index
    %c0_36 = arith.constant 0 : index
    %109 = tpu.strided_load %arg10[%c1_35, %c0_36] {strides = array<i32: 2, 1>} : memref<362x128xf32, #tpu.memory_space<vmem>>, vector<6x128xf32>
    %c14_37 = arith.constant 14 : index
    %c0_38 = arith.constant 0 : index
    %110 = tpu.strided_load %arg10[%c14_37, %c0_38] {strides = array<i32: 2, 1>} : memref<362x128xf32, #tpu.memory_space<vmem>>, vector<6x128xf32>
    %c15_39 = arith.constant 15 : index
    %c0_40 = arith.constant 0 : index
    %111 = tpu.strided_load %arg10[%c15_39, %c0_40] {strides = array<i32: 2, 1>} : memref<362x128xf32, #tpu.memory_space<vmem>>, vector<6x128xf32>
    %112 = arith.maximumf %108, %109 : vector<6x128xf32>
    %113 = arith.maximumf %110, %111 : vector<6x128xf32>
    %114 = arith.maximumf %112, %113 : vector<6x128xf32>
    %c0_41 = arith.constant 0 : index
    %c0_42 = arith.constant 0 : index
    %115 = vector.load %arg11[%c0_41, %c0_42] : memref<72x128xf32, #tpu.memory_space<vmem>>, vector<6x128xf32>
    tpu.vector_store %arg11[%c0_41, %c0_42], %114 {strides = array<i32>} : memref<72x128xf32, #tpu.memory_space<vmem>>, vector<6x128xf32>,
    %c28_43 = arith.constant 28 : index
    %c0_44 = arith.constant 0 : index
    %116 = tpu.strided_load %arg10[%c28_43, %c0_44] {strides = array<i32: 2, 1>} : memref<362x128xf32, #tpu.memory_space<vmem>>, vector<6x128xf32>
    %c29_45 = arith.constant 29 : index
    %c0_46 = arith.constant 0 : index
    %117 = tpu.strided_load %arg10[%c29_45, %c0_46] {strides = array<i32: 2, 1>} : memref<362x128xf32, #tpu.memory_space<vmem>>, vector<6x128xf32>
    %c42 = arith.constant 42 : index
    %c0_47 = arith.constant 0 : index
    %118 = tpu.strided_load %arg10[%c42, %c0_47] {strides = array<i32: 2, 1>} : memref<362x128xf32, #tpu.memory_space<vmem>>, vector<6x128xf32>
    %c43 = arith.constant 43 : index
    %c0_48 = arith.constant 0 : index
    %119 = tpu.strided_load %arg10[%c43, %c0_48] {strides = array<i32: 2, 1>} : memref<362x128xf32, #tpu.memory_space<vmem>>, vector<6x128xf32>
    %120 = arith.maximumf %116, %117 : vector<6x128xf32>
    %121 = arith.maximumf %118, %119 : vector<6x128xf32>
    %122 = arith.maximumf %120, %121 : vector<6x128xf32>
    %c6 = arith.constant 6 : index
    %c0_49 = arith.constant 0 : index
    %123 = vector.load %arg11[%c6, %c0_49] : memref<72x128xf32, #tpu.memory_space<vmem>>, vector<6x128xf32>
    tpu.vector_store %arg11[%c6, %c0_49], %122 {strides = array<i32>} : memref<72x128xf32, #tpu.memory_space<vmem>>, vector<6x128xf32>,
    %c56 = arith.constant 56 : index
    %c0_50 = arith.constant 0 : index
    %124 = tpu.strided_load %arg10[%c56, %c0_50] {strides = array<i32: 2, 1>} : memref<362x128xf32, #tpu.memory_space<vmem>>, vector<6x128xf32>
    %c57 = arith.constant 57 : index
    %c0_51 = arith.constant 0 : index
    %125 = tpu.strided_load %arg10[%c57, %c0_51] {strides = array<i32: 2, 1>} : memref<362x128xf32, #tpu.memory_space<vmem>>, vector<6x128xf32>
    %c70 = arith.constant 70 : index
    %c0_52 = arith.constant 0 : index
    %126 = tpu.strided_load %arg10[%c70, %c0_52] {strides = array<i32: 2, 1>} : memref<362x128xf32, #tpu.memory_space<vmem>>, vector<6x128xf32>
    %c71 = arith.constant 71 : index
    %c0_53 = arith.constant 0 : index
    %127 = tpu.strided_load %arg10[%c71, %c0_53] {strides = array<i32: 2, 1>} : memref<362x128xf32, #tpu.memory_space<vmem>>, vector<6x128xf32>
    %128 = arith.maximumf %124, %125 : vector<6x128xf32>
    %129 = arith.maximumf %126, %127 : vector<6x128xf32>
    %130 = arith.maximumf %128, %129 : vector<6x128xf32>
    %c12 = arith.constant 12 : index
    %c0_54 = arith.constant 0 : index
    %131 = vector.load %arg11[%c12, %c0_54] : memref<72x128xf32, #tpu.memory_space<vmem>>, vector<6x128xf32>
    tpu.vector_store %arg11[%c12, %c0_54], %130 {strides = array<i32>} : memref<72x128xf32, #tpu.memory_space<vmem>>, vector<6x128xf32>,
    %c84 = arith.constant 84 : index
    %c0_55 = arith.constant 0 : index
    %132 = tpu.strided_load %arg10[%c84, %c0_55] {strides = array<i32: 2, 1>} : memref<362x128xf32, #tpu.memory_space<vmem>>, vector<6x128xf32>
    %c85 = arith.constant 85 : index
    %c0_56 = arith.constant 0 : index
    %133 = tpu.strided_load %arg10[%c85, %c0_56] {strides = array<i32: 2, 1>} : memref<362x128xf32, #tpu.memory_space<vmem>>, vector<6x128xf32>
    %c98 = arith.constant 98 : index
    %c0_57 = arith.constant 0 : index
    %134 = tpu.strided_load %arg10[%c98, %c0_57] {strides = array<i32: 2, 1>} : memref<362x128xf32, #tpu.memory_space<vmem>>, vector<6x128xf32>
    %c99 = arith.constant 99 : index
    %c0_58 = arith.constant 0 : index
    %135 = tpu.strided_load %arg10[%c99, %c0_58] {strides = array<i32: 2, 1>} : memref<362x128xf32, #tpu.memory_space<vmem>>, vector<6x128xf32>
    %136 = arith.maximumf %132, %133 : vector<6x128xf32>
    %137 = arith.maximumf %134, %135 : vector<6x128xf32>
    %138 = arith.maximumf %136, %137 : vector<6x128xf32>
    %c18 = arith.constant 18 : index
    %c0_59 = arith.constant 0 : index
    %139 = vector.load %arg11[%c18, %c0_59] : memref<72x128xf32, #tpu.memory_space<vmem>>, vector<6x128xf32>
    tpu.vector_store %arg11[%c18, %c0_59], %138 {strides = array<i32>} : memref<72x128xf32, #tpu.memory_space<vmem>>, vector<6x128xf32>,
    %c112 = arith.constant 112 : index
    %c0_60 = arith.constant 0 : index
    %140 = tpu.strided_load %arg10[%c112, %c0_60] {strides = array<i32: 2, 1>} : memref<362x128xf32, #tpu.memory_space<vmem>>, vector<6x128xf32>
    %c113 = arith.constant 113 : index
    %c0_61 = arith.constant 0 : index
    %141 = tpu.strided_load %arg10[%c113, %c0_61] {strides = array<i32: 2, 1>} : memref<362x128xf32, #tpu.memory_space<vmem>>, vector<6x128xf32>
    %c126 = arith.constant 126 : index
    %c0_62 = arith.constant 0 : index
    %142 = tpu.strided_load %arg10[%c126, %c0_62] {strides = array<i32: 2, 1>} : memref<362x128xf32, #tpu.memory_space<vmem>>, vector<6x128xf32>
    %c127 = arith.constant 127 : index
    %c0_63 = arith.constant 0 : index
    %143 = tpu.strided_load %arg10[%c127, %c0_63] {strides = array<i32: 2, 1>} : memref<362x128xf32, #tpu.memory_space<vmem>>, vector<6x128xf32>
    %144 = arith.maximumf %140, %141 : vector<6x128xf32>
    %145 = arith.maximumf %142, %143 : vector<6x128xf32>
    %146 = arith.maximumf %144, %145 : vector<6x128xf32>
    %c24 = arith.constant 24 : index
    %c0_64 = arith.constant 0 : index
    %147 = vector.load %arg11[%c24, %c0_64] : memref<72x128xf32, #tpu.memory_space<vmem>>, vector<6x128xf32>
    tpu.vector_store %arg11[%c24, %c0_64], %146 {strides = array<i32>} : memref<72x128xf32, #tpu.memory_space<vmem>>, vector<6x128xf32>,
    %c140 = arith.constant 140 : index
    %c0_65 = arith.constant 0 : index
    %148 = tpu.strided_load %arg10[%c140, %c0_65] {strides = array<i32: 2, 1>} : memref<362x128xf32, #tpu.memory_space<vmem>>, vector<6x128xf32>
    %c141 = arith.constant 141 : index
    %c0_66 = arith.constant 0 : index
    %149 = tpu.strided_load %arg10[%c141, %c0_66] {strides = array<i32: 2, 1>} : memref<362x128xf32, #tpu.memory_space<vmem>>, vector<6x128xf32>
    %c154 = arith.constant 154 : index
    %c0_67 = arith.constant 0 : index
    %150 = tpu.strided_load %arg10[%c154, %c0_67] {strides = array<i32: 2, 1>} : memref<362x128xf32, #tpu.memory_space<vmem>>, vector<6x128xf32>
    %c155 = arith.constant 155 : index
    %c0_68 = arith.constant 0 : index
    %151 = tpu.strided_load %arg10[%c155, %c0_68] {strides = array<i32: 2, 1>} : memref<362x128xf32, #tpu.memory_space<vmem>>, vector<6x128xf32>
    %152 = arith.maximumf %148, %149 : vector<6x128xf32>
    %153 = arith.maximumf %150, %151 : vector<6x128xf32>
    %154 = arith.maximumf %152, %153 : vector<6x128xf32>
    %c30_69 = arith.constant 30 : index
    %c0_70 = arith.constant 0 : index
    %155 = vector.load %arg11[%c30_69, %c0_70] : memref<72x128xf32, #tpu.memory_space<vmem>>, vector<6x128xf32>
    tpu.vector_store %arg11[%c30_69, %c0_70], %154 {strides = array<i32>} : memref<72x128xf32, #tpu.memory_space<vmem>>, vector<6x128xf32>,
    %c196 = arith.constant 196 : index
    %c0_71 = arith.constant 0 : index
    %156 = tpu.strided_load %arg10[%c196, %c0_71] {strides = array<i32: 2, 1>} : memref<362x128xf32, #tpu.memory_space<vmem>>, vector<6x128xf32>
    %c197 = arith.constant 197 : index
    %c0_72 = arith.constant 0 : index
    %157 = tpu.strided_load %arg10[%c197, %c0_72] {strides = array<i32: 2, 1>} : memref<362x128xf32, #tpu.memory_space<vmem>>, vector<6x128xf32>
    %c210 = arith.constant 210 : index
    %c0_73 = arith.constant 0 : index
    %158 = tpu.strided_load %arg10[%c210, %c0_73] {strides = array<i32: 2, 1>} : memref<362x128xf32, #tpu.memory_space<vmem>>, vector<6x128xf32>
    %c211 = arith.constant 211 : index
    %c0_74 = arith.constant 0 : index
    %159 = tpu.strided_load %arg10[%c211, %c0_74] {strides = array<i32: 2, 1>} : memref<362x128xf32, #tpu.memory_space<vmem>>, vector<6x128xf32>
    %160 = arith.maximumf %156, %157 : vector<6x128xf32>
    %161 = arith.maximumf %158, %159 : vector<6x128xf32>
    %162 = arith.maximumf %160, %161 : vector<6x128xf32>
    %c36 = arith.constant 36 : index
    %c0_75 = arith.constant 0 : index
    %163 = vector.load %arg11[%c36, %c0_75] : memref<72x128xf32, #tpu.memory_space<vmem>>, vector<6x128xf32>
    tpu.vector_store %arg11[%c36, %c0_75], %162 {strides = array<i32>} : memref<72x128xf32, #tpu.memory_space<vmem>>, vector<6x128xf32>,
    %c224 = arith.constant 224 : index
    %c0_76 = arith.constant 0 : index
    %164 = tpu.strided_load %arg10[%c224, %c0_76] {strides = array<i32: 2, 1>} : memref<362x128xf32, #tpu.memory_space<vmem>>, vector<6x128xf32>
    %c225 = arith.constant 225 : index
    %c0_77 = arith.constant 0 : index
    %165 = tpu.strided_load %arg10[%c225, %c0_77] {strides = array<i32: 2, 1>} : memref<362x128xf32, #tpu.memory_space<vmem>>, vector<6x128xf32>
    %c238 = arith.constant 238 : index
    %c0_78 = arith.constant 0 : index
    %166 = tpu.strided_load %arg10[%c238, %c0_78] {strides = array<i32: 2, 1>} : memref<362x128xf32, #tpu.memory_space<vmem>>, vector<6x128xf32>
    %c239 = arith.constant 239 : index
    %c0_79 = arith.constant 0 : index
    %167 = tpu.strided_load %arg10[%c239, %c0_79] {strides = array<i32: 2, 1>} : memref<362x128xf32, #tpu.memory_space<vmem>>, vector<6x128xf32>
    %168 = arith.maximumf %164, %165 : vector<6x128xf32>
    %169 = arith.maximumf %166, %167 : vector<6x128xf32>
    %170 = arith.maximumf %168, %169 : vector<6x128xf32>
    %c42_80 = arith.constant 42 : index
    %c0_81 = arith.constant 0 : index
    %171 = vector.load %arg11[%c42_80, %c0_81] : memref<72x128xf32, #tpu.memory_space<vmem>>, vector<6x128xf32>
    tpu.vector_store %arg11[%c42_80, %c0_81], %170 {strides = array<i32>} : memref<72x128xf32, #tpu.memory_space<vmem>>, vector<6x128xf32>,
    %c252 = arith.constant 252 : index
    %c0_82 = arith.constant 0 : index
    %172 = tpu.strided_load %arg10[%c252, %c0_82] {strides = array<i32: 2, 1>} : memref<362x128xf32, #tpu.memory_space<vmem>>, vector<6x128xf32>
    %c253 = arith.constant 253 : index
    %c0_83 = arith.constant 0 : index
    %173 = tpu.strided_load %arg10[%c253, %c0_83] {strides = array<i32: 2, 1>} : memref<362x128xf32, #tpu.memory_space<vmem>>, vector<6x128xf32>
    %c266 = arith.constant 266 : index
    %c0_84 = arith.constant 0 : index
    %174 = tpu.strided_load %arg10[%c266, %c0_84] {strides = array<i32: 2, 1>} : memref<362x128xf32, #tpu.memory_space<vmem>>, vector<6x128xf32>
    %c267 = arith.constant 267 : index
    %c0_85 = arith.constant 0 : index
    %175 = tpu.strided_load %arg10[%c267, %c0_85] {strides = array<i32: 2, 1>} : memref<362x128xf32, #tpu.memory_space<vmem>>, vector<6x128xf32>
    %176 = arith.maximumf %172, %173 : vector<6x128xf32>
    %177 = arith.maximumf %174, %175 : vector<6x128xf32>
    %178 = arith.maximumf %176, %177 : vector<6x128xf32>
    %c48 = arith.constant 48 : index
    %c0_86 = arith.constant 0 : index
    %179 = vector.load %arg11[%c48, %c0_86] : memref<72x128xf32, #tpu.memory_space<vmem>>, vector<6x128xf32>
    tpu.vector_store %arg11[%c48, %c0_86], %178 {strides = array<i32>} : memref<72x128xf32, #tpu.memory_space<vmem>>, vector<6x128xf32>,
    %c280 = arith.constant 280 : index
    %c0_87 = arith.constant 0 : index
    %180 = tpu.strided_load %arg10[%c280, %c0_87] {strides = array<i32: 2, 1>} : memref<362x128xf32, #tpu.memory_space<vmem>>, vector<6x128xf32>
    %c281 = arith.constant 281 : index
    %c0_88 = arith.constant 0 : index
    %181 = tpu.strided_load %arg10[%c281, %c0_88] {strides = array<i32: 2, 1>} : memref<362x128xf32, #tpu.memory_space<vmem>>, vector<6x128xf32>
    %c294 = arith.constant 294 : index
    %c0_89 = arith.constant 0 : index
    %182 = tpu.strided_load %arg10[%c294, %c0_89] {strides = array<i32: 2, 1>} : memref<362x128xf32, #tpu.memory_space<vmem>>, vector<6x128xf32>
    %c295 = arith.constant 295 : index
    %c0_90 = arith.constant 0 : index
    %183 = tpu.strided_load %arg10[%c295, %c0_90] {strides = array<i32: 2, 1>} : memref<362x128xf32, #tpu.memory_space<vmem>>, vector<6x128xf32>
    %184 = arith.maximumf %180, %181 : vector<6x128xf32>
    %185 = arith.maximumf %182, %183 : vector<6x128xf32>
    %186 = arith.maximumf %184, %185 : vector<6x128xf32>
    %c54 = arith.constant 54 : index
    %c0_91 = arith.constant 0 : index
    %187 = vector.load %arg11[%c54, %c0_91] : memref<72x128xf32, #tpu.memory_space<vmem>>, vector<6x128xf32>
    tpu.vector_store %arg11[%c54, %c0_91], %186 {strides = array<i32>} : memref<72x128xf32, #tpu.memory_space<vmem>>, vector<6x128xf32>,
    %c308 = arith.constant 308 : index
    %c0_92 = arith.constant 0 : index
    %188 = tpu.strided_load %arg10[%c308, %c0_92] {strides = array<i32: 2, 1>} : memref<362x128xf32, #tpu.memory_space<vmem>>, vector<6x128xf32>
    %c309 = arith.constant 309 : index
    %c0_93 = arith.constant 0 : index
    %189 = tpu.strided_load %arg10[%c309, %c0_93] {strides = array<i32: 2, 1>} : memref<362x128xf32, #tpu.memory_space<vmem>>, vector<6x128xf32>
    %c322 = arith.constant 322 : index
    %c0_94 = arith.constant 0 : index
    %190 = tpu.strided_load %arg10[%c322, %c0_94] {strides = array<i32: 2, 1>} : memref<362x128xf32, #tpu.memory_space<vmem>>, vector<6x128xf32>
    %c323 = arith.constant 323 : index
    %c0_95 = arith.constant 0 : index
    %191 = tpu.strided_load %arg10[%c323, %c0_95] {strides = array<i32: 2, 1>} : memref<362x128xf32, #tpu.memory_space<vmem>>, vector<6x128xf32>
    %192 = arith.maximumf %188, %189 : vector<6x128xf32>
    %193 = arith.maximumf %190, %191 : vector<6x128xf32>
    %194 = arith.maximumf %192, %193 : vector<6x128xf32>
    %c60 = arith.constant 60 : index
    %c0_96 = arith.constant 0 : index
    %195 = vector.load %arg11[%c60, %c0_96] : memref<72x128xf32, #tpu.memory_space<vmem>>, vector<6x128xf32>
    tpu.vector_store %arg11[%c60, %c0_96], %194 {strides = array<i32>} : memref<72x128xf32, #tpu.memory_space<vmem>>, vector<6x128xf32>,
    %c336 = arith.constant 336 : index
    %c0_97 = arith.constant 0 : index
    %196 = tpu.strided_load %arg10[%c336, %c0_97] {strides = array<i32: 2, 1>} : memref<362x128xf32, #tpu.memory_space<vmem>>, vector<6x128xf32>
    %c337 = arith.constant 337 : index
    %c0_98 = arith.constant 0 : index
    %197 = tpu.strided_load %arg10[%c337, %c0_98] {strides = array<i32: 2, 1>} : memref<362x128xf32, #tpu.memory_space<vmem>>, vector<6x128xf32>
    %c350 = arith.constant 350 : index
    %c0_99 = arith.constant 0 : index
    %198 = tpu.strided_load %arg10[%c350, %c0_99] {strides = array<i32: 2, 1>} : memref<362x128xf32, #tpu.memory_space<vmem>>, vector<6x128xf32>
    %c351 = arith.constant 351 : index
    %c0_100 = arith.constant 0 : index
    %199 = tpu.strided_load %arg10[%c351, %c0_100] {strides = array<i32: 2, 1>} : memref<362x128xf32, #tpu.memory_space<vmem>>, vector<6x128xf32>
    %200 = arith.maximumf %196, %197 : vector<6x128xf32>
    %201 = arith.maximumf %198, %199 : vector<6x128xf32>
    %202 = arith.maximumf %200, %201 : vector<6x128xf32>
    %c66 = arith.constant 66 : index
    %c0_101 = arith.constant 0 : index
    %203 = vector.load %arg11[%c66, %c0_101] : memref<72x128xf32, #tpu.memory_space<vmem>>, vector<6x128xf32>
    tpu.vector_store %arg11[%c66, %c0_101], %202 {strides = array<i32>} : memref<72x128xf32, #tpu.memory_space<vmem>>, vector<6x128xf32>,
    %c0_102 = arith.constant 0 : index
    %c0_103 = arith.constant 0 : index
    %204 = vector.load %arg11[%c0_102, %c0_103] : memref<72x128xf32, #tpu.memory_space<vmem>>, vector<58x128xf32>
    %c0_i32_104 = arith.constant 0 : i32
    %205 = vector.broadcast %c0_i32_104 : i32 to vector<1x128xi32>
    %206 = arith.cmpi sge, %0, %205 : vector<1x128xi32>
    %c4_i32_105 = arith.constant 4 : i32
    %207 = vector.broadcast %c4_i32_105 : i32 to vector<1x128xi32>
    %208 = arith.cmpi slt, %0, %207 : vector<1x128xi32>
    %209 = arith.andi %206, %208 : vector<1x128xi1>
    %cst_106 = arith.constant 0.000000e+00 : f32
    %210 = vector.shape_cast %209 : vector<1x128xi1> to vector<1x128xi1>
    %211 = vector.broadcast %210 : vector<1x128xi1> to vector<58x128xi1>
    %212 = vector.broadcast %cst_106 : f32 to vector<58x128xf32>
    %213 = arith.select %211, %204, %212 : vector<58x128xi1>, vector<58x128xf32>
    %c1_107 = arith.constant 1 : index
    %c0_108 = arith.constant 0 : index
    %214 = vector.load %arg11[%c1_107, %c0_108] : memref<72x128xf32, #tpu.memory_space<vmem>>, vector<58x128xf32>
    %c4_i32_109 = arith.constant 4 : i32
    %215 = vector.broadcast %c4_i32_109 : i32 to vector<1x128xi32>
    %216 = arith.cmpi sge, %0, %215 : vector<1x128xi32>
    %c8_i32_110 = arith.constant 8 : i32
    %217 = vector.broadcast %c8_i32_110 : i32 to vector<1x128xi32>
    %218 = arith.cmpi slt, %0, %217 : vector<1x128xi32>
    %219 = arith.andi %216, %218 : vector<1x128xi1>
    %cst_111 = arith.constant 0.000000e+00 : f32
    %220 = vector.shape_cast %219 : vector<1x128xi1> to vector<1x128xi1>
    %221 = vector.broadcast %220 : vector<1x128xi1> to vector<58x128xi1>
    %222 = vector.broadcast %cst_111 : f32 to vector<58x128xf32>
    %223 = arith.select %221, %214, %222 : vector<58x128xi1>, vector<58x128xf32>
    %224 = arith.addf %213, %223 : vector<58x128xf32>
    %c2_112 = arith.constant 2 : index
    %c0_113 = arith.constant 0 : index
    %225 = vector.load %arg11[%c2_112, %c0_113] : memref<72x128xf32, #tpu.memory_space<vmem>>, vector<58x128xf32>
    %c8_i32_114 = arith.constant 8 : i32
    %226 = vector.broadcast %c8_i32_114 : i32 to vector<1x128xi32>
    %227 = arith.cmpi sge, %0, %226 : vector<1x128xi32>
    %c12_i32_115 = arith.constant 12 : i32
    %228 = vector.broadcast %c12_i32_115 : i32 to vector<1x128xi32>
    %229 = arith.cmpi slt, %0, %228 : vector<1x128xi32>
    %230 = arith.andi %227, %229 : vector<1x128xi1>
    %cst_116 = arith.constant 0.000000e+00 : f32
    %231 = vector.shape_cast %230 : vector<1x128xi1> to vector<1x128xi1>
    %232 = vector.broadcast %231 : vector<1x128xi1> to vector<58x128xi1>
    %233 = vector.broadcast %cst_116 : f32 to vector<58x128xf32>
    %234 = arith.select %232, %225, %233 : vector<58x128xi1>, vector<58x128xf32>
    %235 = arith.addf %224, %234 : vector<58x128xf32>
    %c6_117 = arith.constant 6 : index
    %c0_118 = arith.constant 0 : index
    %236 = vector.load %arg11[%c6_117, %c0_118] : memref<72x128xf32, #tpu.memory_space<vmem>>, vector<58x128xf32>
    %c12_i32_119 = arith.constant 12 : i32
    %237 = vector.broadcast %c12_i32_119 : i32 to vector<1x128xi32>
    %238 = arith.cmpi sge, %0, %237 : vector<1x128xi32>
    %c16_i32_120 = arith.constant 16 : i32
    %239 = vector.broadcast %c16_i32_120 : i32 to vector<1x128xi32>
    %240 = arith.cmpi slt, %0, %239 : vector<1x128xi32>
    %241 = arith.andi %238, %240 : vector<1x128xi1>
    %cst_121 = arith.constant 0.000000e+00 : f32
    %242 = vector.shape_cast %241 : vector<1x128xi1> to vector<1x128xi1>
    %243 = vector.broadcast %242 : vector<1x128xi1> to vector<58x128xi1>
    %244 = vector.broadcast %cst_121 : f32 to vector<58x128xf32>
    %245 = arith.select %243, %236, %244 : vector<58x128xi1>, vector<58x128xf32>
    %246 = arith.addf %235, %245 : vector<58x128xf32>
    %c7 = arith.constant 7 : index
    %c0_122 = arith.constant 0 : index
    %247 = vector.load %arg11[%c7, %c0_122] : memref<72x128xf32, #tpu.memory_space<vmem>>, vector<58x128xf32>
    %c16_i32_123 = arith.constant 16 : i32
    %248 = vector.broadcast %c16_i32_123 : i32 to vector<1x128xi32>
    %249 = arith.cmpi sge, %0, %248 : vector<1x128xi32>
    %c20_i32_124 = arith.constant 20 : i32
    %250 = vector.broadcast %c20_i32_124 : i32 to vector<1x128xi32>
    %251 = arith.cmpi slt, %0, %250 : vector<1x128xi32>
    %252 = arith.andi %249, %251 : vector<1x128xi1>
    %cst_125 = arith.constant 0.000000e+00 : f32
    %253 = vector.shape_cast %252 : vector<1x128xi1> to vector<1x128xi1>
    %254 = vector.broadcast %253 : vector<1x128xi1> to vector<58x128xi1>
    %255 = vector.broadcast %cst_125 : f32 to vector<58x128xf32>
    %256 = arith.select %254, %247, %255 : vector<58x128xi1>, vector<58x128xf32>
    %257 = arith.addf %246, %256 : vector<58x128xf32>
    %c8 = arith.constant 8 : index
    %c0_126 = arith.constant 0 : index
    %258 = vector.load %arg11[%c8, %c0_126] : memref<72x128xf32, #tpu.memory_space<vmem>>, vector<58x128xf32>
    %c20_i32_127 = arith.constant 20 : i32
    %259 = vector.broadcast %c20_i32_127 : i32 to vector<1x128xi32>
    %260 = arith.cmpi sge, %0, %259 : vector<1x128xi32>
    %c24_i32_128 = arith.constant 24 : i32
    %261 = vector.broadcast %c24_i32_128 : i32 to vector<1x128xi32>
    %262 = arith.cmpi slt, %0, %261 : vector<1x128xi32>
    %263 = arith.andi %260, %262 : vector<1x128xi1>
    %cst_129 = arith.constant 0.000000e+00 : f32
    %264 = vector.shape_cast %263 : vector<1x128xi1> to vector<1x128xi1>
    %265 = vector.broadcast %264 : vector<1x128xi1> to vector<58x128xi1>
    %266 = vector.broadcast %cst_129 : f32 to vector<58x128xf32>
    %267 = arith.select %265, %258, %266 : vector<58x128xi1>, vector<58x128xf32>
    %268 = arith.addf %257, %267 : vector<58x128xf32>
    %c12_130 = arith.constant 12 : index
    %c0_131 = arith.constant 0 : index
    %269 = vector.load %arg11[%c12_130, %c0_131] : memref<72x128xf32, #tpu.memory_space<vmem>>, vector<58x128xf32>
    %c24_i32_132 = arith.constant 24 : i32
    %270 = vector.broadcast %c24_i32_132 : i32 to vector<1x128xi32>
    %271 = arith.cmpi sge, %0, %270 : vector<1x128xi32>
    %c28_i32_133 = arith.constant 28 : i32
    %272 = vector.broadcast %c28_i32_133 : i32 to vector<1x128xi32>
    %273 = arith.cmpi slt, %0, %272 : vector<1x128xi32>
    %274 = arith.andi %271, %273 : vector<1x128xi1>
    %cst_134 = arith.constant 0.000000e+00 : f32
    %275 = vector.shape_cast %274 : vector<1x128xi1> to vector<1x128xi1>
    %276 = vector.broadcast %275 : vector<1x128xi1> to vector<58x128xi1>
    %277 = vector.broadcast %cst_134 : f32 to vector<58x128xf32>
    %278 = arith.select %276, %269, %277 : vector<58x128xi1>, vector<58x128xf32>
    %279 = arith.addf %268, %278 : vector<58x128xf32>
    %c13 = arith.constant 13 : index
    %c0_135 = arith.constant 0 : index
    %280 = vector.load %arg11[%c13, %c0_135] : memref<72x128xf32, #tpu.memory_space<vmem>>, vector<58x128xf32>
    %c28_i32_136 = arith.constant 28 : i32
    %281 = vector.broadcast %c28_i32_136 : i32 to vector<1x128xi32>
    %282 = arith.cmpi sge, %0, %281 : vector<1x128xi32>
    %c32_i32_137 = arith.constant 32 : i32
    %283 = vector.broadcast %c32_i32_137 : i32 to vector<1x128xi32>
    %284 = arith.cmpi slt, %0, %283 : vector<1x128xi32>
    %285 = arith.andi %282, %284 : vector<1x128xi1>
    %cst_138 = arith.constant 0.000000e+00 : f32
    %286 = vector.shape_cast %285 : vector<1x128xi1> to vector<1x128xi1>
    %287 = vector.broadcast %286 : vector<1x128xi1> to vector<58x128xi1>
    %288 = vector.broadcast %cst_138 : f32 to vector<58x128xf32>
    %289 = arith.select %287, %280, %288 : vector<58x128xi1>, vector<58x128xf32>
    %290 = arith.addf %279, %289 : vector<58x128xf32>
    %c14_139 = arith.constant 14 : index
    %c0_140 = arith.constant 0 : index
    %291 = vector.load %arg11[%c14_139, %c0_140] : memref<72x128xf32, #tpu.memory_space<vmem>>, vector<58x128xf32>
    %c32_i32_141 = arith.constant 32 : i32
    %292 = vector.broadcast %c32_i32_141 : i32 to vector<1x128xi32>
    %293 = arith.cmpi sge, %0, %292 : vector<1x128xi32>
    %c36_i32_142 = arith.constant 36 : i32
    %294 = vector.broadcast %c36_i32_142 : i32 to vector<1x128xi32>
    %295 = arith.cmpi slt, %0, %294 : vector<1x128xi32>
    %296 = arith.andi %293, %295 : vector<1x128xi1>
    %cst_143 = arith.constant 0.000000e+00 : f32
    %297 = vector.shape_cast %296 : vector<1x128xi1> to vector<1x128xi1>
    %298 = vector.broadcast %297 : vector<1x128xi1> to vector<58x128xi1>
    %299 = vector.broadcast %cst_143 : f32 to vector<58x128xf32>
    %300 = arith.select %298, %291, %299 : vector<58x128xi1>, vector<58x128xf32>
    %301 = arith.addf %290, %300 : vector<58x128xf32>
    %302 = arith.truncf %301 : vector<58x128xf32> to vector<58x128xbf16>
    %c0_144 = arith.constant 0 : index
    %c0_145 = arith.constant 0 : index
    %303 = vector.load %arg3[%c0_144, %c0_145] : memref<128x128xbf16, #tpu.memory_space<vmem>>, vector<128x128xbf16>
    %cst_146 = arith.constant dense<0.000000e+00> : vector<58x128xf32>
    %304 = tpu.matmul %302, %303, %cst_146 {dimension_numbers = #tpu.dot_dimension_numbers<[1], [0], [0], [1], [0, 0, 1, 1], [], []>} : vector<58x128xbf16>, vector<128x128xbf16>, vector<58x128xf32> -> vector<58x128xf32>
    %c0_147 = arith.constant 0 : index
    %c0_148 = arith.constant 0 : index
    %305 = vector.load %arg4[%c0_147, %c0_148] : memref<1x128xf32, #tpu.memory_space<vmem>>, vector<1x128xf32>
    %306 = vector.broadcast %305 : vector<1x128xf32> to vector<58x128xf32>
    %307 = arith.addf %304, %306 : vector<58x128xf32>
    %cst_149 = arith.constant 0.000000e+00 : f32
    %308 = vector.broadcast %cst_149 : f32 to vector<58x128xf32>
    %309 = arith.maximumf %307, %308 : vector<58x128xf32>
    %c0_150 = arith.constant 0 : index
    %c0_151 = arith.constant 0 : index
    %310 = vector.load %arg12[%c0_150, %c0_151] : memref<58x128xf32, #tpu.memory_space<vmem>>, vector<58x128xf32>
    tpu.vector_store %arg12[%c0_150, %c0_151], %309 {strides = array<i32>} : memref<58x128xf32, #tpu.memory_space<vmem>>, vector<58x128xf32>,
    %c0_152 = arith.constant 0 : index
    %c0_153 = arith.constant 0 : index
    %311 = tpu.strided_load %arg12[%c0_152, %c0_153] {strides = array<i32: 2, 1>} : memref<58x128xf32, #tpu.memory_space<vmem>>, vector<2x128xf32>
    %c1_154 = arith.constant 1 : index
    %c0_155 = arith.constant 0 : index
    %312 = tpu.strided_load %arg12[%c1_154, %c0_155] {strides = array<i32: 2, 1>} : memref<58x128xf32, #tpu.memory_space<vmem>>, vector<2x128xf32>
    %c6_156 = arith.constant 6 : index
    %c0_157 = arith.constant 0 : index
    %313 = tpu.strided_load %arg12[%c6_156, %c0_157] {strides = array<i32: 2, 1>} : memref<58x128xf32, #tpu.memory_space<vmem>>, vector<2x128xf32>
    %c7_158 = arith.constant 7 : index
    %c0_159 = arith.constant 0 : index
    %314 = tpu.strided_load %arg12[%c7_158, %c0_159] {strides = array<i32: 2, 1>} : memref<58x128xf32, #tpu.memory_space<vmem>>, vector<2x128xf32>
    %315 = arith.maximumf %311, %312 : vector<2x128xf32>
    %316 = arith.maximumf %313, %314 : vector<2x128xf32>
    %317 = arith.maximumf %315, %316 : vector<2x128xf32>
    %c0_160 = arith.constant 0 : index
    %c0_161 = arith.constant 0 : index
    %318 = vector.load %arg13[%c0_160, %c0_161] : memref<8x128xf32, #tpu.memory_space<vmem>>, vector<2x128xf32>
    tpu.vector_store %arg13[%c0_160, %c0_161], %317 {strides = array<i32>} : memref<8x128xf32, #tpu.memory_space<vmem>>, vector<2x128xf32>,
    %c12_162 = arith.constant 12 : index
    %c0_163 = arith.constant 0 : index
    %319 = tpu.strided_load %arg12[%c12_162, %c0_163] {strides = array<i32: 2, 1>} : memref<58x128xf32, #tpu.memory_space<vmem>>, vector<2x128xf32>
    %c13_164 = arith.constant 13 : index
    %c0_165 = arith.constant 0 : index
    %320 = tpu.strided_load %arg12[%c13_164, %c0_165] {strides = array<i32: 2, 1>} : memref<58x128xf32, #tpu.memory_space<vmem>>, vector<2x128xf32>
    %c18_166 = arith.constant 18 : index
    %c0_167 = arith.constant 0 : index
    %321 = tpu.strided_load %arg12[%c18_166, %c0_167] {strides = array<i32: 2, 1>} : memref<58x128xf32, #tpu.memory_space<vmem>>, vector<2x128xf32>
    %c19 = arith.constant 19 : index
    %c0_168 = arith.constant 0 : index
    %322 = tpu.strided_load %arg12[%c19, %c0_168] {strides = array<i32: 2, 1>} : memref<58x128xf32, #tpu.memory_space<vmem>>, vector<2x128xf32>
    %323 = arith.maximumf %319, %320 : vector<2x128xf32>
    %324 = arith.maximumf %321, %322 : vector<2x128xf32>
    %325 = arith.maximumf %323, %324 : vector<2x128xf32>
    %c2_169 = arith.constant 2 : index
    %c0_170 = arith.constant 0 : index
    %326 = vector.load %arg13[%c2_169, %c0_170] : memref<8x128xf32, #tpu.memory_space<vmem>>, vector<2x128xf32>
    tpu.vector_store %arg13[%c2_169, %c0_170], %325 {strides = array<i32>} : memref<8x128xf32, #tpu.memory_space<vmem>>, vector<2x128xf32>,
    %c36_171 = arith.constant 36 : index
    %c0_172 = arith.constant 0 : index
    %327 = tpu.strided_load %arg12[%c36_171, %c0_172] {strides = array<i32: 2, 1>} : memref<58x128xf32, #tpu.memory_space<vmem>>, vector<2x128xf32>
    %c37 = arith.constant 37 : index
    %c0_173 = arith.constant 0 : index
    %328 = tpu.strided_load %arg12[%c37, %c0_173] {strides = array<i32: 2, 1>} : memref<58x128xf32, #tpu.memory_space<vmem>>, vector<2x128xf32>
    %c42_174 = arith.constant 42 : index
    %c0_175 = arith.constant 0 : index
    %329 = tpu.strided_load %arg12[%c42_174, %c0_175] {strides = array<i32: 2, 1>} : memref<58x128xf32, #tpu.memory_space<vmem>>, vector<2x128xf32>
    %c43_176 = arith.constant 43 : index
    %c0_177 = arith.constant 0 : index
    %330 = tpu.strided_load %arg12[%c43_176, %c0_177] {strides = array<i32: 2, 1>} : memref<58x128xf32, #tpu.memory_space<vmem>>, vector<2x128xf32>
    %331 = arith.maximumf %327, %328 : vector<2x128xf32>
    %332 = arith.maximumf %329, %330 : vector<2x128xf32>
    %333 = arith.maximumf %331, %332 : vector<2x128xf32>
    %c4 = arith.constant 4 : index
    %c0_178 = arith.constant 0 : index
    %334 = vector.load %arg13[%c4, %c0_178] : memref<8x128xf32, #tpu.memory_space<vmem>>, vector<2x128xf32>
    tpu.vector_store %arg13[%c4, %c0_178], %333 {strides = array<i32>} : memref<8x128xf32, #tpu.memory_space<vmem>>, vector<2x128xf32>,
    %c48_179 = arith.constant 48 : index
    %c0_180 = arith.constant 0 : index
    %335 = tpu.strided_load %arg12[%c48_179, %c0_180] {strides = array<i32: 2, 1>} : memref<58x128xf32, #tpu.memory_space<vmem>>, vector<2x128xf32>
    %c49 = arith.constant 49 : index
    %c0_181 = arith.constant 0 : index
    %336 = tpu.strided_load %arg12[%c49, %c0_181] {strides = array<i32: 2, 1>} : memref<58x128xf32, #tpu.memory_space<vmem>>, vector<2x128xf32>
    %c54_182 = arith.constant 54 : index
    %c0_183 = arith.constant 0 : index
    %337 = tpu.strided_load %arg12[%c54_182, %c0_183] {strides = array<i32: 2, 1>} : memref<58x128xf32, #tpu.memory_space<vmem>>, vector<2x128xf32>
    %c55 = arith.constant 55 : index
    %c0_184 = arith.constant 0 : index
    %338 = tpu.strided_load %arg12[%c55, %c0_184] {strides = array<i32: 2, 1>} : memref<58x128xf32, #tpu.memory_space<vmem>>, vector<2x128xf32>
    %339 = arith.maximumf %335, %336 : vector<2x128xf32>
    %340 = arith.maximumf %337, %338 : vector<2x128xf32>
    %341 = arith.maximumf %339, %340 : vector<2x128xf32>
    %c6_185 = arith.constant 6 : index
    %c0_186 = arith.constant 0 : index
    %342 = vector.load %arg13[%c6_185, %c0_186] : memref<8x128xf32, #tpu.memory_space<vmem>>, vector<2x128xf32>
    tpu.vector_store %arg13[%c6_185, %c0_186], %341 {strides = array<i32>} : memref<8x128xf32, #tpu.memory_space<vmem>>, vector<2x128xf32>,
    %c0_187 = arith.constant 0 : index
    %c0_188 = arith.constant 0 : index
    %343 = tpu.strided_load %arg13[%c0_187, %c0_188] {strides = array<i32: 4, 1>} : memref<8x128xf32, #tpu.memory_space<vmem>>, vector<2x128xf32>
    %c0_i32_189 = arith.constant 0 : i32
    %344 = vector.broadcast %c0_i32_189 : i32 to vector<1x128xi32>
    %345 = arith.cmpi sge, %0, %344 : vector<1x128xi32>
    %c8_i32_190 = arith.constant 8 : i32
    %346 = vector.broadcast %c8_i32_190 : i32 to vector<1x128xi32>
    %347 = arith.cmpi slt, %0, %346 : vector<1x128xi32>
    %348 = arith.andi %345, %347 : vector<1x128xi1>
    %cst_191 = arith.constant 0.000000e+00 : f32
    %349 = vector.shape_cast %348 : vector<1x128xi1> to vector<1x128xi1>
    %350 = vector.broadcast %349 : vector<1x128xi1> to vector<2x128xi1>
    %351 = vector.broadcast %cst_191 : f32 to vector<2x128xf32>
    %352 = arith.select %350, %343, %351 : vector<2x128xi1>, vector<2x128xf32>
    %c1_192 = arith.constant 1 : index
    %c0_193 = arith.constant 0 : index
    %353 = tpu.strided_load %arg13[%c1_192, %c0_193] {strides = array<i32: 4, 1>} : memref<8x128xf32, #tpu.memory_space<vmem>>, vector<2x128xf32>
    %c8_i32_194 = arith.constant 8 : i32
    %354 = vector.broadcast %c8_i32_194 : i32 to vector<1x128xi32>
    %355 = arith.cmpi sge, %0, %354 : vector<1x128xi32>
    %c16_i32_195 = arith.constant 16 : i32
    %356 = vector.broadcast %c16_i32_195 : i32 to vector<1x128xi32>
    %357 = arith.cmpi slt, %0, %356 : vector<1x128xi32>
    %358 = arith.andi %355, %357 : vector<1x128xi1>
    %cst_196 = arith.constant 0.000000e+00 : f32
    %359 = vector.shape_cast %358 : vector<1x128xi1> to vector<1x128xi1>
    %360 = vector.broadcast %359 : vector<1x128xi1> to vector<2x128xi1>
    %361 = vector.broadcast %cst_196 : f32 to vector<2x128xf32>
    %362 = arith.select %360, %353, %361 : vector<2x128xi1>, vector<2x128xf32>
    %363 = arith.addf %352, %362 : vector<2x128xf32>
    %c2_197 = arith.constant 2 : index
    %c0_198 = arith.constant 0 : index
    %364 = tpu.strided_load %arg13[%c2_197, %c0_198] {strides = array<i32: 4, 1>} : memref<8x128xf32, #tpu.memory_space<vmem>>, vector<2x128xf32>
    %c16_i32_199 = arith.constant 16 : i32
    %365 = vector.broadcast %c16_i32_199 : i32 to vector<1x128xi32>
    %366 = arith.cmpi sge, %0, %365 : vector<1x128xi32>
    %c24_i32_200 = arith.constant 24 : i32
    %367 = vector.broadcast %c24_i32_200 : i32 to vector<1x128xi32>
    %368 = arith.cmpi slt, %0, %367 : vector<1x128xi32>
    %369 = arith.andi %366, %368 : vector<1x128xi1>
    %cst_201 = arith.constant 0.000000e+00 : f32
    %370 = vector.shape_cast %369 : vector<1x128xi1> to vector<1x128xi1>
    %371 = vector.broadcast %370 : vector<1x128xi1> to vector<2x128xi1>
    %372 = vector.broadcast %cst_201 : f32 to vector<2x128xf32>
    %373 = arith.select %371, %364, %372 : vector<2x128xi1>, vector<2x128xf32>
    %374 = arith.addf %363, %373 : vector<2x128xf32>
    %c3 = arith.constant 3 : index
    %c0_202 = arith.constant 0 : index
    %375 = tpu.strided_load %arg13[%c3, %c0_202] {strides = array<i32: 4, 1>} : memref<8x128xf32, #tpu.memory_space<vmem>>, vector<2x128xf32>
    %c24_i32_203 = arith.constant 24 : i32
    %376 = vector.broadcast %c24_i32_203 : i32 to vector<1x128xi32>
    %377 = arith.cmpi sge, %0, %376 : vector<1x128xi32>
    %c32_i32_204 = arith.constant 32 : i32
    %378 = vector.broadcast %c32_i32_204 : i32 to vector<1x128xi32>
    %379 = arith.cmpi slt, %0, %378 : vector<1x128xi32>
    %380 = arith.andi %377, %379 : vector<1x128xi1>
    %cst_205 = arith.constant 0.000000e+00 : f32
    %381 = vector.shape_cast %380 : vector<1x128xi1> to vector<1x128xi1>
    %382 = vector.broadcast %381 : vector<1x128xi1> to vector<2x128xi1>
    %383 = vector.broadcast %cst_205 : f32 to vector<2x128xf32>
    %384 = arith.select %382, %375, %383 : vector<2x128xi1>, vector<2x128xf32>
    %385 = arith.addf %374, %384 : vector<2x128xf32>
    %386 = arith.truncf %385 : vector<2x128xf32> to vector<2x128xbf16>
    %c0_206 = arith.constant 0 : index
    %c0_207 = arith.constant 0 : index
    %387 = vector.load %arg5[%c0_206, %c0_207] : memref<128x128xbf16, #tpu.memory_space<vmem>>, vector<128x128xbf16>
    %cst_208 = arith.constant dense<0.000000e+00> : vector<2x128xf32>
    %388 = tpu.matmul %386, %387, %cst_208 {dimension_numbers = #tpu.dot_dimension_numbers<[1], [0], [0], [1], [0, 0, 1, 1], [], []>} : vector<2x128xbf16>, vector<128x128xbf16>, vector<2x128xf32> -> vector<2x128xf32>
    %c0_209 = arith.constant 0 : index
    %c0_210 = arith.constant 0 : index
    %389 = vector.load %arg6[%c0_209, %c0_210] : memref<1x128xf32, #tpu.memory_space<vmem>>, vector<1x128xf32>
    %390 = vector.broadcast %389 : vector<1x128xf32> to vector<2x128xf32>
    %391 = arith.addf %388, %390 : vector<2x128xf32>
    %cst_211 = arith.constant 0.000000e+00 : f32
    %392 = vector.broadcast %cst_211 : f32 to vector<2x128xf32>
    %393 = arith.maximumf %391, %392 : vector<2x128xf32>
    %394 = arith.truncf %393 : vector<2x128xf32> to vector<2x128xbf16>
    %c0_212 = arith.constant 0 : index
    %c0_213 = arith.constant 0 : index
    %395 = vector.load %arg7[%c0_212, %c0_213] : memref<128x128xbf16, #tpu.memory_space<vmem>>, vector<128x128xbf16>
    %cst_214 = arith.constant dense<0.000000e+00> : vector<2x128xf32>
    %396 = tpu.matmul %394, %395, %cst_214 {dimension_numbers = #tpu.dot_dimension_numbers<[1], [0], [0], [1], [0, 0, 1, 1], [], []>} : vector<2x128xbf16>, vector<128x128xbf16>, vector<2x128xf32> -> vector<2x128xf32>
    %c0_215 = arith.constant 0 : index
    %c0_216 = arith.constant 0 : index
    %397 = vector.load %arg8[%c0_215, %c0_216] : memref<1x128xf32, #tpu.memory_space<vmem>>, vector<1x128xf32>
    %398 = vector.broadcast %397 : vector<1x128xf32> to vector<2x128xf32>
    %399 = arith.addf %396, %398 : vector<2x128xf32>
    %c0_217 = arith.constant 0 : index
    %c0_218 = arith.constant 0 : index
    %400 = vector.load %arg9[%c0_217, %c0_218] : memref<2x128xf32, #tpu.memory_space<vmem>>, vector<2x128xf32>
    tpu.vector_store %arg9[%c0_217, %c0_218], %399 {strides = array<i32>} : memref<2x128xf32, #tpu.memory_space<vmem>>, vector<2x128xf32>,
    return
  }
}

</mosaic_0001>

<bundles_post_ra>
// kernel: tile.7
= control target key start
LH: loop header
LB: loop body
LE: loop exit
PB: predicated region body
PF: predicated region fallthrough
CT: control target
= control target key end

     0   :  { %vm182_vm0 = vcmask 64512   ;;  %s670_s0 = inlined_call_operand.vmem [shape: f32[392,9,4], index: 0, kind: input, shape index: {}]   ;;  %s671_s1 = inlined_call_operand.vmem [shape: f32[392,36], index: 1, kind: output, shape index: {}]  }
   0x1   :  { %v365_v0 = vld [vmem:[%s670_s0 + $0x8c] sm:$0xf]  ;;  %v366_v1 = vld [vmem:[%s670_s0 + $0x88] sm:$0xf]  ;;  %v367_v2 = vld [vmem:[%s670_s0 + $0x84] sm:$0xf] }
   0x2   :  { %8 = vst [vmem:[#allocation0 + $0x118] sm:$0xf] %v365_v0  ;;  %13 = vst [vmem:[#allocation0 + $0x110] sm:$0xf] %v366_v1  ;;  %v368_v3 = vld [vmem:[%s670_s0 + $0x80] sm:$0xf] }
   0x3   :  { %18 = vst [vmem:[#allocation0 + $0x108] sm:$0xf] %v367_v2  ;;  %v369_v4 = vld [vmem:[%s670_s0 + $0x7c] sm:$0xf]  ;;  %v370_v5 = vld [vmem:[%s670_s0 + $0x78] sm:$0xf] }
   0x4   :  { %23 = vst [vmem:[#allocation0 + $0x100] sm:$0xf] %v368_v3  ;;  %28 = vst [vmem:[#allocation0 + $0xf8] sm:$0xf] %v369_v4  ;;  %v371_v6 = vld [vmem:[%s670_s0 + $0x74] sm:$0xf] }
   0x5   :  { %33 = vst [vmem:[#allocation0 + $0xf0] sm:$0xf] %v370_v5  ;;  %v372_v7 = vld [vmem:[%s670_s0 + $0x70] sm:$0xf]  ;;  %v373_v8 = vld [vmem:[%s670_s0 + $0x6c] sm:$0xf] }
   0x6   :  { %38 = vst [vmem:[#allocation0 + $0xe8] sm:$0xf] %v371_v6  ;;  %43 = vst [vmem:[#allocation0 + $0xe0] sm:$0xf] %v372_v7  ;;  %v374_v9 = vld [vmem:[%s670_s0 + $0x68] sm:$0xf] }
   0x7   :  { %48 = vst [vmem:[#allocation0 + $0xd8] sm:$0xf] %v373_v8  ;;  %v375_v10 = vld [vmem:[%s670_s0 + $0x64] sm:$0xf]  ;;  %v376_v11 = vld [vmem:[%s670_s0 + $0x60] sm:$0xf] }
   0x8   :  { %53 = vst [vmem:[#allocation0 + $0xd0] sm:$0xf] %v374_v9  ;;  %58 = vst [vmem:[#allocation0 + $0xc8] sm:$0xf] %v375_v10  ;;  %v377_v12 = vld [vmem:[%s670_s0 + $0x5c] sm:$0xf] }
   0x9   :  { %63 = vst [vmem:[#allocation0 + $0xc0] sm:$0xf] %v376_v11  ;;  %v378_v13 = vld [vmem:[%s670_s0 + $0x58] sm:$0xf]  ;;  %v379_v14 = vld [vmem:[%s670_s0 + $0x54] sm:$0xf] }
   0xa   :  { %68 = vst [vmem:[#allocation0 + $0xb8] sm:$0xf] %v377_v12  ;;  %73 = vst [vmem:[#allocation0 + $0xb0] sm:$0xf] %v378_v13  ;;  %v380_v15 = vld [vmem:[%s670_s0 + $0x50] sm:$0xf] }
   0xb   :  { %78 = vst [vmem:[#allocation0 + $0xa8] sm:$0xf] %v379_v14  ;;  %v381_v16 = vld [vmem:[%s670_s0 + $0x4c] sm:$0xf]  ;;  %v382_v17 = vld [vmem:[%s670_s0 + $0x48] sm:$0xf] }
   0xc   :  { %83 = vst [vmem:[#allocation0 + $0xa0] sm:$0xf] %v380_v15  ;;  %88 = vst [vmem:[#allocation0 + $0x98] sm:$0xf] %v381_v16  ;;  %v383_v18 = vld [vmem:[%s670_s0 + $0x44] sm:$0xf] }
   0xd   :  { %93 = vst [vmem:[#allocation0 + $0x90] sm:$0xf] %v382_v17  ;;  %v384_v19 = vld [vmem:[%s670_s0 + $0x40] sm:$0xf]  ;;  %v385_v20 = vld [vmem:[%s670_s0 + $0x3c] sm:$0xf] }
   0xe   :  { %98 = vst [vmem:[#allocation0 + $0x88] sm:$0xf] %v383_v18  ;;  %103 = vst [vmem:[#allocation0 + $0x80] sm:$0xf] %v384_v19  ;;  %v386_v21 = vld [vmem:[%s670_s0 + $0x38] sm:$0xf] }
   0xf   :  { %108 = vst [vmem:[#allocation0 + $0x78] sm:$0xf] %v385_v20  ;;  %v387_v22 = vld [vmem:[%s670_s0 + $0x34] sm:$0xf]  ;;  %v388_v23 = vld [vmem:[%s670_s0 + $0x30] sm:$0xf] }
  0x10   :  { %113 = vst [vmem:[#allocation0 + $0x70] sm:$0xf] %v386_v21  ;;  %118 = vst [vmem:[#allocation0 + $0x68] sm:$0xf] %v387_v22  ;;  %v389_v24 = vld [vmem:[%s670_s0 + $0x2c] sm:$0xf] }
  0x11   :  { %123 = vst [vmem:[#allocation0 + $0x60] sm:$0xf] %v388_v23  ;;  %v390_v25 = vld [vmem:[%s670_s0 + $0x28] sm:$0xf]  ;;  %v391_v26 = vld [vmem:[%s670_s0 + $0x24] sm:$0xf] }
  0x12   :  { %128 = vst [vmem:[#allocation0 + $0x58] sm:$0xf] %v389_v24  ;;  %133 = vst [vmem:[#allocation0 + $0x50] sm:$0xf] %v390_v25  ;;  %v392_v27 = vld [vmem:[%s670_s0 + $0x20] sm:$0xf] }
  0x13   :  { %138 = vst [vmem:[#allocation0 + $0x48] sm:$0xf] %v391_v26  ;;  %v393_v28 = vld [vmem:[%s670_s0 + $0x1c] sm:$0xf]  ;;  %v394_v29 = vld [vmem:[%s670_s0 + $0x18] sm:$0xf] }
  0x14   :  { %143 = vst [vmem:[#allocation0 + $0x40] sm:$0xf] %v392_v27  ;;  %148 = vst [vmem:[#allocation0 + $0x38] sm:$0xf] %v393_v28  ;;  %v395_v30 = vld [vmem:[%s670_s0 + $0x14] sm:$0xf] }
  0x15   :  { %153 = vst [vmem:[#allocation0 + $0x30] sm:$0xf] %v394_v29  ;;  %v396_v31 = vld [vmem:[%s670_s0 + $0x10] sm:$0xf]  ;;  %v397_v32 = vld [vmem:[%s670_s0 + $0xc] sm:$0xf] }
  0x16   :  { %158 = vst [vmem:[#allocation0 + $0x28] sm:$0xf] %v395_v30  ;;  %163 = vst [vmem:[#allocation0 + $0x20] sm:$0xf] %v396_v31  ;;  %v398_v33 = vld [vmem:[%s670_s0 + $0x8] sm:$0xf] }
  0x17   :  { %168 = vst [vmem:[#allocation0 + $0x18] sm:$0xf] %v397_v32  ;;  %v399_v34 = vld [vmem:[%s670_s0 + $0x4] sm:$0xf]  ;;  %v178_v35 = vld [vmem:[%s670_s0] sm:$0xf] }
  0x18   :  { %173 = vst [vmem:[#allocation0 + $0x10] sm:$0xf] %v398_v33  ;;  %177 = vst [vmem:[#allocation0 + $0x8] sm:$0xf] %v399_v34  ;;  %v206_v36 = vld [vmem:[#allocation0 + $0xb8] sm:$0xf]  }
  0x19   :  { %179 = vst [vmem:[#allocation0] sm:$0xf] %v178_v35  ;;  %v211_v37 = vld [vmem:[#allocation0 + $0xd8] sm:$0xf]   ;;  %405 = vst.msk [vmem:[%s671_s1 + $0x5c] sm:$0xf] %vm182_vm0, %v206_v36  }
  0x1a   :  { %v201_v38 = vld [vmem:[#allocation0 + $0x98] sm:$0xf]   ;;  %406 = vst.msk [vmem:[%s671_s1 + $0x78] sm:$0xf] %vm182_vm0, %v211_v37   ;;  %v272_v42 = vld [vmem:[#allocation0 + $0x80] sm:$0xf]  }
  0x1b   :  { %v216_v39 = vld [vmem:[#allocation0 + $0xf8] sm:$0xf]   ;;  %404 = vst.msk [vmem:[%s671_s1 + $0x58] sm:$0xf] %vm182_vm0, %v201_v38   ;;  %v276_v43 = vld [vmem:[#allocation0 + $0x88] sm:$0xf]  }
  0x1c   :  { %v221_v40 = vld [vmem:[#allocation0 + $0x118] sm:$0xf]   ;;  %407 = vst.msk [vmem:[%s671_s1 + $0x7c] sm:$0xf] %vm182_vm0, %v216_v39   ;;  %v260_v44 = vld [vmem:[#allocation0 + $0x60] sm:$0xf]  }
  0x1d   :  { %v196_v41 = vld [vmem:[#allocation0 + $0x78] sm:$0xf]   ;;  %408 = vst.msk [vmem:[%s671_s1 + $0x98] sm:$0xf] %vm182_vm0, %v221_v40   ;;  %v264_v45 = vld [vmem:[#allocation0 + $0x68] sm:$0xf]  }
  0x1e   :  { %403 = vst.msk [vmem:[%s671_s1 + $0x3c] sm:$0xf] %vm182_vm0, %v196_v41   ;;  %v268_v46 = vld [vmem:[#allocation0 + $0x70] sm:$0xf]   ;;  %420 = vst [vmem:[%s671_s1 + $0x40] sm:$0xf] %v272_v42  }
  0x1f   :  { %421 = vst [vmem:[%s671_s1 + $0x48] sm:$0xf] %v276_v43   ;;  %v191_v47 = vld [vmem:[#allocation0 + $0x58] sm:$0xf]   ;;  %v252_v48 = vld [vmem:[#allocation0 + $0x48] sm:$0xf]  }
  0x20   :  { %v256_v49 = vld [vmem:[#allocation0 + $0x50] sm:$0xf]   ;;  %417 = vst [vmem:[%s671_s1 + $0x24] sm:$0xf] %v260_v44   ;;  %418 = vst [vmem:[%s671_s1 + $0x2c] sm:$0xf] %v264_v45  }
  0x21   :  { %419 = vst [vmem:[%s671_s1 + $0x34] sm:$0xf] %v268_v46   ;;  %v186_v50 = vld [vmem:[#allocation0 + $0x38] sm:$0xf]   ;;  %402 = vst.msk [vmem:[%s671_s1 + $0x38] sm:$0xf] %vm182_vm0, %v191_v47  }
  0x22   :  { %v244_v51 = vld [vmem:[#allocation0 + $0x30] sm:$0xf]   ;;  %v248_v52 = vld [vmem:[#allocation0 + $0x40] sm:$0xf]   ;;  %415 = vst [vmem:[%s671_s1 + $0x28] sm:$0xf] %v252_v48  }
  0x23   :  { %416 = vst [vmem:[%s671_s1 + $0x30] sm:$0xf] %v256_v49   ;;  %v181_v53 = vld [vmem:[#allocation0 + $0x18] sm:$0xf]   ;;  %401 = vst.msk [vmem:[%s671_s1 + $0x1c] sm:$0xf] %vm182_vm0, %v186_v50  }
  0x24   :  { %v236_v54 = vld [vmem:[#allocation0 + $0x20] sm:$0xf]   ;;  %v240_v55 = vld [vmem:[#allocation0 + $0x28] sm:$0xf]   ;;  %413 = vst [vmem:[%s671_s1 + $0x14] sm:$0xf] %v244_v51  }
  0x25   :  { %414 = vst [vmem:[%s671_s1 + $0x20] sm:$0xf] %v248_v52   ;;  %400 = vst.msk [vmem:[%s671_s1 + $0x18] sm:$0xf] %vm182_vm0, %v181_v53   ;;  %v225_v56 = vld [vmem:[#allocation0] sm:$0xf]  }
  0x26   :  { %v228_v57 = vld [vmem:[#allocation0 + $0x8] sm:$0xf]   ;;  %v232_v58 = vld [vmem:[#allocation0 + $0x10] sm:$0xf]   ;;  %411 = vst [vmem:[%s671_s1 + $0x4] sm:$0xf] %v236_v54  }
  0x27   :  { %412 = vst [vmem:[%s671_s1 + $0xc] sm:$0xf] %v240_v55   ;;  %226 = vst [vmem:[%s671_s1] sm:$0xf] %v225_v56   ;;  %v280_v59 = vld [vmem:[#allocation0 + $0x90] sm:$0xf]  }
  0x28   :  { %409 = vst [vmem:[%s671_s1 + $0x8] sm:$0xf] %v228_v57   ;;  %410 = vst [vmem:[%s671_s1 + $0x10] sm:$0xf] %v232_v58   ;;  %v284_v60 = vld [vmem:[#allocation0 + $0xa0] sm:$0xf]  }
  0x29   :  { %v288_v61 = vld [vmem:[#allocation0 + $0xa8] sm:$0xf]   ;;  %422 = vst [vmem:[%s671_s1 + $0x50] sm:$0xf] %v280_v59   ;;  %423 = vst [vmem:[%s671_s1 + $0x44] sm:$0xf] %v284_v60  }
  0x2a   :  { %424 = vst [vmem:[%s671_s1 + $0x4c] sm:$0xf] %v288_v61   ;;  %v292_v62 = vld [vmem:[#allocation0 + $0xb0] sm:$0xf]   ;;  %v296_v63 = vld [vmem:[#allocation0 + $0xc0] sm:$0xf]  }
  0x2b   :  { %v300_v0 = vld [vmem:[#allocation0 + $0xc8] sm:$0xf]   ;;  %425 = vst [vmem:[%s671_s1 + $0x54] sm:$0xf] %v292_v62   ;;  %426 = vst [vmem:[%s671_s1 + $0x60] sm:$0xf] %v296_v63  }
  0x2c   :  { %427 = vst [vmem:[%s671_s1 + $0x68] sm:$0xf] %v300_v0   ;;  %v304_v1 = vld [vmem:[#allocation0 + $0xd0] sm:$0xf]   ;;  %v308_v2 = vld [vmem:[#allocation0 + $0xe0] sm:$0xf]  }
  0x2d   :  { %v312_v3 = vld [vmem:[#allocation0 + $0xe8] sm:$0xf]   ;;  %428 = vst [vmem:[%s671_s1 + $0x70] sm:$0xf] %v304_v1   ;;  %429 = vst [vmem:[%s671_s1 + $0x64] sm:$0xf] %v308_v2  }
  0x2e   :  { %430 = vst [vmem:[%s671_s1 + $0x6c] sm:$0xf] %v312_v3   ;;  %v316_v4 = vld [vmem:[#allocation0 + $0xf0] sm:$0xf]   ;;  %v320_v5 = vld [vmem:[#allocation0 + $0x100] sm:$0xf]  }
  0x2f   :  { %v324_v6 = vld [vmem:[#allocation0 + $0x108] sm:$0xf]   ;;  %431 = vst [vmem:[%s671_s1 + $0x74] sm:$0xf] %v316_v4   ;;  %432 = vst [vmem:[%s671_s1 + $0x80] sm:$0xf] %v320_v5  }
  0x30   :  { %433 = vst [vmem:[%s671_s1 + $0x88] sm:$0xf] %v324_v6   ;;  %v328_v7 = vld [vmem:[#allocation0 + $0x110] sm:$0xf]  }
  0x31   :  { %434 = vst [vmem:[%s671_s1 + $0x90] sm:$0xf] %v328_v7  }

// kernel: forward.1
= control target key start
LH: loop header
LB: loop body
LE: loop exit
PB: predicated region body
PF: predicated region fallthrough
CT: control target
= control target key end

     0   :  { %v34_v1 = vlaneseq  ;;  %v2797_v2 = vmov 0.0   ;;  %vm2798_vm0 = vmmov 0   ;;  %s5492_s0 = inlined_call_operand.vmem [shape: f32[392,128], index: 0, kind: input, shape index: {}]   ;;  %s5493_s1 = inlined_call_operand.vmem [shape: bf16[128,128], index: 1, kind: input, shape index: {}]   ;;  %s5494_s2 = inlined_call_operand.vmem [shape: f32[1,128], index: 2, kind: input, shape index: {}]   ;;  %s5495_s3 = inlined_call_operand.vmem [shape: bf16[128,128], index: 3, kind: input, shape index: {}]   ;;  %s5496_s4 = inlined_call_operand.vmem [shape: f32[1,128], index: 4, kind: input, shape index: {}]   ;;  %s5497_s5 = inlined_call_operand.vmem [shape: bf16[128,128], index: 5, kind: input, shape index: {}]   ;;  %s5498_s6 = inlined_call_operand.vmem [shape: f32[1,128], index: 6, kind: input, shape index: {}]   ;;  %s5499_s7 = inlined_call_operand.vmem [shape: bf16[128,128], index: 7, kind: input, shape index: {}]   ;;  %s5500_s8 = inlined_call_operand.vmem [shape: f32[1,128], index: 8, kind: input, shape index: {}]   ;;  %s5501_s9 = inlined_call_operand.hbm [shape: f32[2,128], index: 9, kind: output, shape index: {}]  }
   0x1   :  { %v2739_v0 = vld [vmem:[%s5493_s1] sm:$0xff]   ;;  %2548 = vmatprep.subr.bf16.mxu0 %v2797_v2  ;;  %2720 = vmatprep.subr.bf16.mxu1 %v2797_v2  ;;  %v2740_v3 = vld [vmem:[%s5493_s1 + $0x8] sm:$0xff]   ;;  %v2741_v5 = vld [vmem:[%s5493_s1 + $0x10] sm:$0xff]  }
   0x2   :  { %2549 = vmatpush3.bf16.msra.mxu0 %v2739_v0  ;;  %2564 = vmatprep.mubr.msk.bf16.mxu0 %vm2798_vm0, %v2797_v2  ;;  %v2860_v4 = vand.u32 127, %v34_v1  ;;  %v2742_v6 = vld [vmem:[%s5493_s1 + $0x18] sm:$0xff]   ;;  %v36_v7 = vld [vmem:[%s5492_s0] sm:$0xff]  ;;  %v37_v8 = vld [vmem:[%s5492_s0 + $0x8] sm:$0xff] }
   0x3   :  { %2550 = vmatprep.subr.bf16.mxu0 %v2797_v2  ;;  %2728 = vmatpush3.bf16.msra.mxu1 %v2739_v0  ;;  %v2885_v9 = vld [vmem:[%s5492_s0 + $0x10] sm:$0xff]  ;;  %v2894_v10 = vld [vmem:[%s5492_s0 + $0x18] sm:$0xff]  ;;  %v133_v13 = vld [vmem:[%s5492_s0 + $0x1] sm:$0xff] }
   0x4   :  { %2721 = vmatprep.subr.bf16.mxu1 %v2797_v2  ;;  %2628 = vmatprep.mubr.msk.bf16.mxu1 %vm2798_vm0, %v2797_v2  ;;  %vm83_vm1 = vcmp.lt.s32.totalorder %v2860_v4, 4  ;;  %vm179_vm2 = vcmp.ge.s32.totalorder %v2860_v4, 4  ;;  %vm5502_vm3 = vcmp.lt.s32.totalorder %v2860_v4, 8  ;;  %vm322_vm4 = vcmp.ge.s32.totalorder %v2860_v4, 8  ;;  %v134_v14 = vld [vmem:[%s5492_s0 + $0x9] sm:$0xff]  ;;  %v135_v16 = vld [vmem:[%s5492_s0 + $0x11] sm:$0xff] }
   0x5   :  { %vm323_vm5 = vcmp.lt.s32.totalorder %v2860_v4, 12  ;;  %vm465_vm6 = vcmp.ge.s32.totalorder %v2860_v4, 12  ;;  %v87_v11 = vsel %vm83_vm1, %v36_v7, 0.0  ;;  %v88_v12 = vsel %vm83_vm1, %v37_v8, 0.0  ;;  %v136_v17 = vld [vmem:[%s5492_s0 + $0x19] sm:$0xff]  ;;  %vm2920_vm8 = vmand %vm179_vm2, %vm5502_vm3  ;;  %v276_v22 = vld [vmem:[%s5492_s0 + $0x2] sm:$0xff] }
   0x6   :  { %2551 = vmatpush3.bf16.msra.mxu0 %v2740_v3  ;;  %vm466_vm7 = vcmp.lt.s32.totalorder %v2860_v4, 16  ;;  %v89_v15 = vsel %vm83_vm1, %v2885_v9, 0.0  ;;  %vm5503_vm9 = vcmp.ge.s32.totalorder %v2860_v4, 16  ;;  %vm609_vm10 = vcmp.lt.s32.totalorder %v2860_v4, 20  ;;  %v277_v23 = vld [vmem:[%s5492_s0 + $0xa] sm:$0xff]  ;;  %vm2944_vm11 = vmand %vm322_vm4, %vm323_vm5  ;;  %v420_v30 = vld [vmem:[%s5492_s0 + $0x16] sm:$0xff] }
   0x7   :  { %2552 = vmatprep.subr.bf16.mxu0 %v2797_v2  ;;  %2729 = vmatpush3.bf16.msra.mxu1 %v2740_v3  ;;  %v90_v19 = vsel %vm83_vm1, %v2894_v10, 0.0  ;;  %v184_v20 = vsel %vm2920_vm8, %v133_v13, 0.0  ;;  %v185_v21 = vsel %vm2920_vm8, %v134_v14, 0.0  ;;  %vm708_vm12 = vcmp.ge.s32.totalorder %v2860_v4, 20  ;;  %v419_v29 = vld [vmem:[%s5492_s0 + $0xe] sm:$0xff]  ;;  %vm2963_vm13 = vmand %vm465_vm6, %vm466_vm7  ;;  %v563_v37 = vld [vmem:[%s5492_s0 + $0x17] sm:$0xff] }
   0x8   :  { %2722 = vmatprep.subr.bf16.mxu1 %v2797_v2  ;;  %v186_v25 = vsel %vm2920_vm8, %v135_v16, 0.0  ;;  %v187_v26 = vsel %vm2920_vm8, %v136_v17, 0.0  ;;  %v230_v27 = vadd.f32 %v184_v20, %v87_v11  ;;  %v231_v28 = vadd.f32 %v185_v21, %v88_v12  ;;  %v562_v36 = vld [vmem:[%s5492_s0 + $0xf] sm:$0xff]  ;;  %vm2986_vm14 = vmand %vm5503_vm9, %vm609_vm10  ;;  %v2743_v39 = vld [vmem:[%s5493_s1 + $0x20] sm:$0xff]  }
   0x9   :  { %v327_v32 = vsel %vm2944_vm11, %v276_v22, 0.0  ;;  %v328_v33 = vsel %vm2944_vm11, %v277_v23, 0.0  ;;  %v470_v34 = vsel %vm2963_vm13, %v419_v29, 0.0  ;;  %v471_v35 = vsel %vm2963_vm13, %v420_v30, 0.0  ;;  %v805_v44 = vld [vmem:[%s5492_s0 + $0x1c] sm:$0xff]  ;;  %v806_v45 = vld [vmem:[%s5492_s0 + $0x24] sm:$0xff] }
   0xa   :  { %2553 = vmatpush3.bf16.msra.mxu0 %v2741_v5  ;;  %v373_v40 = vadd.f32 %v327_v32, %v230_v27  ;;  %v374_v41 = vadd.f32 %v328_v33, %v231_v28  ;;  %v613_v42 = vsel %vm2986_vm14, %v562_v36, 0.0  ;;  %v614_v43 = vsel %vm2986_vm14, %v563_v37, 0.0  ;;  %v948_v46 = vld [vmem:[%s5492_s0 + $0x1d] sm:$0xff]  ;;  %v949_v50 = vld [vmem:[%s5492_s0 + $0x25] sm:$0xff]  ;;  %v278_v0 = vld [vmem:[%s5492_s0 + $0x12] sm:$0xff] }
   0xb   :  { %2554 = vmatprep.subr.bf16.mxu0 %v2797_v2  ;;  %2730 = vmatpush3.bf16.msra.mxu1 %v2741_v5  ;;  %vm5504_vm15 = vcmp.lt.s32.totalorder %v2860_v4, 24  ;;  %vm851_vm2 = vcmp.ge.s32.totalorder %v2860_v4, 24  ;;  %vm852_vm5 = vcmp.lt.s32.totalorder %v2860_v4, 28  ;;  %vm994_vm6 = vcmp.ge.s32.totalorder %v2860_v4, 28  ;;  %v3027_v51 = vld [vmem:[%s5492_s0 + $0x20] sm:$0xff]  ;;  %v3048_v56 = vld [vmem:[%s5492_s0 + $0x28] sm:$0xff] }
   0xc   :  { %2723 = vmatprep.subr.bf16.mxu1 %v2797_v2  ;;  %v516_v47 = vadd.f32 %v470_v34, %v373_v40  ;;  %v517_v48 = vadd.f32 %v471_v35, %v374_v41  ;;  %vm3015_vm10 = vmand %vm708_vm12, %vm5504_vm15  ;;  %vm995_vm3 = vcmp.lt.s32.totalorder %v2860_v4, 32  ;;  %vm1137_vm9 = vcmp.ge.s32.totalorder %v2860_v4, 32  ;;  %v137_v57 = vld [vmem:[%s5492_s0 + $0x21] sm:$0xff]  ;;  %v138_v8 = vld [vmem:[%s5492_s0 + $0x29] sm:$0xff] }
   0xd   :  { %v232_v52 = vadd.f32 %v186_v25, %v89_v15  ;;  %v713_v53 = vsel %vm3015_vm10, %v2885_v9, 0.0  ;;  %v714_v54 = vsel %vm3015_vm10, %v2894_v10, 0.0  ;;  %vm3040_vm12 = vmand %vm851_vm2, %vm852_vm5  ;;  %vm1138_vm15 = vcmp.lt.s32.totalorder %v2860_v4, 36  ;;  %v2744_v58 = vld [vmem:[%s5493_s1 + $0x28] sm:$0xff]   ;;  %v279_v9 = vld [vmem:[%s5492_s0 + $0x1a] sm:$0xff] }
   0xe   :  { %2555 = vmatpush3.bf16.msra.mxu0 %v2742_v6  ;;  %v233_v59 = vadd.f32 %v187_v26, %v90_v19  ;;  %v659_v60 = vadd.f32 %v613_v42, %v516_v47  ;;  %v660_v61 = vadd.f32 %v614_v43, %v517_v48  ;;  %vm3060_vm5 = vmand %vm994_vm6, %vm995_vm3  ;;  %v91_v63 = vsel %vm83_vm1, %v3027_v51, 0.0  ;;  %v1091_v12 = vld [vmem:[%s5492_s0 + $0x1e] sm:$0xff]  ;;  %v1092_v13 = vld [vmem:[%s5492_s0 + $0x26] sm:$0xff] }
   0xf   :  { %2556 = vmatprep.subr.bf16.mxu0 %v2797_v2  ;;  %2731 = vmatpush3.bf16.msra.mxu1 %v2742_v6  ;;  %v856_v1 = vsel %vm3040_vm12, %v805_v44, 0.0  ;;  %v857_v3 = vsel %vm3040_vm12, %v806_v45, 0.0  ;;  %v999_v5 = vsel %vm3060_vm5, %v948_v46, 0.0  ;;  %v1000_v6 = vsel %vm3060_vm5, %v949_v50, 0.0  ;;  %vm3083_vm6 = vmand %vm1137_vm9, %vm1138_vm15  ;;  %v564_v16 = vld [vmem:[%s5492_s0 + $0x1f] sm:$0xff]  ;;  %v565_v22 = vld [vmem:[%s5492_s0 + $0x27] sm:$0xff] }
  0x10   :  { %2724 = vmatprep.subr.bf16.mxu1 %v2797_v2  ;;  %v759_v10 = vadd.f32 %v713_v53, %v659_v60  ;;  %v760_v11 = vadd.f32 %v714_v54, %v660_v61  ;;  %v92_v14 = vsel %vm83_vm1, %v3048_v56, 0.0  ;;  %v188_v15 = vsel %vm2920_vm8, %v137_v57, 0.0  ;;  %v2745_v23 = vld [vmem:[%s5493_s1 + $0x30] sm:$0xff]   ;;  %v2746_v42 = vld [vmem:[%s5493_s1 + $0x38] sm:$0xff]  }
  0x11   :  { %v1142_v17 = vsel %vm3083_vm6, %v1091_v12, 0.0  ;;  %v1143_v19 = vsel %vm3083_vm6, %v1092_v13, 0.0  ;;  %v329_v20 = vsel %vm2944_vm11, %v278_v0, 0.0  ;;  %v330_v21 = vsel %vm2944_vm11, %v279_v9, 0.0  ;;  %v808_v40 = vld [vmem:[%s5492_s0 + $0x34] sm:$0xff]  ;;  %v280_v0 = vld [vmem:[%s5492_s0 + $0x22] sm:$0xff] }
  0x12   :  { %2557 = vmatpush3.bf16.msra.mxu0 %v2743_v39  ;;  %v902_v25 = vadd.f32 %v856_v1, %v759_v10  ;;  %v903_v26 = vadd.f32 %v857_v3, %v760_v11  ;;  %v189_v27 = vsel %vm2920_vm8, %v138_v8, 0.0  ;;  %v375_v28 = vadd.f32 %v329_v20, %v232_v52  ;;  %v950_v41 = vld [vmem:[%s5492_s0 + $0x2d] sm:$0xff]  ;;  %v951_v47 = vld [vmem:[%s5492_s0 + $0x35] sm:$0xff] }
  0x13   :  { %2558 = vmatprep.subr.bf16.mxu0 %v2797_v2  ;;  %2732 = vmatpush3.bf16.msra.mxu1 %v2743_v39  ;;  %v376_v29 = vadd.f32 %v330_v21, %v233_v59  ;;  %v472_v30 = vsel %vm2963_vm13, %v1091_v12, 0.0  ;;  %v473_v32 = vsel %vm2963_vm13, %v1092_v13, 0.0  ;;  %v615_v33 = vsel %vm2986_vm14, %v564_v16, 0.0  ;;  %v807_v39 = vld [vmem:[%s5492_s0 + $0x2c] sm:$0xff]  ;;  %v3166_v57 = vld [vmem:[%s5492_s0 + $0x38] sm:$0xff] }
  0x14   :  { %2725 = vmatprep.subr.bf16.mxu1 %v2797_v2  ;;  %v1045_v34 = vadd.f32 %v999_v5, %v902_v25  ;;  %v1046_v35 = vadd.f32 %v1000_v6, %v903_v26  ;;  %v518_v36 = vadd.f32 %v472_v30, %v375_v28  ;;  %v616_v37 = vsel %vm2986_vm14, %v565_v22, 0.0  ;;  %v1093_v54 = vld [vmem:[%s5492_s0 + $0x2e] sm:$0xff]  ;;  %v1094_v6 = vld [vmem:[%s5492_s0 + $0x36] sm:$0xff] }
  0x15   :  { %v234_v43 = vadd.f32 %v188_v15, %v91_v63  ;;  %v235_v44 = vadd.f32 %v189_v27, %v92_v14  ;;  %v519_v45 = vadd.f32 %v473_v32, %v376_v29  ;;  %v715_v46 = vsel %vm3015_vm10, %v3027_v51, 0.0  ;;  %v3161_v51 = vld [vmem:[%s5492_s0 + $0x30] sm:$0xff]  ;;  %v140_v63 = vld [vmem:[%s5492_s0 + $0x39] sm:$0xff] }
  0x16   :  { %2559 = vmatpush3.bf16.msra.mxu0 %v2744_v58  ;;  %v1188_v48 = vadd.f32 %v1142_v17, %v1045_v34  ;;  %v1189_v50 = vadd.f32 %v1143_v19, %v1046_v35  ;;  %v661_v52 = vadd.f32 %v615_v33, %v518_v36  ;;  %v716_v53 = vsel %vm3015_vm10, %v3048_v56, 0.0  ;;  %v139_v61 = vld [vmem:[%s5492_s0 + $0x31] sm:$0xff]  ;;  %v809_v30 = vld [vmem:[%s5492_s0 + $0x3c] sm:$0xff]  ;;  %v810_v36 = vld [vmem:[%s5492_s0 + $0x44] sm:$0xff] }
  0x17   :  { %2560 = vmatprep.subr.bf16.mxu0 %v2797_v2  ;;  %2733 = vmatpush3.bf16.msra.mxu1 %v2744_v58  ;;  %v662_v58 = vadd.f32 %v616_v37, %v519_v45  ;;  %v858_v56 = vsel %vm3040_vm12, %v807_v39, 0.0  ;;  %v859_v59 = vsel %vm3040_vm12, %v808_v40, 0.0  ;;  %v1001_v60 = vsel %vm3060_vm5, %v950_v41, 0.0  ;;  %v281_v9 = vld [vmem:[%s5492_s0 + $0x2a] sm:$0xff]  ;;  %v567_v20 = vld [vmem:[%s5492_s0 + $0x37] sm:$0xff] }
  0x18   :  { %2726 = vmatprep.subr.bf16.mxu1 %v2797_v2  ;;  %v1234_v1 = vpack.c.bf16 %v1189_v50, %v1188_v48  ;;  %v761_v3 = vadd.f32 %v715_v46, %v661_v52  ;;  %v1002_v5 = vsel %vm3060_vm5, %v951_v47, 0.0  ;;  %v1144_v8 = vsel %vm3083_vm6, %v1093_v54, 0.0  ;;  %v566_v14 = vld [vmem:[%s5492_s0 + $0x2f] sm:$0xff]  ;;  %v952_v37 = vld [vmem:[%s5492_s0 + $0x3d] sm:$0xff]  ;;  %v953_v39 = vld [vmem:[%s5492_s0 + $0x45] sm:$0xff] }
  0x19   :  { %v762_v10 = vadd.f32 %v716_v53, %v662_v58  ;;  %v1145_v11 = vsel %vm3083_vm6, %v1094_v6, 0.0  ;;  %v93_v12 = vsel %vm83_vm1, %v3161_v51, 0.0  ;;  %v94_v13 = vsel %vm83_vm1, %v3166_v57, 0.0  ;;  %v1096_v45 = vld [vmem:[%s5492_s0 + $0x46] sm:$0xff] }
  0x1a   :  { %2561 = vmatpush3.bf16.msra.mxu0 %v2745_v23  ;;  %v904_v15 = vadd.f32 %v858_v56, %v761_v3  ;;  %v190_v16 = vsel %vm2920_vm8, %v139_v61, 0.0  ;;  %v191_v17 = vsel %vm2920_vm8, %v140_v63, 0.0  ;;  %v331_v19 = vsel %vm2944_vm11, %v280_v0, 0.0  ;;  %v3256_v52 = vld [vmem:[%s5492_s0 + $0x40] sm:$0xff]  ;;  %v3261_v53 = vld [vmem:[%s5492_s0 + $0x48] sm:$0xff] }
  0x1b   :  { %2562 = vmatprep.subr.bf16.mxu0 %v2797_v2  ;;  %2734 = vmatpush3.bf16.msra.mxu1 %v2745_v23  ;;  %v905_v21 = vadd.f32 %v859_v59, %v762_v10  ;;  %v332_v22 = vsel %vm2944_vm11, %v281_v9, 0.0  ;;  %v377_v23 = vadd.f32 %v331_v19, %v234_v43  ;;  %v474_v25 = vsel %vm2963_vm13, %v1093_v54, 0.0  ;;  %v282_v54 = vld [vmem:[%s5492_s0 + $0x32] sm:$0xff]  ;;  %v141_v59 = vld [vmem:[%s5492_s0 + $0x41] sm:$0xff] }
  0x1c   :  { %2727 = vmatprep.subr.bf16.mxu1 %v2797_v2  ;;  %v1047_v26 = vadd.f32 %v1001_v60, %v904_v15  ;;  %v378_v27 = vadd.f32 %v332_v22, %v235_v44  ;;  %v475_v28 = vsel %vm2963_vm13, %v1094_v6, 0.0  ;;  %v617_v29 = vsel %vm2986_vm14, %v566_v14, 0.0  ;;  %v1095_v44 = vld [vmem:[%s5492_s0 + $0x3e] sm:$0xff]  ;;  %v142_v60 = vld [vmem:[%s5492_s0 + $0x49] sm:$0xff] }
  0x1d   :  { %v1048_v32 = vadd.f32 %v1002_v5, %v905_v21  ;;  %v236_v33 = vadd.f32 %v190_v16, %v93_v12  ;;  %v520_v34 = vadd.f32 %v474_v25, %v377_v23  ;;  %v618_v35 = vsel %vm2986_vm14, %v567_v20, 0.0  ;;  %v283_v61 = vld [vmem:[%s5492_s0 + $0x3a] sm:$0xff] }
  0x1e   :  { %2563 = vmatpush3.bf16.msra.mxu0 %v2746_v42  ;;  %v1190_v40 = vadd.f32 %v1144_v8, %v1047_v26  ;;  %v237_v41 = vadd.f32 %v191_v17, %v94_v13  ;;  %v717_v43 = vsel %vm3015_vm10, %v3161_v51, 0.0  ;;  %v718_v48 = vsel %vm3015_vm10, %v3166_v57, 0.0  ;;  %v568_v10 = vld [vmem:[%s5492_s0 + $0x3f] sm:$0xff]  ;;  %v811_v26 = vld [vmem:[%s5492_s0 + $0x4c] sm:$0xff] }
  0x1f   :  { %2735 = vmatpush3.bf16.msra.mxu1 %v2746_v42  ;;  %v521_v42 = vadd.f32 %v475_v28, %v378_v27  ;;  %v1191_v46 = vadd.f32 %v1145_v11, %v1048_v32  ;;  %v663_v47 = vadd.f32 %v617_v29, %v520_v34  ;;  %v860_v50 = vsel %vm3040_vm12, %v809_v30, 0.0  ;;  %v569_v11 = vld [vmem:[%s5492_s0 + $0x47] sm:$0xff]  ;;  %v812_v32 = vld [vmem:[%s5492_s0 + $0x54] sm:$0xff] }
  0x20   :  { %v861_v57 = vsel %vm3040_vm12, %v810_v36, 0.0  ;;  %v1003_v58 = vsel %vm3060_vm5, %v952_v37, 0.0  ;;  %v1004_v56 = vsel %vm3060_vm5, %v953_v39, 0.0  ;;  %v1147_v3 = vsel %vm3083_vm6, %v1096_v45, 0.0  ;;  %v955_v34 = vld [vmem:[%s5492_s0 + $0x55] sm:$0xff] }
  0x21   :  { %2565 = vmatmul.mubr.bf16.vlgmr.msra.gmra.mrb[0].mxu0 %v1234_v1  ;;  %v664_v51 = vadd.f32 %v618_v35, %v521_v42  ;;  %v1235_v63 = vpack.c.bf16 %v1191_v46, %v1190_v40  ;;  %v763_v0 = vadd.f32 %v717_v43, %v663_v47  ;;  %v1146_v1 = vsel %vm3083_vm6, %v1095_v44, 0.0  ;;  %v1097_v40 = vld [vmem:[%s5492_s0 + $0x4e] sm:$0xff]  ;;  %v3349_v47 = vld [vmem:[%s5492_s0 + $0x58] sm:$0xff] }
  0x22   :  { %2568 = vmatprep.mubr.msk.bf16.mxu0 %vm2798_vm0, %v2797_v2  ;;  %v95_v6 = vsel %vm83_vm1, %v3256_v52, 0.0  ;;  %v96_v8 = vsel %vm83_vm1, %v3261_v53, 0.0  ;;  %v333_v9 = vsel %vm2944_vm11, %v282_v54, 0.0  ;;  %v192_v13 = vsel %vm2920_vm8, %v141_v59, 0.0  ;;  %v3342_v42 = vld [vmem:[%s5492_s0 + $0x50] sm:$0xff] }
  0x23   :  { %v764_v5 = vadd.f32 %v718_v48, %v664_v51  ;;  %v906_v12 = vadd.f32 %v860_v50, %v763_v0  ;;  %v193_v14 = vsel %vm2920_vm8, %v142_v60, 0.0  ;;  %v334_v15 = vsel %vm2944_vm11, %v283_v61, 0.0  ;;  %v284_v48 = vld [vmem:[%s5492_s0 + $0x42] sm:$0xff]  ;;  %v285_v50 = vld [vmem:[%s5492_s0 + $0x4a] sm:$0xff] }
  0x24   :  { %v379_v17 = vadd.f32 %v333_v9, %v236_v33  ;;  %v380_v19 = vadd.f32 %v334_v15, %v237_v41  ;;  %v476_v20 = vsel %vm2963_vm13, %v1095_v44, 0.0  ;;  %v477_v22 = vsel %vm2963_vm13, %v1096_v45, 0.0  ;;  %v954_v33 = vld [vmem:[%s5492_s0 + $0x4d] sm:$0xff]  ;;  %v1098_v41 = vld [vmem:[%s5492_s0 + $0x56] sm:$0xff] }
  0x25   :  { %v907_v16 = vadd.f32 %v861_v57, %v764_v5  ;;  %v1049_v21 = vadd.f32 %v1003_v58, %v906_v12  ;;  %v619_v23 = vsel %vm2986_vm14, %v568_v10, 0.0  ;;  %v620_v25 = vsel %vm2986_vm14, %v569_v11, 0.0  ;;  %v143_v57 = vld [vmem:[%s5492_s0 + $0x51] sm:$0xff]  ;;  %v144_v58 = vld [vmem:[%s5492_s0 + $0x59] sm:$0xff] }
  0x26   :  { %v238_v28 = vadd.f32 %v192_v13, %v95_v6  ;;  %v522_v29 = vadd.f32 %v476_v20, %v379_v17  ;;  %v523_v30 = vadd.f32 %v477_v22, %v380_v19  ;;  %v239_v36 = vadd.f32 %v193_v14, %v96_v8  ;;  %v570_v5 = vld [vmem:[%s5492_s0 + $0x4f] sm:$0xff]  ;;  %v571_v6 = vld [vmem:[%s5492_s0 + $0x57] sm:$0xff]  ;;  %v814_v22 = vld [vmem:[%s5492_s0 + $0x64] sm:$0xff] }
  0x27   :  { %v1050_v27 = vadd.f32 %v1004_v56, %v907_v16  ;;  %v1192_v35 = vadd.f32 %v1146_v1, %v1049_v21  ;;  %v719_v37 = vsel %vm3015_vm10, %v3256_v52, 0.0  ;;  %v720_v39 = vsel %vm3015_vm10, %v3261_v53, 0.0  ;;  %v813_v21 = vld [vmem:[%s5492_s0 + $0x5c] sm:$0xff] }
  0x28   :  { %v665_v44 = vadd.f32 %v619_v23, %v522_v29  ;;  %v666_v45 = vadd.f32 %v620_v25, %v523_v30  ;;  %v862_v46 = vsel %vm3040_vm12, %v811_v26, 0.0  ;;  %v863_v52 = vsel %vm3040_vm12, %v812_v32, 0.0  ;;  %v957_v29 = vld [vmem:[%s5492_s0 + $0x65] sm:$0xff] }
  0x29   :  { %2569 = vmatmul.mubr.bf16.gmra.mrb[4].mxu0 %v1235_v63  ;;  %v1193_v43 = vadd.f32 %v1147_v3, %v1050_v27  ;;  %v1005_v53 = vsel %vm3060_vm5, %v954_v33, 0.0  ;;  %v1006_v54 = vsel %vm3060_vm5, %v955_v34, 0.0  ;;  %v1148_v51 = vsel %vm3083_vm6, %v1097_v40, 0.0 }
  0x2a   :  { %2572 = vmatprep.mubr.msk.bf16.mxu0 %vm2798_vm0, %v2797_v2  ;;  %v765_v59 = vadd.f32 %v719_v37, %v665_v44  ;;  %v766_v60 = vadd.f32 %v720_v39, %v666_v45  ;;  %v1149_v61 = vsel %vm3083_vm6, %v1098_v41, 0.0  ;;  %v97_v63 = vsel %vm83_vm1, %v3342_v42, 0.0  ;;  %v3432_v37 = vld [vmem:[%s5492_s0 + $0x68] sm:$0xff]  ;;  %v286_v44 = vld [vmem:[%s5492_s0 + $0x52] sm:$0xff]  ;;  %v287_v45 = vld [vmem:[%s5492_s0 + $0x5a] sm:$0xff] }
  0x2b   :  { %v1236_v56 = vpack.c.bf16 %v1193_v43, %v1192_v35  ;;  %v98_v0 = vsel %vm83_vm1, %v3349_v47, 0.0  ;;  %v335_v1 = vsel %vm2944_vm11, %v284_v48, 0.0  ;;  %v336_v3 = vsel %vm2944_vm11, %v285_v50, 0.0  ;;  %v1099_v35 = vld [vmem:[%s5492_s0 + $0x5e] sm:$0xff]  ;;  %v1100_v50 = vld [vmem:[%s5492_s0 + $0x66] sm:$0xff] }
  0x2c   :  { %v908_v8 = vadd.f32 %v862_v46, %v765_v59  ;;  %v909_v9 = vadd.f32 %v863_v52, %v766_v60  ;;  %v194_v10 = vsel %vm2920_vm8, %v143_v57, 0.0  ;;  %v195_v11 = vsel %vm2920_vm8, %v144_v58, 0.0  ;;  %v145_v43 = vld [vmem:[%s5492_s0 + $0x61] sm:$0xff] }
  0x2d   :  { %v381_v12 = vadd.f32 %v335_v1, %v238_v28  ;;  %v382_v13 = vadd.f32 %v336_v3, %v239_v36  ;;  %v478_v14 = vsel %vm2963_vm13, %v1097_v40, 0.0  ;;  %v479_v15 = vsel %vm2963_vm13, %v1098_v41, 0.0  ;;  %v956_v28 = vld [vmem:[%s5492_s0 + $0x5d] sm:$0xff] }
  0x2e   :  { %v1051_v16 = vadd.f32 %v1005_v53, %v908_v8  ;;  %v1052_v17 = vadd.f32 %v1006_v54, %v909_v9  ;;  %v621_v19 = vsel %vm2986_vm14, %v570_v5, 0.0  ;;  %v622_v20 = vsel %vm2986_vm14, %v571_v6, 0.0  ;;  %v3427_v36 = vld [vmem:[%s5492_s0 + $0x60] sm:$0xff]  ;;  %v146_v53 = vld [vmem:[%s5492_s0 + $0x69] sm:$0xff] }
  0x2f   :  { %v240_v23 = vadd.f32 %v194_v10, %v97_v63  ;;  %v241_v25 = vadd.f32 %v195_v11, %v98_v0  ;;  %v524_v26 = vadd.f32 %v478_v14, %v381_v12  ;;  %v525_v27 = vadd.f32 %v479_v15, %v382_v13  ;;  %v573_v0 = vld [vmem:[%s5492_s0 + $0x67] sm:$0xff] }
  0x30   :  { %v1194_v30 = vadd.f32 %v1148_v51, %v1051_v16  ;;  %v1195_v32 = vadd.f32 %v1149_v61, %v1052_v17  ;;  %v721_v33 = vsel %vm3015_vm10, %v3342_v42, 0.0  ;;  %v722_v34 = vsel %vm3015_vm10, %v3349_v47, 0.0  ;;  %v815_v16 = vld [vmem:[%s5492_s0 + $0x6c] sm:$0xff]  ;;  %v816_v17 = vld [vmem:[%s5492_s0 + $0x74] sm:$0xff] }
  0x31   :  { %2573 = vmatmul.mubr.bf16.gmra.mrb[8].mxu0 %v1236_v56  ;;  %v667_v39 = vadd.f32 %v621_v19, %v524_v26  ;;  %v668_v40 = vadd.f32 %v622_v20, %v525_v27  ;;  %v864_v41 = vsel %vm3040_vm12, %v813_v21, 0.0  ;;  %v865_v42 = vsel %vm3040_vm12, %v814_v22, 0.0  ;;  %v572_v56 = vld [vmem:[%s5492_s0 + $0x5f] sm:$0xff]  ;;  %v958_v19 = vld [vmem:[%s5492_s0 + $0x6d] sm:$0xff] }
  0x32   :  { %2576 = vmatprep.mubr.msk.bf16.mxu0 %vm2798_vm0, %v2797_v2  ;;  %v1237_v46 = vpack.c.bf16 %v1195_v32, %v1194_v30  ;;  %v1007_v47 = vsel %vm3060_vm5, %v956_v28, 0.0  ;;  %v1008_v48 = vsel %vm3060_vm5, %v957_v29, 0.0  ;;  %v1150_v52 = vsel %vm3083_vm6, %v1099_v35, 0.0  ;;  %v1101_v30 = vld [vmem:[%s5492_s0 + $0x6e] sm:$0xff] }
  0x33   :  { %v767_v54 = vadd.f32 %v721_v33, %v667_v39  ;;  %v768_v51 = vadd.f32 %v722_v34, %v668_v40  ;;  %v1151_v57 = vsel %vm3083_vm6, %v1100_v50, 0.0  ;;  %v99_v58 = vsel %vm83_vm1, %v3427_v36, 0.0  ;;  %v3515_v32 = vld [vmem:[%s5492_s0 + $0x70] sm:$0xff]  ;;  %v3520_v33 = vld [vmem:[%s5492_s0 + $0x78] sm:$0xff] }
  0x34   :  { %v100_v59 = vsel %vm83_vm1, %v3432_v37, 0.0  ;;  %v196_v60 = vsel %vm2920_vm8, %v145_v43, 0.0  ;;  %v337_v61 = vsel %vm2944_vm11, %v286_v44, 0.0  ;;  %v338_v63 = vsel %vm2944_vm11, %v287_v45, 0.0  ;;  %v147_v39 = vld [vmem:[%s5492_s0 + $0x71] sm:$0xff]  ;;  %v148_v40 = vld [vmem:[%s5492_s0 + $0x79] sm:$0xff] }
  0x35   :  { %v910_v1 = vadd.f32 %v864_v41, %v767_v54  ;;  %v911_v3 = vadd.f32 %v865_v42, %v768_v51  ;;  %v197_v5 = vsel %vm2920_vm8, %v146_v53, 0.0  ;;  %v383_v6 = vadd.f32 %v337_v61, %v240_v23  ;;  %v288_v41 = vld [vmem:[%s5492_s0 + $0x62] sm:$0xff]  ;;  %v1102_v45 = vld [vmem:[%s5492_s0 + $0x76] sm:$0xff] }
  0x36   :  { %v384_v8 = vadd.f32 %v338_v63, %v241_v25  ;;  %v480_v9 = vsel %vm2963_vm13, %v1099_v35, 0.0  ;;  %v481_v10 = vsel %vm2963_vm13, %v1100_v50, 0.0  ;;  %v623_v11 = vsel %vm2986_vm14, %v572_v56, 0.0  ;;  %v959_v25 = vld [vmem:[%s5492_s0 + $0x75] sm:$0xff] }
  0x37   :  { %v1053_v12 = vadd.f32 %v1007_v47, %v910_v1  ;;  %v1054_v13 = vadd.f32 %v1008_v48, %v911_v3  ;;  %v526_v14 = vadd.f32 %v480_v9, %v383_v6  ;;  %v624_v15 = vsel %vm2986_vm14, %v573_v0, 0.0  ;;  %v289_v47 = vld [vmem:[%s5492_s0 + $0x6a] sm:$0xff] }
  0x38   :  { %v242_v20 = vadd.f32 %v196_v60, %v99_v58  ;;  %v243_v21 = vadd.f32 %v197_v5, %v100_v59  ;;  %v527_v22 = vadd.f32 %v481_v10, %v384_v8  ;;  %v723_v23 = vsel %vm3015_vm10, %v3427_v36, 0.0  ;;  %v574_v54 = vld [vmem:[%s5492_s0 + $0x6f] sm:$0xff]  ;;  %v575_v59 = vld [vmem:[%s5492_s0 + $0x77] sm:$0xff] }
  0x39   :  { %2577 = vmatmul.mubr.bf16.gmra.mrb[12].mxu0 %v1237_v46  ;;  %v1196_v26 = vadd.f32 %v1150_v52, %v1053_v12  ;;  %v1197_v27 = vadd.f32 %v1151_v57, %v1054_v13  ;;  %v669_v28 = vadd.f32 %v623_v11, %v526_v14  ;;  %v724_v29 = vsel %vm3015_vm10, %v3432_v37, 0.0  ;;  %v817_v8 = vld [vmem:[%s5492_s0 + $0x7c] sm:$0xff]  ;;  %v818_v13 = vld [vmem:[%s5492_s0 + $0x84] sm:$0xff] }
  0x3a   :  { %2580 = vmatprep.mubr.msk.bf16.mxu0 %vm2798_vm0, %v2797_v2  ;;  %v670_v34 = vadd.f32 %v624_v15, %v527_v22  ;;  %v866_v35 = vsel %vm3040_vm12, %v815_v16, 0.0  ;;  %v867_v36 = vsel %vm3040_vm12, %v816_v17, 0.0  ;;  %v1009_v37 = vsel %vm3060_vm5, %v958_v19, 0.0  ;;  %v960_v14 = vld [vmem:[%s5492_s0 + $0x7d] sm:$0xff]  ;;  %v961_v15 = vld [vmem:[%s5492_s0 + $0x85] sm:$0xff] }
  0x3b   :  { %v1238_v42 = vpack.c.bf16 %v1197_v27, %v1196_v26  ;;  %v769_v43 = vadd.f32 %v723_v23, %v669_v28  ;;  %v1010_v44 = vsel %vm3060_vm5, %v959_v25, 0.0  ;;  %v1152_v46 = vsel %vm3083_vm6, %v1101_v30, 0.0  ;;  %v69_v22 = vld [vmem:[%s5492_s0 + $0x108] sm:$0xff] }
  0x3c   :  { %v770_v48 = vadd.f32 %v724_v29, %v670_v34  ;;  %v1153_v50 = vsel %vm3083_vm6, %v1102_v45, 0.0  ;;  %v101_v52 = vsel %vm83_vm1, %v3515_v32, 0.0  ;;  %v102_v53 = vsel %vm83_vm1, %v3520_v33, 0.0  ;;  %v165_v28 = vld [vmem:[%s5492_s0 + $0x101] sm:$0xff] }
  0x3d   :  { %v912_v51 = vadd.f32 %v866_v35, %v769_v43  ;;  %v198_v57 = vsel %vm2920_vm8, %v147_v39, 0.0  ;;  %v199_v58 = vsel %vm2920_vm8, %v148_v40, 0.0  ;;  %v339_v56 = vsel %vm2944_vm11, %v288_v41, 0.0  ;;  %v3626_v35 = vld [vmem:[%s5492_s0 + $0x118] sm:$0xff]  ;;  %v3639_v41 = vld [vmem:[%s5492_s0 + $0x86] sm:$0xff] }
  0x3e   :  { %v913_v60 = vadd.f32 %v867_v36, %v770_v48  ;;  %v340_v61 = vsel %vm2944_vm11, %v289_v47, 0.0  ;;  %v385_v63 = vadd.f32 %v339_v56, %v242_v20  ;;  %v482_v0 = vsel %vm2963_vm13, %v1101_v30, 0.0  ;;  %v166_v36 = vld [vmem:[%s5492_s0 + $0x109] sm:$0xff]  ;;  %v3634_v40 = vld [vmem:[%s5492_s0 + $0x7e] sm:$0xff] }
  0x3f   :  { %v1055_v1 = vadd.f32 %v1009_v37, %v912_v51  ;;  %v386_v3 = vadd.f32 %v340_v61, %v243_v21  ;;  %v483_v5 = vsel %vm2963_vm13, %v1102_v45, 0.0  ;;  %v625_v6 = vsel %vm2986_vm14, %v574_v54, 0.0  ;;  %v68_v21 = vld [vmem:[%s5492_s0 + $0x100] sm:$0xff]  ;;  %v451_v56 = vld [vmem:[%s5492_s0 + $0x10e] sm:$0xff] }
  0x40   :  { %v1056_v9 = vadd.f32 %v1010_v44, %v913_v60  ;;  %v3580_v10 = vadd.f32 %v198_v57, %v101_v52  ;;  %v528_v11 = vadd.f32 %v482_v0, %v385_v63  ;;  %v626_v12 = vsel %vm2986_vm14, %v575_v59, 0.0  ;;  %v167_v44 = vld [vmem:[%s5492_s0 + $0x111] sm:$0xff]  ;;  %v168_v48 = vld [vmem:[%s5492_s0 + $0x119] sm:$0xff]  ;;  %v308_v52 = vld [vmem:[%s5492_s0 + $0x102] sm:$0xff] }
  0x41   :  { %2581 = vmatmul.mubr.bf16.gmra.mrb[16].mxu0 %v1238_v42  ;;  %v1198_v16 = vadd.f32 %v1152_v46, %v1055_v1  ;;  %v3593_v17 = vadd.f32 %v199_v58, %v102_v53  ;;  %v529_v19 = vadd.f32 %v483_v5, %v386_v3  ;;  %v725_v20 = vsel %vm3015_vm10, %v3515_v32, 0.0  ;;  %v309_v53 = vld [vmem:[%s5492_s0 + $0x10a] sm:$0xff]  ;;  %v452_v0 = vld [vmem:[%s5492_s0 + $0x116] sm:$0xff] }
  0x42   :  { %2584 = vmatprep.mubr.msk.bf16.mxu0 %vm2798_vm0, %v2797_v2  ;;  %v1199_v23 = vadd.f32 %v1153_v50, %v1056_v9  ;;  %v671_v25 = vadd.f32 %v625_v6, %v528_v11  ;;  %v726_v26 = vsel %vm3015_vm10, %v3520_v33, 0.0  ;;  %v868_v27 = vsel %vm3040_vm12, %v817_v8, 0.0  ;;  %v3621_v33 = vld [vmem:[%s5492_s0 + $0x110] sm:$0xff] }
  0x43   :  { %v672_v29 = vadd.f32 %v626_v12, %v529_v19  ;;  %v869_v30 = vsel %vm3040_vm12, %v818_v13, 0.0  ;;  %v1011_v32 = vsel %vm3060_vm5, %v960_v14, 0.0  ;;  %v1012_v34 = vsel %vm3060_vm5, %v961_v15, 0.0  ;;  %v594_v1 = vld [vmem:[%s5492_s0 + $0x10f] sm:$0xff]  ;;  %v595_v3 = vld [vmem:[%s5492_s0 + $0x117] sm:$0xff] }
  0x44   :  { %v1239_v37 = vpack.c.bf16 %v1199_v23, %v1198_v16  ;;  %v771_v39 = vadd.f32 %v725_v20, %v671_v25  ;;  %v119_v42 = vsel %vm83_vm1, %v68_v21, 0.0  ;;  %v120_v43 = vsel %vm83_vm1, %v69_v22, 0.0  ;;  %v837_v15 = vld [vmem:[%s5492_s0 + $0x11c] sm:$0xff]  ;;  %v838_v22 = vld [vmem:[%s5492_s0 + $0x124] sm:$0xff] }
  0x45   :  { %v772_v45 = vadd.f32 %v726_v26, %v672_v29  ;;  %v1154_v46 = vsel %vm3083_vm6, %v3634_v40, 0.0  ;;  %v1155_v47 = vsel %vm3083_vm6, %v3639_v41, 0.0  ;;  %v216_v50 = vsel %vm2920_vm8, %v165_v28, 0.0  ;;  %v980_v23 = vld [vmem:[%s5492_s0 + $0x11d] sm:$0xff]  ;;  %v981_v29 = vld [vmem:[%s5492_s0 + $0x125] sm:$0xff] }
  0x46   :  { %v914_v54 = vadd.f32 %v868_v27, %v771_v39  ;;  %v121_v51 = vsel %vm83_vm1, %v3621_v33, 0.0  ;;  %v122_v57 = vsel %vm83_vm1, %v3626_v35, 0.0  ;;  %v217_v58 = vsel %vm2920_vm8, %v166_v36, 0.0 }
  0x47   :  { %v915_v59 = vadd.f32 %v869_v30, %v772_v45  ;;  %v218_v60 = vsel %vm2920_vm8, %v167_v44, 0.0  ;;  %v262_v61 = vadd.f32 %v216_v50, %v119_v42  ;;  %v263_v63 = vadd.f32 %v217_v58, %v120_v43  ;;  %v3720_v30 = vld [vmem:[%s5492_s0 + $0x11e] sm:$0xff]  ;;  %v53_v43 = vld [vmem:[%s5492_s0 + $0x88] sm:$0xff] }
  0x48   :  { %v1057_v5 = vadd.f32 %v1011_v32, %v914_v54  ;;  %v219_v6 = vsel %vm2920_vm8, %v168_v48, 0.0  ;;  %v359_v8 = vsel %vm2944_vm11, %v308_v52, 0.0  ;;  %v360_v9 = vsel %vm2944_vm11, %v309_v53, 0.0  ;;  %v3725_v32 = vld [vmem:[%s5492_s0 + $0x126] sm:$0xff]  ;;  %v290_v48 = vld [vmem:[%s5492_s0 + $0x72] sm:$0xff]  ;;  %v291_v50 = vld [vmem:[%s5492_s0 + $0x7a] sm:$0xff] }
  0x49   :  { %2585 = vmatmul.mubr.bf16.gmra.mrb[20].mxu0 %v1239_v37  ;;  %v1058_v11 = vadd.f32 %v1012_v34, %v915_v59  ;;  %v405_v12 = vadd.f32 %v359_v8, %v262_v61  ;;  %v406_v13 = vadd.f32 %v360_v9, %v263_v63  ;;  %v502_v14 = vsel %vm2963_vm13, %v451_v56, 0.0  ;;  %v52_v42 = vld [vmem:[%s5492_s0 + $0x80] sm:$0xff] }
  0x4a   :  { %2588 = vmatprep.mubr.msk.bf16.mxu0 %vm2798_vm0, %v2797_v2  ;;  %v1200_v16 = vadd.f32 %v1154_v46, %v1057_v5  ;;  %v503_v19 = vsel %vm2963_vm13, %v452_v0, 0.0  ;;  %v645_v20 = vsel %vm2986_vm14, %v594_v1, 0.0  ;;  %v646_v21 = vsel %vm2986_vm14, %v595_v3, 0.0  ;;  %v149_v44 = vld [vmem:[%s5492_s0 + $0x81] sm:$0xff] }
  0x4b   :  { %v1201_v25 = vadd.f32 %v1155_v47, %v1058_v11  ;;  %v3712_v26 = vadd.f32 %v218_v60, %v121_v51  ;;  %v548_v27 = vadd.f32 %v502_v14, %v405_v12  ;;  %v549_v28 = vadd.f32 %v503_v19, %v406_v13  ;;  %v150_v47 = vld [vmem:[%s5492_s0 + $0x89] sm:$0xff]  ;;  %v576_v60 = vld [vmem:[%s5492_s0 + $0x7f] sm:$0xff] }
  0x4c   :  { %v3727_v34 = vadd.f32 %v219_v6, %v122_v57  ;;  %v745_v36 = vsel %vm3015_vm10, %v3621_v33, 0.0  ;;  %v746_v37 = vsel %vm3015_vm10, %v3626_v35, 0.0  ;;  %v888_v39 = vsel %vm3040_vm12, %v837_v15, 0.0  ;;  %v577_v61 = vld [vmem:[%s5492_s0 + $0x87] sm:$0xff] }
  0x4d   :  { %v1240_v33 = vpack.c.bf16 %v1201_v25, %v1200_v16  ;;  %v691_v45 = vadd.f32 %v645_v20, %v548_v27  ;;  %v692_v46 = vadd.f32 %v646_v21, %v549_v28  ;;  %v889_v35 = vsel %vm3040_vm12, %v838_v22, 0.0  ;;  %v963_v20 = vld [vmem:[%s5492_s0 + $0x95] sm:$0xff] }
  0x4e   :  { %v1031_v52 = vsel %vm3060_vm5, %v980_v23, 0.0  ;;  %v1032_v53 = vsel %vm3060_vm5, %v981_v29, 0.0  ;;  %v1174_v54 = vsel %vm3083_vm6, %v3720_v30, 0.0  ;;  %v1175_v51 = vsel %vm3083_vm6, %v3725_v32, 0.0  ;;  %v3822_v27 = vld [vmem:[%s5492_s0 + $0x8e] sm:$0xff] }
  0x4f   :  { %v791_v57 = vadd.f32 %v745_v36, %v691_v45  ;;  %v792_v58 = vadd.f32 %v746_v37, %v692_v46  ;;  %v103_v56 = vsel %vm83_vm1, %v52_v42, 0.0  ;;  %v104_v59 = vsel %vm83_vm1, %v53_v43, 0.0 }
  0x50   :  { %v200_v63 = vsel %vm2920_vm8, %v149_v44, 0.0  ;;  %v201_v0 = vsel %vm2920_vm8, %v150_v47, 0.0  ;;  %v341_v1 = vsel %vm2944_vm11, %v290_v48, 0.0  ;;  %v342_v3 = vsel %vm2944_vm11, %v291_v50, 0.0  ;;  %v170_v47 = vld [vmem:[%s5492_s0 + $0x129] sm:$0xff] }
  0x51   :  { %2589 = vmatmul.mubr.bf16.gmra.mrb[24].mxu0 %v1240_v33  ;;  %v934_v5 = vadd.f32 %v888_v39, %v791_v57  ;;  %v935_v6 = vadd.f32 %v889_v35, %v792_v58  ;;  %v387_v8 = vadd.f32 %v341_v1, %v3580_v10  ;;  %v388_v9 = vadd.f32 %v342_v3, %v3593_v17  ;;  %v819_v10 = vld [vmem:[%s5492_s0 + $0x8c] sm:$0xff]  ;;  %v3827_v39 = vld [vmem:[%s5492_s0 + $0x120] sm:$0xff] }
  0x52   :  { %2592 = vmatprep.mubr.msk.bf16.mxu0 %vm2798_vm0, %v2797_v2  ;;  %v484_v11 = vsel %vm2963_vm13, %v3634_v40, 0.0  ;;  %v485_v12 = vsel %vm2963_vm13, %v3639_v41, 0.0  ;;  %v627_v13 = vsel %vm2986_vm14, %v576_v60, 0.0  ;;  %v628_v14 = vsel %vm2986_vm14, %v577_v61, 0.0  ;;  %v820_v40 = vld [vmem:[%s5492_s0 + $0x94] sm:$0xff]  ;;  %v169_v35 = vld [vmem:[%s5492_s0 + $0x121] sm:$0xff] }
  0x53   :  { %v1077_v15 = vadd.f32 %v1031_v52, %v934_v5  ;;  %v1078_v17 = vadd.f32 %v1032_v53, %v935_v6  ;;  %v530_v16 = vadd.f32 %v484_v11, %v387_v8  ;;  %v531_v19 = vadd.f32 %v485_v12, %v388_v9  ;;  %v962_v41 = vld [vmem:[%s5492_s0 + $0x8d] sm:$0xff]  ;;  %v3854_v53 = vld [vmem:[%s5492_s0 + $0x96] sm:$0xff]  ;;  %v596_v60 = vld [vmem:[%s5492_s0 + $0x11f] sm:$0xff] }
  0x54   :  { %v3811_v21 = vadd.f32 %v200_v63, %v103_v56  ;;  %v3813_v22 = vadd.f32 %v201_v0, %v104_v59  ;;  %v727_v23 = vsel %vm3015_vm10, %v52_v42, 0.0  ;;  %v728_v25 = vsel %vm3015_vm10, %v53_v43, 0.0  ;;  %v3832_v42 = vld [vmem:[%s5492_s0 + $0x128] sm:$0xff]  ;;  %v310_v43 = vld [vmem:[%s5492_s0 + $0x112] sm:$0xff] }
  0x55   :  { %v1220_v28 = vadd.f32 %v1174_v54, %v1077_v15  ;;  %v1221_v29 = vadd.f32 %v1175_v51, %v1078_v17  ;;  %v673_v36 = vadd.f32 %v627_v13, %v530_v16  ;;  %v674_v37 = vadd.f32 %v628_v14, %v531_v19  ;;  %v311_v51 = vld [vmem:[%s5492_s0 + $0x11a] sm:$0xff]  ;;  %v597_v3 = vld [vmem:[%s5492_s0 + $0x127] sm:$0xff] }
  0x56   :  { %v870_v44 = vsel %vm3040_vm12, %v819_v10, 0.0  ;;  %v871_v33 = vsel %vm3040_vm12, %v820_v40, 0.0  ;;  %v1013_v45 = vsel %vm3060_vm5, %v962_v41, 0.0  ;;  %v1014_v46 = vsel %vm3060_vm5, %v963_v20, 0.0  ;;  %v839_v10 = vld [vmem:[%s5492_s0 + $0x12c] sm:$0xff]  ;;  %v983_v16 = vld [vmem:[%s5492_s0 + $0x135] sm:$0xff] }
  0x57   :  { %v1250_v48 = vpack.c.bf16 %v1221_v29, %v1220_v28  ;;  %v773_v50 = vadd.f32 %v727_v23, %v673_v36  ;;  %v774_v52 = vadd.f32 %v728_v25, %v674_v37  ;;  %v1156_v54 = vsel %vm3083_vm6, %v3822_v27, 0.0  ;;  %v3921_v23 = vld [vmem:[%s5492_s0 + $0x12e] sm:$0xff] }
  0x58   :  { %v1157_v57 = vsel %vm3083_vm6, %v3854_v53, 0.0  ;;  %v123_v58 = vsel %vm83_vm1, %v3827_v39, 0.0  ;;  %v124_v56 = vsel %vm83_vm1, %v3832_v42, 0.0  ;;  %v361_v59 = vsel %vm2944_vm11, %v310_v43, 0.0  ;;  %v54_v25 = vld [vmem:[%s5492_s0 + $0x90] sm:$0xff] }
  0x59   :  { %2629 = vmatmul.mubr.bf16.vlgmr.msra.gmra.mrb[0].mxu1 %v1250_v48  ;;  %v916_v61 = vadd.f32 %v870_v44, %v773_v50  ;;  %v917_v63 = vadd.f32 %v871_v33, %v774_v52  ;;  %v220_v0 = vsel %vm2920_vm8, %v169_v35, 0.0  ;;  %v221_v1 = vsel %vm2920_vm8, %v170_v47, 0.0  ;;  %v151_v43 = vld [vmem:[%s5492_s0 + $0x91] sm:$0xff]  ;;  %v292_v44 = vld [vmem:[%s5492_s0 + $0x82] sm:$0xff]  ;;  %v152_v47 = vld [vmem:[%s5492_s0 + $0x99] sm:$0xff] }
  0x5a   :  { %2632 = vmatprep.mubr.msk.bf16.mxu1 %vm2798_vm0, %v2797_v2  ;;  %v362_v5 = vsel %vm2944_vm11, %v311_v51, 0.0  ;;  %v407_v6 = vadd.f32 %v361_v59, %v3712_v26  ;;  %v504_v8 = vsel %vm2963_vm13, %v3720_v30, 0.0  ;;  %v505_v9 = vsel %vm2963_vm13, %v3725_v32, 0.0  ;;  %v840_v26 = vld [vmem:[%s5492_s0 + $0x134] sm:$0xff]  ;;  %v293_v48 = vld [vmem:[%s5492_s0 + $0x8a] sm:$0xff] }
  0x5b   :  { %v1059_v11 = vadd.f32 %v1013_v45, %v916_v61  ;;  %v1060_v12 = vadd.f32 %v1014_v46, %v917_v63  ;;  %v408_v13 = vadd.f32 %v362_v5, %v3727_v34  ;;  %v647_v14 = vsel %vm2986_vm14, %v596_v60, 0.0  ;;  %v982_v34 = vld [vmem:[%s5492_s0 + $0x12d] sm:$0xff]  ;;  %v3951_v35 = vld [vmem:[%s5492_s0 + $0x136] sm:$0xff] }
  0x5c   :  { %v3903_v30 = vadd.f32 %v220_v0, %v123_v58  ;;  %v3905_v15 = vadd.f32 %v221_v1, %v124_v56  ;;  %v550_v32 = vadd.f32 %v504_v8, %v407_v6  ;;  %v648_v17 = vsel %vm2986_vm14, %v597_v3, 0.0  ;;  %v578_v60 = vld [vmem:[%s5492_s0 + $0x8f] sm:$0xff]  ;;  %v579_v61 = vld [vmem:[%s5492_s0 + $0x97] sm:$0xff] }
  0x5d   :  { %v1202_v19 = vadd.f32 %v1156_v54, %v1059_v11  ;;  %v1203_v40 = vadd.f32 %v1157_v57, %v1060_v12  ;;  %v551_v41 = vadd.f32 %v505_v9, %v408_v13  ;;  %v747_v20 = vsel %vm3015_vm10, %v3827_v39, 0.0  ;;  %v3936_v39 = vld [vmem:[%s5492_s0 + $0x98] sm:$0xff] }
  0x5e   :  { %v693_v28 = vadd.f32 %v647_v14, %v550_v32  ;;  %v748_v29 = vsel %vm3015_vm10, %v3832_v42, 0.0  ;;  %v890_v36 = vsel %vm3040_vm12, %v839_v10, 0.0  ;;  %v891_v37 = vsel %vm3040_vm12, %v840_v26, 0.0  ;;  %v964_v32 = vld [vmem:[%s5492_s0 + $0x9d] sm:$0xff] }
  0x5f   :  { %v1241_v42 = vpack.c.bf16 %v1203_v40, %v1202_v19  ;;  %v694_v33 = vadd.f32 %v648_v17, %v551_v41  ;;  %v1033_v45 = vsel %vm3060_vm5, %v982_v34, 0.0  ;;  %v1034_v46 = vsel %vm3060_vm5, %v983_v16, 0.0  ;;  %v965_v17 = vld [vmem:[%s5492_s0 + $0xa5] sm:$0xff] }
  0x60   :  { %v793_v50 = vadd.f32 %v747_v20, %v693_v28  ;;  %v1176_v52 = vsel %vm3083_vm6, %v3921_v23, 0.0  ;;  %v1177_v54 = vsel %vm3083_vm6, %v3951_v35, 0.0  ;;  %v105_v51 = vsel %vm83_vm1, %v54_v25, 0.0  ;;  %v4022_v41 = vld [vmem:[%s5492_s0 + $0x9e] sm:$0xff]  ;;  %v4027_v20 = vld [vmem:[%s5492_s0 + $0x130] sm:$0xff] }
  0x61   :  { %2593 = vmatmul.mubr.bf16.gmra.mrb[28].mxu0 %v1241_v42  ;;  %v794_v57 = vadd.f32 %v748_v29, %v694_v33  ;;  %v106_v58 = vsel %vm83_vm1, %v3936_v39, 0.0  ;;  %v202_v56 = vsel %vm2920_vm8, %v151_v43, 0.0  ;;  %v343_v59 = vsel %vm2944_vm11, %v292_v44, 0.0  ;;  %v312_v43 = vld [vmem:[%s5492_s0 + $0x122] sm:$0xff] }
  0x62   :  { %v936_v63 = vadd.f32 %v890_v36, %v793_v50  ;;  %2596 = vmatprep.mubr.msk.bf16.mxu0 %vm2798_vm0, %v2797_v2  ;;  %v203_v0 = vsel %vm2920_vm8, %v152_v47, 0.0  ;;  %v344_v1 = vsel %vm2944_vm11, %v293_v48, 0.0  ;;  %v389_v3 = vadd.f32 %v343_v59, %v3811_v21  ;;  %v821_v21 = vld [vmem:[%s5492_s0 + $0x9c] sm:$0xff]  ;;  %v313_v48 = vld [vmem:[%s5492_s0 + $0x12a] sm:$0xff] }
  0x63   :  { %v937_v5 = vadd.f32 %v891_v37, %v794_v57  ;;  %v390_v6 = vadd.f32 %v344_v1, %v3813_v22  ;;  %v486_v8 = vsel %vm2963_vm13, %v3822_v27, 0.0  ;;  %v487_v9 = vsel %vm2963_vm13, %v3854_v53, 0.0  ;;  %v822_v22 = vld [vmem:[%s5492_s0 + $0xa4] sm:$0xff]  ;;  %v4036_v37 = vld [vmem:[%s5492_s0 + $0x138] sm:$0xff] }
  0x64   :  { %v1079_v11 = vadd.f32 %v1033_v45, %v936_v63  ;;  %v532_v12 = vadd.f32 %v486_v8, %v389_v3  ;;  %v629_v13 = vsel %vm2986_vm14, %v578_v60, 0.0  ;;  %v630_v14 = vsel %vm2986_vm14, %v579_v61, 0.0  ;;  %v4051_v45 = vld [vmem:[%s5492_s0 + $0xa6] sm:$0xff]  ;;  %v172_v47 = vld [vmem:[%s5492_s0 + $0x139] sm:$0xff]  ;;  %v598_v60 = vld [vmem:[%s5492_s0 + $0x12f] sm:$0xff] }
  0x65   :  { %v1080_v27 = vadd.f32 %v1034_v46, %v937_v5  ;;  %v4004_v10 = vadd.f32 %v202_v56, %v105_v51  ;;  %v533_v53 = vadd.f32 %v487_v9, %v390_v6  ;;  %v729_v26 = vsel %vm3015_vm10, %v54_v25, 0.0  ;;  %v599_v61 = vld [vmem:[%s5492_s0 + $0x137] sm:$0xff] }
  0x66   :  { %v1222_v34 = vadd.f32 %v1176_v52, %v1079_v11  ;;  %v4014_v16 = vadd.f32 %v203_v0, %v106_v58  ;;  %v675_v19 = vadd.f32 %v629_v13, %v532_v12  ;;  %v730_v40 = vsel %vm3015_vm10, %v3936_v39, 0.0  ;;  %v171_v39 = vld [vmem:[%s5492_s0 + $0x131] sm:$0xff] }
  0x67   :  { %v1223_v25 = vadd.f32 %v1177_v54, %v1080_v27  ;;  %v676_v28 = vadd.f32 %v630_v14, %v533_v53  ;;  %v872_v29 = vsel %vm3040_vm12, %v821_v21, 0.0  ;;  %v873_v36 = vsel %vm3040_vm12, %v822_v22, 0.0  ;;  %v985_v53 = vld [vmem:[%s5492_s0 + $0x145] sm:$0xff] }
  0x68   :  { %v775_v44 = vadd.f32 %v729_v26, %v675_v19  ;;  %v1015_v42 = vsel %vm3060_vm5, %v964_v32, 0.0  ;;  %v1016_v33 = vsel %vm3060_vm5, %v965_v17, 0.0  ;;  %v1158_v46 = vsel %vm3083_vm6, %v4022_v41, 0.0  ;;  %v4124_v19 = vld [vmem:[%s5492_s0 + $0x13e] sm:$0xff] }
  0x69   :  { %v1251_v50 = vpack.c.bf16 %v1223_v25, %v1222_v34  ;;  %v776_v52 = vadd.f32 %v730_v40, %v676_v28  ;;  %v1159_v54 = vsel %vm3083_vm6, %v4051_v45, 0.0  ;;  %v125_v51 = vsel %vm83_vm1, %v4027_v20, 0.0  ;;  %v4129_v40 = vld [vmem:[%s5492_s0 + $0xa0] sm:$0xff] }
  0x6a   :  { %v918_v57 = vadd.f32 %v872_v29, %v775_v44  ;;  %v126_v58 = vsel %vm83_vm1, %v4036_v37, 0.0  ;;  %v222_v56 = vsel %vm2920_vm8, %v171_v39, 0.0  ;;  %v363_v59 = vsel %vm2944_vm11, %v312_v43, 0.0  ;;  %v4148_v39 = vld [vmem:[%s5492_s0 + $0xa9] sm:$0xff]  ;;  %v294_v43 = vld [vmem:[%s5492_s0 + $0x92] sm:$0xff] }
  0x6b   :  { %2633 = vmatmul.mubr.bf16.gmra.mrb[4].mxu1 %v1251_v50  ;;  %v919_v63 = vadd.f32 %v873_v36, %v776_v52  ;;  %v223_v0 = vsel %vm2920_vm8, %v172_v47, 0.0  ;;  %v364_v1 = vsel %vm2944_vm11, %v313_v48, 0.0  ;;  %v409_v3 = vadd.f32 %v363_v59, %v3903_v30  ;;  %v295_v48 = vld [vmem:[%s5492_s0 + $0x9a] sm:$0xff] }
  0x6c   :  { %v1061_v5 = vadd.f32 %v1015_v42, %v918_v57  ;;  %2636 = vmatprep.mubr.msk.bf16.mxu1 %vm2798_vm0, %v2797_v2  ;;  %v410_v6 = vadd.f32 %v364_v1, %v3905_v15  ;;  %v506_v8 = vsel %vm2963_vm13, %v3921_v23, 0.0  ;;  %v507_v9 = vsel %vm2963_vm13, %v3951_v35, 0.0  ;;  %v841_v15 = vld [vmem:[%s5492_s0 + $0x13c] sm:$0xff]  ;;  %v842_v23 = vld [vmem:[%s5492_s0 + $0x144] sm:$0xff] }
  0x6d   :  { %v1062_v11 = vadd.f32 %v1016_v33, %v919_v63  ;;  %v552_v12 = vadd.f32 %v506_v8, %v409_v3  ;;  %v649_v13 = vsel %vm2986_vm14, %v598_v60, 0.0  ;;  %v650_v30 = vsel %vm2986_vm14, %v599_v61, 0.0  ;;  %v984_v35 = vld [vmem:[%s5492_s0 + $0x13d] sm:$0xff]  ;;  %v581_v61 = vld [vmem:[%s5492_s0 + $0xa7] sm:$0xff] }
  0x6e   :  { %v1204_v14 = vadd.f32 %v1158_v46, %v1061_v5  ;;  %v4108_v21 = vadd.f32 %v222_v56, %v125_v51  ;;  %v553_v22 = vadd.f32 %v507_v9, %v410_v6  ;;  %v749_v27 = vsel %vm3015_vm10, %v4027_v20, 0.0  ;;  %v4134_v20 = vld [vmem:[%s5492_s0 + $0xa8] sm:$0xff]  ;;  %v580_v57 = vld [vmem:[%s5492_s0 + $0x9f] sm:$0xff] }
  0x6f   :  { %v1205_v26 = vadd.f32 %v1159_v54, %v1062_v11  ;;  %v4116_v32 = vadd.f32 %v223_v0, %v126_v58  ;;  %v695_v17 = vadd.f32 %v649_v13, %v552_v12  ;;  %v750_v34 = vsel %vm3015_vm10, %v4036_v37, 0.0  ;;  %v153_v37 = vld [vmem:[%s5492_s0 + $0xa1] sm:$0xff]  ;;  %v823_v11 = vld [vmem:[%s5492_s0 + $0xac] sm:$0xff] }
  0x70   :  { %v696_v25 = vadd.f32 %v650_v30, %v553_v22  ;;  %v892_v28 = vsel %vm3040_vm12, %v841_v15, 0.0  ;;  %v893_v29 = vsel %vm3040_vm12, %v842_v23, 0.0  ;;  %v1035_v36 = vsel %vm3060_vm5, %v984_v35, 0.0  ;;  %v4158_v46 = vld [vmem:[%s5492_s0 + $0x146] sm:$0xff]  ;;  %v967_v30 = vld [vmem:[%s5492_s0 + $0xb5] sm:$0xff] }
  0x71   :  { %v1242_v44 = vpack.c.bf16 %v1205_v26, %v1204_v14  ;;  %v795_v42 = vadd.f32 %v749_v27, %v695_v17  ;;  %v1036_v33 = vsel %vm3060_vm5, %v985_v53, 0.0  ;;  %v1178_v47 = vsel %vm3083_vm6, %v4124_v19, 0.0  ;;  %v4221_v15 = vld [vmem:[%s5492_s0 + $0xae] sm:$0xff]  ;;  %v4232_v27 = vld [vmem:[%s5492_s0 + $0xb6] sm:$0xff]  ;;  %v4237_v53 = vld [vmem:[%s5492_s0 + $0x140] sm:$0xff] }
  0x72   :  { %v796_v50 = vadd.f32 %v750_v34, %v696_v25  ;;  %v1179_v52 = vsel %vm3083_vm6, %v4158_v46, 0.0  ;;  %v107_v54 = vsel %vm83_vm1, %v4129_v40, 0.0  ;;  %v108_v51 = vsel %vm83_vm1, %v4134_v20, 0.0  ;;  %v4242_v26 = vld [vmem:[%s5492_s0 + $0x148] sm:$0xff] }
  0x73   :  { %2597 = vmatmul.mubr.bf16.gmra.mrb[32].mxu0 %v1242_v44  ;;  %v938_v58 = vadd.f32 %v892_v28, %v795_v42  ;;  %v204_v56 = vsel %vm2920_vm8, %v153_v37, 0.0  ;;  %v205_v59 = vsel %vm2920_vm8, %v4148_v39, 0.0  ;;  %v345_v60 = vsel %vm2944_vm11, %v294_v43, 0.0  ;;  %v4247_v17 = vld [vmem:[%s5492_s0 + $0x141] sm:$0xff]  ;;  %v4256_v28 = vld [vmem:[%s5492_s0 + $0x149] sm:$0xff] }
  0x74   :  { %v939_v63 = vadd.f32 %v893_v29, %v796_v50  ;;  %2600 = vmatprep.mubr.msk.bf16.mxu0 %vm2798_vm0, %v2797_v2  ;;  %v346_v0 = vsel %vm2944_vm11, %v295_v48, 0.0  ;;  %v391_v1 = vadd.f32 %v345_v60, %v4004_v10  ;;  %v488_v3 = vsel %vm2963_vm13, %v4022_v41, 0.0  ;;  %v824_v10 = vld [vmem:[%s5492_s0 + $0xb4] sm:$0xff]  ;;  %v600_v42 = vld [vmem:[%s5492_s0 + $0x13f] sm:$0xff]  ;;  %v843_v60 = vld [vmem:[%s5492_s0 + $0x14c] sm:$0xff] }
  0x75   :  { %v1081_v5 = vadd.f32 %v1035_v36, %v938_v58  ;;  %v392_v6 = vadd.f32 %v346_v0, %v4014_v16  ;;  %v489_v8 = vsel %vm2963_vm13, %v4051_v45, 0.0  ;;  %v631_v9 = vsel %vm2986_vm14, %v580_v57, 0.0  ;;  %v966_v45 = vld [vmem:[%s5492_s0 + $0xad] sm:$0xff]  ;;  %v315_v36 = vld [vmem:[%s5492_s0 + $0x13a] sm:$0xff] }
  0x76   :  { %v1082_v12 = vadd.f32 %v1036_v33, %v939_v63  ;;  %v4208_v41 = vadd.f32 %v204_v56, %v107_v54  ;;  %v534_v13 = vadd.f32 %v488_v3, %v391_v1  ;;  %v632_v16 = vsel %vm2986_vm14, %v581_v61, 0.0  ;;  %v314_v29 = vld [vmem:[%s5492_s0 + $0x132] sm:$0xff]  ;;  %v601_v33 = vld [vmem:[%s5492_s0 + $0x147] sm:$0xff] }
  0x77   :  { %v1224_v23 = vadd.f32 %v1178_v47, %v1081_v5  ;;  %v535_v35 = vadd.f32 %v489_v8, %v392_v6  ;;  %v731_v14 = vsel %vm3015_vm10, %v4129_v40, 0.0  ;;  %v732_v22 = vsel %vm3015_vm10, %v4134_v20, 0.0  ;;  %v844_v61 = vld [vmem:[%s5492_s0 + $0x154] sm:$0xff] }
  0x78   :  { %v1225_v34 = vadd.f32 %v1179_v52, %v1082_v12  ;;  %v677_v40 = vadd.f32 %v631_v9, %v534_v13  ;;  %v874_v20 = vsel %vm3040_vm12, %v823_v11, 0.0  ;;  %v875_v25 = vsel %vm3040_vm12, %v824_v10, 0.0  ;;  %v986_v5 = vld [vmem:[%s5492_s0 + $0x14d] sm:$0xff]  ;;  %v987_v9 = vld [vmem:[%s5492_s0 + $0x155] sm:$0xff] }
  0x79   :  { %v678_v37 = vadd.f32 %v632_v16, %v535_v35  ;;  %v1017_v39 = vsel %vm3060_vm5, %v966_v45, 0.0  ;;  %v1018_v43 = vsel %vm3060_vm5, %v967_v30, 0.0  ;;  %v1160_v44 = vsel %vm3083_vm6, %v4221_v15, 0.0  ;;  %v4318_v11 = vld [vmem:[%s5492_s0 + $0xb0] sm:$0xff]  ;;  %v4330_v12 = vld [vmem:[%s5492_s0 + $0xb8] sm:$0xff] }
  0x7a   :  { %v1252_v47 = vpack.c.bf16 %v1225_v34, %v1224_v23  ;;  %v777_v48 = vadd.f32 %v731_v14, %v677_v40  ;;  %v1161_v50 = vsel %vm3083_vm6, %v4232_v27, 0.0  ;;  %v127_v52 = vsel %vm83_vm1, %v4237_v53, 0.0  ;;  %v4343_v23 = vld [vmem:[%s5492_s0 + $0x156] sm:$0xff]  ;;  %v296_v40 = vld [vmem:[%s5492_s0 + $0xa2] sm:$0xff] }
  0x7b   :  { %v778_v54 = vadd.f32 %v732_v22, %v678_v37  ;;  %v128_v57 = vsel %vm83_vm1, %v4242_v26, 0.0  ;;  %v224_v58 = vsel %vm2920_vm8, %v4247_v17, 0.0  ;;  %v365_v56 = vsel %vm2944_vm11, %v314_v29, 0.0  ;;  %v155_v35 = vld [vmem:[%s5492_s0 + $0xb1] sm:$0xff]  ;;  %v4351_v14 = vld [vmem:[%s5492_s0 + $0xb9] sm:$0xff] }
  0x7c   :  { %2637 = vmatmul.mubr.bf16.gmra.mrb[8].mxu1 %v1252_v47  ;;  %v251_v63 = vadd.f32 %v205_v59, %v108_v51  ;;  %v920_v0 = vadd.f32 %v874_v20, %v777_v48  ;;  %v225_v1 = vsel %vm2920_vm8, %v4256_v28, 0.0  ;;  %v366_v3 = vsel %vm2944_vm11, %v315_v36, 0.0 }
  0x7d   :  { %v921_v6 = vadd.f32 %v875_v25, %v778_v54  ;;  %2640 = vmatprep.mubr.msk.bf16.mxu1 %vm2798_vm0, %v2797_v2  ;;  %v411_v8 = vadd.f32 %v365_v56, %v4108_v21  ;;  %v412_v51 = vadd.f32 %v366_v3, %v4116_v32  ;;  %v508_v59 = vsel %vm2963_vm13, %v4124_v19, 0.0 }
  0x7e   :  { %v1063_v10 = vadd.f32 %v1017_v39, %v920_v0  ;;  %v509_v21 = vsel %vm2963_vm13, %v4158_v46, 0.0  ;;  %v651_v32 = vsel %vm2986_vm14, %v600_v42, 0.0  ;;  %v652_v19 = vsel %vm2986_vm14, %v601_v33, 0.0  ;;  %v4338_v46 = vld [vmem:[%s5492_s0 + $0x14e] sm:$0xff]  ;;  %v825_v0 = vld [vmem:[%s5492_s0 + $0xbc] sm:$0xff] }
  0x7f   :  { %v1064_v13 = vadd.f32 %v1018_v43, %v921_v6  ;;  %v554_v16 = vadd.f32 %v508_v59, %v411_v8  ;;  %v555_v45 = vadd.f32 %v509_v21, %v412_v51  ;;  %v751_v30 = vsel %vm3015_vm10, %v4237_v53, 0.0  ;;  %v826_v51 = vld [vmem:[%s5492_s0 + $0xc4] sm:$0xff] }
  0x80   :  { %v1206_v22 = vadd.f32 %v1160_v44, %v1063_v10  ;;  %v752_v53 = vsel %vm3015_vm10, %v4242_v26, 0.0  ;;  %v894_v17 = vsel %vm3040_vm12, %v843_v60, 0.0  ;;  %v895_v34 = vsel %vm3040_vm12, %v844_v61, 0.0  ;;  %v297_v26 = vld [vmem:[%s5492_s0 + $0xaa] sm:$0xff]  ;;  %v968_v59 = vld [vmem:[%s5492_s0 + $0xbd] sm:$0xff] }
  0x81   :  { %v1207_v20 = vadd.f32 %v1161_v50, %v1064_v13  ;;  %v697_v25 = vadd.f32 %v651_v32, %v554_v16  ;;  %v698_v28 = vadd.f32 %v652_v19, %v555_v45  ;;  %v1037_v29 = vsel %vm3060_vm5, %v986_v5, 0.0  ;;  %v582_v44 = vld [vmem:[%s5492_s0 + $0xaf] sm:$0xff]  ;;  %v583_v50 = vld [vmem:[%s5492_s0 + $0xb7] sm:$0xff] }
  0x82   :  { %v1038_v36 = vsel %vm3060_vm5, %v987_v9, 0.0  ;;  %v1180_v37 = vsel %vm3083_vm6, %v4338_v46, 0.0  ;;  %v1181_v39 = vsel %vm3083_vm6, %v4343_v23, 0.0  ;;  %v109_v43 = vsel %vm83_vm1, %v4318_v11, 0.0  ;;  %v4440_v45 = vld [vmem:[%s5492_s0 + $0xbe] sm:$0xff] }
  0x83   :  { %v1243_v42 = vpack.c.bf16 %v1207_v20, %v1206_v22  ;;  %v797_v33 = vadd.f32 %v751_v30, %v697_v25  ;;  %v798_v47 = vadd.f32 %v752_v53, %v698_v28  ;;  %v110_v48 = vsel %vm83_vm1, %v4330_v12, 0.0  ;;  %v4445_v30 = vld [vmem:[%s5492_s0 + $0xc6] sm:$0xff] }
  0x84   :  { %v206_v54 = vsel %vm2920_vm8, %v155_v35, 0.0  ;;  %v207_v56 = vsel %vm2920_vm8, %v4351_v14, 0.0  ;;  %v347_v60 = vsel %vm2944_vm11, %v296_v40, 0.0  ;;  %v348_v61 = vsel %vm2944_vm11, %v297_v26, 0.0  ;;  %v175_v35 = vld [vmem:[%s5492_s0 + $0x151] sm:$0xff]  ;;  %v176_v14 = vld [vmem:[%s5492_s0 + $0x159] sm:$0xff] }
  0x85   :  { %2601 = vmatmul.mubr.bf16.gmra.mrb[36].mxu0 %v1243_v42  ;;  %v270_v3 = vadd.f32 %v224_v58, %v127_v52  ;;  %v271_v5 = vadd.f32 %v225_v1, %v128_v57  ;;  %v940_v6 = vadd.f32 %v894_v17, %v797_v33  ;;  %v941_v8 = vadd.f32 %v895_v34, %v798_v47  ;;  %v969_v58 = vld [vmem:[%s5492_s0 + $0xc5] sm:$0xff]  ;;  %v602_v26 = vld [vmem:[%s5492_s0 + $0x14f] sm:$0xff] }
  0x86   :  { %2604 = vmatprep.mubr.msk.bf16.mxu0 %vm2798_vm0, %v2797_v2  ;;  %v393_v9 = vadd.f32 %v347_v60, %v4208_v41  ;;  %v394_v10 = vadd.f32 %v348_v61, %v251_v63  ;;  %v490_v52 = vsel %vm2963_vm13, %v4221_v15, 0.0  ;;  %v491_v57 = vsel %vm2963_vm13, %v4232_v27, 0.0  ;;  %v4425_v15 = vld [vmem:[%s5492_s0 + $0x150] sm:$0xff]  ;;  %v4430_v27 = vld [vmem:[%s5492_s0 + $0x158] sm:$0xff] }
  0x87   :  { %v1083_v1 = vadd.f32 %v1037_v29, %v940_v6  ;;  %v1084_v21 = vadd.f32 %v1038_v36, %v941_v8  ;;  %v633_v32 = vsel %vm2986_vm14, %v582_v44, 0.0  ;;  %v634_v41 = vsel %vm2986_vm14, %v583_v50, 0.0  ;;  %v317_v22 = vld [vmem:[%s5492_s0 + $0x14a] sm:$0xff] }
  0x88   :  { %v4432_v63 = vadd.f32 %v206_v54, %v109_v43  ;;  %v536_v19 = vadd.f32 %v490_v52, %v393_v9  ;;  %v537_v13 = vadd.f32 %v491_v57, %v394_v10  ;;  %v733_v16 = vsel %vm3015_vm10, %v4318_v11, 0.0  ;;  %v316_v11 = vld [vmem:[%s5492_s0 + $0x142] sm:$0xff]  ;;  %v603_v43 = vld [vmem:[%s5492_s0 + $0x157] sm:$0xff] }
  0x89   :  { %v1226_v53 = vadd.f32 %v1180_v37, %v1083_v1  ;;  %v1227_v17 = vadd.f32 %v1181_v39, %v1084_v21  ;;  %v734_v34 = vsel %vm3015_vm10, %v4330_v12, 0.0  ;;  %v876_v40 = vsel %vm3040_vm12, %v825_v0, 0.0  ;;  %v846_v9 = vld [vmem:[%s5492_s0 + $0x164] sm:$0xff] }
  0x8a   :  { %v679_v20 = vadd.f32 %v633_v32, %v536_v19  ;;  %v680_v25 = vadd.f32 %v634_v41, %v537_v13  ;;  %v877_v28 = vsel %vm3040_vm12, %v826_v51, 0.0  ;;  %v1019_v29 = vsel %vm3060_vm5, %v968_v59, 0.0  ;;  %v845_v59 = vld [vmem:[%s5492_s0 + $0x15c] sm:$0xff]  ;;  %v989_v57 = vld [vmem:[%s5492_s0 + $0x165] sm:$0xff] }
  0x8b   :  { %v1253_v36 = vpack.c.bf16 %v1227_v17, %v1226_v53  ;;  %v1020_v37 = vsel %vm3060_vm5, %v969_v58, 0.0  ;;  %v1162_v12 = vsel %vm3083_vm6, %v4440_v45, 0.0  ;;  %v1163_v39 = vsel %vm3083_vm6, %v4445_v30, 0.0  ;;  %v988_v10 = vld [vmem:[%s5492_s0 + $0x15d] sm:$0xff]  ;;  %v4554_v17 = vld [vmem:[%s5492_s0 + $0x166] sm:$0xff] }
  0x8c   :  { %v779_v44 = vadd.f32 %v733_v16, %v679_v20  ;;  %v780_v42 = vadd.f32 %v734_v34, %v680_v25  ;;  %v129_v33 = vsel %vm83_vm1, %v4425_v15, 0.0  ;;  %v130_v47 = vsel %vm83_vm1, %v4430_v27, 0.0  ;;  %v4540_v16 = vld [vmem:[%s5492_s0 + $0x15e] sm:$0xff]  ;;  %v298_v34 = vld [vmem:[%s5492_s0 + $0xb2] sm:$0xff] }
  0x8d   :  { %2641 = vmatmul.mubr.bf16.gmra.mrb[12].mxu1 %v1253_v36  ;;  %v226_v50 = vsel %vm2920_vm8, %v175_v35, 0.0  ;;  %v227_v54 = vsel %vm2920_vm8, %v176_v14, 0.0  ;;  %v367_v60 = vsel %vm2944_vm11, %v316_v11, 0.0  ;;  %v368_v61 = vsel %vm2944_vm11, %v317_v22, 0.0  ;;  %v157_v35 = vld [vmem:[%s5492_s0 + $0xc1] sm:$0xff]  ;;  %v158_v14 = vld [vmem:[%s5492_s0 + $0xc9] sm:$0xff] }
  0x8e   :  { %v253_v0 = vadd.f32 %v207_v56, %v110_v48  ;;  %v922_v6 = vadd.f32 %v876_v40, %v779_v44  ;;  %v923_v8 = vadd.f32 %v877_v28, %v780_v42  ;;  %2644 = vmatprep.mubr.msk.bf16.mxu1 %vm2798_vm0, %v2797_v2  ;;  %v413_v51 = vadd.f32 %v367_v60, %v270_v3  ;;  %v584_v42 = vld [vmem:[%s5492_s0 + $0xbf] sm:$0xff]  ;;  %v585_v60 = vld [vmem:[%s5492_s0 + $0xc7] sm:$0xff] }
  0x8f   :  { %v414_v52 = vadd.f32 %v368_v61, %v271_v5  ;;  %v510_v48 = vsel %vm2963_vm13, %v4338_v46, 0.0  ;;  %v511_v56 = vsel %vm2963_vm13, %v4343_v23, 0.0  ;;  %v653_v3 = vsel %vm2986_vm14, %v602_v26, 0.0  ;;  %v4523_v46 = vld [vmem:[%s5492_s0 + $0xc0] sm:$0xff]  ;;  %v4528_v23 = vld [vmem:[%s5492_s0 + $0xc8] sm:$0xff] }
  0x90   :  { %v1065_v58 = vadd.f32 %v1019_v29, %v922_v6  ;;  %v1066_v1 = vadd.f32 %v1020_v37, %v923_v8  ;;  %v556_v21 = vadd.f32 %v510_v48, %v413_v51  ;;  %v654_v5 = vsel %vm2986_vm14, %v603_v43, 0.0 }
  0x91   :  { %v4530_v32 = vadd.f32 %v226_v50, %v129_v33  ;;  %v4532_v41 = vadd.f32 %v227_v54, %v130_v47  ;;  %v557_v19 = vadd.f32 %v511_v56, %v414_v52  ;;  %v753_v13 = vsel %vm3015_vm10, %v4425_v15, 0.0 }
  0x92   :  { %v1208_v11 = vadd.f32 %v1162_v12, %v1065_v58  ;;  %v1209_v22 = vadd.f32 %v1163_v39, %v1066_v1  ;;  %v699_v53 = vadd.f32 %v653_v3, %v556_v21  ;;  %v754_v15 = vsel %vm3015_vm10, %v4430_v27, 0.0  ;;  %v299_v27 = vld [vmem:[%s5492_s0 + $0xba] sm:$0xff] }
  0x93   :  { %v700_v40 = vadd.f32 %v654_v5, %v557_v19  ;;  %v896_v20 = vsel %vm3040_vm12, %v845_v59, 0.0  ;;  %v897_v25 = vsel %vm3040_vm12, %v846_v9, 0.0  ;;  %v1039_v28 = vsel %vm3060_vm5, %v988_v10, 0.0 }
  0x94   :  { %v1244_v29 = vpack.c.bf16 %v1209_v22, %v1208_v11  ;;  %v799_v26 = vadd.f32 %v753_v13, %v699_v53  ;;  %v1040_v36 = vsel %vm3060_vm5, %v989_v57, 0.0  ;;  %v1182_v37 = vsel %vm3083_vm6, %v4540_v16, 0.0 }
  0x95   :  { %v800_v12 = vadd.f32 %v754_v15, %v700_v40  ;;  %v1183_v39 = vsel %vm3083_vm6, %v4554_v17, 0.0  ;;  %v111_v43 = vsel %vm83_vm1, %v4523_v46, 0.0  ;;  %v112_v44 = vsel %vm83_vm1, %v4528_v23, 0.0 }
  0x96   :  { %2605 = vmatmul.mubr.bf16.gmra.mrb[40].mxu0 %v1244_v29  ;;  %v942_v33 = vadd.f32 %v896_v20, %v799_v26  ;;  %v208_v47 = vsel %vm2920_vm8, %v157_v35, 0.0  ;;  %v209_v50 = vsel %vm2920_vm8, %v158_v14, 0.0  ;;  %v349_v54 = vsel %vm2944_vm11, %v298_v34, 0.0 }
  0x97   :  { %14 = vsyncpa [#allocation7], 0  ;;  %v943_v61 = vadd.f32 %v897_v25, %v800_v12  ;;  %2608 = vmatprep.mubr.msk.bf16.mxu0 %vm2798_vm0, %v2797_v2  ;;  %v350_v6 = vsel %vm2944_vm11, %v299_v27, 0.0  ;;  %v395_v8 = vadd.f32 %v349_v54, %v4432_v63  ;;  %v492_v51 = vsel %vm2963_vm13, %v4440_v45, 0.0  ;;  %v827_v48 = vld [vmem:[%s5492_s0 + $0xcc] sm:$0xff]  ;;  %v971_v57 = vld [vmem:[%s5492_s0 + $0xd5] sm:$0xff] }
  0x98   :  { %v1085_v59 = vadd.f32 %v1039_v28, %v942_v33  ;;  %v396_v9 = vadd.f32 %v350_v6, %v253_v0  ;;  %v493_v10 = vsel %vm2963_vm13, %v4445_v30, 0.0  ;;  %v635_v52 = vsel %vm2986_vm14, %v584_v42, 0.0  ;;  %v828_v0 = vld [vmem:[%s5492_s0 + $0xd4] sm:$0xff]  ;;  %v4631_v19 = vld [vmem:[%s5492_s0 + $0x160] sm:$0xff]  ;;  %v2756_v7 = vld [vmem:[%s5497_s5 + $0x8] sm:$0xff]   ;;  %s2799_s12 = smov [#allocation6]  }
  0x99   :  { %v1086_v56 = vadd.f32 %v1040_v36, %v943_v61  ;;  %v4610_v3 = vadd.f32 %v208_v47, %v111_v43  ;;  %v538_v63 = vadd.f32 %v492_v51, %v395_v8  ;;  %v636_v45 = vsel %vm2986_vm14, %v585_v60, 0.0  ;;  %v970_v30 = vld [vmem:[%s5492_s0 + $0xcd] sm:$0xff]  ;;  %v177_v22 = vld [vmem:[%s5492_s0 + $0x161] sm:$0xff]  ;;  %v4687_v60 = vld [vmem:[%s5492_s0 + $0xd6] sm:$0xff]  ;;  %s2443_s13 = sshll.u32 %s2799_s12, 4  ;;  %s2444_s13 = int_to_ptr.vmem [resolvable:$true] %s2443_s13 }
  0x9a   :  { %v1228_v58 = vadd.f32 %v1182_v37, %v1085_v59  ;;  %v4623_v1 = vadd.f32 %v209_v50, %v112_v44  ;;  %v539_v21 = vadd.f32 %v493_v10, %v396_v9  ;;  %v735_v5 = vsel %vm3015_vm10, %v4523_v46, 0.0  ;;  %v318_v46 = vld [vmem:[%s5492_s0 + $0x152] sm:$0xff]  ;;  %v319_v53 = vld [vmem:[%s5492_s0 + $0x15a] sm:$0xff]  ;;  %v605_v36 = vld [vmem:[%s5492_s0 + $0x167] sm:$0xff]  ;;  %p2778_p1 = scmp.lt.s32.totalorder %s2444_s13, %s2444_s13 }
  0x9b   :  { %v1229_v13 = vadd.f32 %v1183_v39, %v1086_v56  ;;  %v681_v35 = vadd.f32 %v635_v52, %v538_v63  ;;  %v736_v14 = vsel %vm3015_vm10, %v4528_v23, 0.0  ;;  %v878_v11 = vsel %vm3040_vm12, %v827_v48, 0.0  ;;  %v4656_v20 = vld [vmem:[%s5492_s0 + $0xce] sm:$0xff]  ;;  %v604_v26 = vld [vmem:[%s5492_s0 + $0x15f] sm:$0xff] }
  0x9c   :  { %v682_v15 = vadd.f32 %v636_v45, %v539_v21  ;;  %v879_v34 = vsel %vm3040_vm12, %v828_v0, 0.0  ;;  %v1021_v23 = vsel %vm3060_vm5, %v970_v30, 0.0  ;;  %v1022_v40 = vsel %vm3060_vm5, %v971_v57, 0.0  ;;  %v705_v50 = vld [vmem:[%s5492_s0 + $0x168] sm:$0xff]  ;;  %v991_v10 = vld [vmem:[%s5492_s0 + $0x175] sm:$0xff]  ;;  %v2755_v62 = vld [vmem:[%s5497_s5] sm:$0xff]  }
  0x9d   :  { %v1254_v25 = vpack.c.bf16 %v1229_v13, %v1228_v58  ;;  %v781_v28 = vadd.f32 %v735_v5, %v681_v35  ;;  %v1164_v27 = vsel %vm3083_vm6, %v4656_v20, 0.0  ;;  %v131_v29 = vsel %vm83_vm1, %v4631_v19, 0.0  ;;  %v847_v61 = vld [vmem:[%s5492_s0 + $0x16c] sm:$0xff]  ;;  %v1134_v45 = vld [vmem:[%s5492_s0 + $0x176] sm:$0xff] }
  0x9e   :  { %v782_v37 = vadd.f32 %v736_v14, %v682_v15  ;;  %v228_v12 = vsel %vm2920_vm8, %v177_v22, 0.0  ;;  %v369_v39 = vsel %vm2944_vm11, %v318_v46, 0.0  ;;  %v370_v43 = vsel %vm2944_vm11, %v319_v53, 0.0  ;;  %v990_v9 = vld [vmem:[%s5492_s0 + $0x16d] sm:$0xff]  ;;  %v4731_v5 = vld [vmem:[%s5492_s0 + $0xd8] sm:$0xff] }
  0x9f   :  { %2645 = vmatmul.mubr.bf16.gmra.mrb[16].mxu1 %v1254_v25  ;;  %v924_v44 = vadd.f32 %v878_v11, %v781_v28  ;;  %v415_v42 = vadd.f32 %v369_v39, %v4530_v32  ;;  %v416_v33 = vadd.f32 %v370_v43, %v4532_v41  ;;  %v512_v47 = vsel %vm2963_vm13, %v4540_v16, 0.0  ;;  %v62_v21 = vld [vmem:[%s5492_s0 + $0xd0] sm:$0xff]  ;;  %v160_v53 = vld [vmem:[%s5492_s0 + $0xd9] sm:$0xff] }
  0xa0   :  { %v925_v54 = vadd.f32 %v879_v34, %v782_v37  ;;  %2648 = vmatprep.mubr.msk.bf16.mxu1 %vm2798_vm0, %v2797_v2  ;;  %v513_v32 = vsel %vm2963_vm13, %v4554_v17, 0.0  ;;  %v655_v41 = vsel %vm2986_vm14, %v604_v26, 0.0  ;;  %v656_v16 = vsel %vm2986_vm14, %v605_v36, 0.0  ;;  %v848_v17 = vld [vmem:[%s5492_s0 + $0x174] sm:$0xff]  ;;  %v301_v25 = vld [vmem:[%s5492_s0 + $0xca] sm:$0xff] }
  0xa1   :  { %v1067_v6 = vadd.f32 %v1021_v23, %v924_v44  ;;  %v1165_v8 = vsel %vm3083_vm6, %v4687_v60, 0.0  ;;  %v558_v51 = vadd.f32 %v512_v47, %v415_v42  ;;  %v559_v59 = vadd.f32 %v513_v32, %v416_v33  ;;  %v4745_v22 = vld [vmem:[%s5492_s0 + $0x16e] sm:$0xff]  ;;  %v587_v44 = vld [vmem:[%s5492_s0 + $0xd7] sm:$0xff] }
  0xa2   :  { %v1068_v52 = vadd.f32 %v1022_v40, %v925_v54  ;;  %v4713_v48 = vadd.f32 %v228_v12, %v131_v29  ;;  %v755_v56 = vsel %vm3015_vm10, %v4631_v19, 0.0  ;;  %v756_v63 = vsel %vm3015_vm10, %v705_v50, 0.0  ;;  %v300_v19 = vld [vmem:[%s5492_s0 + $0xc2] sm:$0xff]  ;;  %v159_v46 = vld [vmem:[%s5492_s0 + $0xd1] sm:$0xff] }
  0xa3   :  { %v1210_v0 = vadd.f32 %v1164_v27, %v1067_v6  ;;  %v701_v30 = vadd.f32 %v655_v41, %v558_v51  ;;  %v702_v57 = vadd.f32 %v656_v16, %v559_v59  ;;  %v898_v58 = vsel %vm3040_vm12, %v847_v61, 0.0  ;;  %v586_v36 = vld [vmem:[%s5492_s0 + $0xcf] sm:$0xff]  ;;  %v973_v51 = vld [vmem:[%s5492_s0 + $0xe5] sm:$0xff] }
  0xa4   :  { %v1211_v13 = vadd.f32 %v1165_v8, %v1068_v52  ;;  %v899_v35 = vsel %vm3040_vm12, %v848_v17, 0.0  ;;  %v1041_v14 = vsel %vm3060_vm5, %v990_v9, 0.0  ;;  %v1042_v11 = vsel %vm3060_vm5, %v991_v10, 0.0  ;;  %v81_v52 = vld [vmem:[%s5492_s0 + $0x168] sm:$0x3] }
  0xa5   :  { %v801_v15 = vadd.f32 %v755_v56, %v701_v30  ;;  %v802_v34 = vadd.f32 %v756_v63, %v702_v57  ;;  %v1184_v23 = vsel %vm3083_vm6, %v4745_v22, 0.0  ;;  %v1185_v40 = vsel %vm3083_vm6, %v1134_v45, 0.0  ;;  %v178_v56 = vld [vmem:[%s5492_s0 + $0x169] sm:$0x3] }
  0xa6   :  { %v1245_v28 = vpack.c.bf16 %v1211_v13, %v1210_v0  ;;  %v113_v27 = vsel %vm83_vm1, %v62_v21, 0.0  ;;  %v114_v29 = vsel %vm83_vm1, %v4731_v5, 0.0  ;;  %v351_v26 = vsel %vm2944_vm11, %v300_v19, 0.0  ;;  %v320_v63 = vld [vmem:[%s5492_s0 + $0x162] sm:$0xff] }
  0xa7   :  { %v944_v37 = vadd.f32 %v898_v58, %v801_v15  ;;  %v945_v12 = vadd.f32 %v899_v35, %v802_v34  ;;  %v210_v39 = vsel %vm2920_vm8, %v159_v46, 0.0  ;;  %v211_v43 = vsel %vm2920_vm8, %v160_v53, 0.0  ;;  %v321_v58 = vld [vmem:[%s5492_s0 + $0x16a] sm:$0x3] }
  0xa8   :  { %2609 = vmatmul.mubr.bf16.gmra.mrb[44].mxu0 %v1245_v28  ;;  %v352_v42 = vsel %vm2944_vm11, %v301_v25, 0.0  ;;  %v397_v33 = vadd.f32 %v351_v26, %v4610_v3  ;;  %v494_v47 = vsel %vm2963_vm13, %v4656_v20, 0.0  ;;  %v495_v50 = vsel %vm2963_vm13, %v4687_v60, 0.0  ;;  %v829_v3 = vld [vmem:[%s5492_s0 + $0xdc] sm:$0xff]  ;;  %v830_v20 = vld [vmem:[%s5492_s0 + $0xe4] sm:$0xff] }
  0xa9   :  { %v1087_v54 = vadd.f32 %v1041_v14, %v944_v37  ;;  %v1088_v32 = vadd.f32 %v1042_v11, %v945_v12  ;;  %2612 = vmatprep.mubr.msk.bf16.mxu0 %vm2798_vm0, %v2797_v2  ;;  %v398_v41 = vadd.f32 %v352_v42, %v4623_v1  ;;  %v637_v16 = vsel %vm2986_vm14, %v586_v36, 0.0  ;;  %v972_v1 = vld [vmem:[%s5492_s0 + $0xdd] sm:$0xff]  ;;  %v606_v14 = vld [vmem:[%s5492_s0 + $0x16f] sm:$0xff]  ;;  %v4864_v36 = vld [vmem:[%s5492_s0 + $0xe6] sm:$0xff] }
  0xaa   :  { %v4798_v61 = vadd.f32 %v210_v39, %v113_v27  ;;  %v4800_v60 = vadd.f32 %v211_v43, %v114_v29  ;;  %v540_v6 = vadd.f32 %v494_v47, %v397_v33  ;;  %v638_v8 = vsel %vm2986_vm14, %v587_v44, 0.0  ;;  %v607_v27 = vld [vmem:[%s5492_s0 + $0x177] sm:$0x3]  ;;  %v850_v47 = vld [vmem:[%s5492_s0 + $0x184] sm:$0x3] }
  0xab   :  { %v1230_v59 = vadd.f32 %v1184_v23, %v1087_v54  ;;  %v1231_v17 = vadd.f32 %v1185_v40, %v1088_v32  ;;  %v541_v9 = vadd.f32 %v495_v50, %v398_v41  ;;  %v737_v10 = vsel %vm3015_vm10, %v62_v21, 0.0  ;;  %v4850_v23 = vld [vmem:[%s5492_s0 + $0xde] sm:$0xff]  ;;  %v706_v29 = vld [vmem:[%s5492_s0 + $0x170] sm:$0xff]  ;;  %v707_v39 = vld [vmem:[%s5492_s0 + $0x178] sm:$0x3] }
  0xac   :  { %v683_v45 = vadd.f32 %v637_v16, %v540_v6  ;;  %v738_v0 = vsel %vm3015_vm10, %v4731_v5, 0.0  ;;  %v880_v30 = vsel %vm3040_vm12, %v829_v3, 0.0  ;;  %v881_v57 = vsel %vm3040_vm12, %v830_v20, 0.0  ;;  %v464_v5 = vld [vmem:[%s5492_s0 + $0x176] sm:$0x3]  ;;  %v992_v50 = vld [vmem:[%s5492_s0 + $0x17d] sm:$0xff] }
  0xad   :  { %v1255_v21 = vpack.c.bf16 %v1231_v17, %v1230_v59  ;;  %v684_v19 = vadd.f32 %v638_v8, %v541_v9  ;;  %v1023_v13 = vsel %vm3060_vm5, %v972_v1, 0.0  ;;  %v1024_v35 = vsel %vm3060_vm5, %v973_v51, 0.0  ;;  %v993_v3 = vld [vmem:[%s5492_s0 + $0x185] sm:$0x3]  ;;  %v4916_v9 = vld [vmem:[%s5492_s0 + $0xe8] sm:$0xff] }
  0xae   :  { %v783_v11 = vadd.f32 %v737_v10, %v683_v45  ;;  %v132_v46 = vsel %vm83_vm1, %v81_v52, 0.0  ;;  %v229_v53 = vsel %vm2920_vm8, %v178_v56, 0.0  ;;  %v371_v15 = vsel %vm2944_vm11, %v320_v63, 0.0  ;;  %v1135_v20 = vld [vmem:[%s5492_s0 + $0x17e] sm:$0xff]  ;;  %v1136_v59 = vld [vmem:[%s5492_s0 + $0x186] sm:$0x3] }
  0xaf   :  { %2649 = vmatmul.mubr.bf16.gmra.mrb[20].mxu1 %v1255_v21  ;;  %v784_v34 = vadd.f32 %v738_v0, %v684_v19  ;;  %v275_v40 = vadd.f32 %v229_v53, %v132_v46  ;;  %v372_v25 = vsel %vm2944_vm11, %v321_v58, 0.0  ;;  %v417_v28 = vadd.f32 %v371_v15, %v4713_v48  ;;  %v4911_v17 = vld [vmem:[%s5492_s0 + $0xe0] sm:$0xff]  ;;  %v162_v21 = vld [vmem:[%s5492_s0 + $0xe9] sm:$0xff]  ;;  %v302_v19 = vld [vmem:[%s5492_s0 + $0xd2] sm:$0xff] }
  0xb0   :  { %v926_v26 = vadd.f32 %v880_v30, %v783_v11  ;;  %2652 = vmatprep.mubr.msk.bf16.mxu1 %vm2798_vm0, %v2797_v2  ;;  %v514_v48 = vsel %vm2963_vm13, %v4745_v22, 0.0  ;;  %v515_v37 = vsel %vm2963_vm13, %v464_v5, 0.0  ;;  %v657_v12 = vsel %vm2986_vm14, %v606_v14, 0.0  ;;  %v849_v22 = vld [vmem:[%s5492_s0 + $0x17c] sm:$0xff] }
  0xb1   :  { %v927_v43 = vadd.f32 %v881_v57, %v784_v34  ;;  %v1166_v44 = vsel %vm3083_vm6, %v4850_v23, 0.0  ;;  %v418_v42 = vadd.f32 %v372_v25, %v275_v40  ;;  %v560_v33 = vadd.f32 %v514_v48, %v417_v28  ;;  %v161_v45 = vld [vmem:[%s5492_s0 + $0xe1] sm:$0xff] }
  0xb2   :  { %v1069_v54 = vadd.f32 %v1023_v13, %v926_v26  ;;  %v1167_v32 = vsel %vm3083_vm6, %v4864_v36, 0.0  ;;  %v658_v41 = vsel %vm2986_vm14, %v607_v27, 0.0  ;;  %v757_v16 = vsel %vm3015_vm10, %v706_v29, 0.0  ;;  %v303_v13 = vld [vmem:[%s5492_s0 + $0xda] sm:$0xff]  ;;  %v589_v25 = vld [vmem:[%s5492_s0 + $0xe7] sm:$0xff] }
  0xb3   :  { %v1070_v6 = vadd.f32 %v1024_v35, %v927_v43  ;;  %v561_v8 = vadd.f32 %v515_v37, %v418_v42  ;;  %v703_v1 = vadd.f32 %v657_v12, %v560_v33  ;;  %v758_v51 = vsel %vm3015_vm10, %v707_v39, 0.0  ;;  %v588_v40 = vld [vmem:[%s5492_s0 + $0xdf] sm:$0xff]  ;;  %v831_v43 = vld [vmem:[%s5492_s0 + $0xec] sm:$0xff] }
  0xb4   :  { %v1212_v10 = vadd.f32 %v1166_v44, %v1069_v54  ;;  %v900_v52 = vsel %vm3040_vm12, %v849_v22, 0.0  ;;  %v901_v56 = vsel %vm3040_vm12, %v850_v47, 0.0  ;;  %v1043_v63 = vsel %vm3060_vm5, %v992_v50, 0.0  ;;  %v974_v54 = vld [vmem:[%s5492_s0 + $0xed] sm:$0xff] }
  0xb5   :  { %v1213_v0 = vadd.f32 %v1167_v32, %v1070_v6  ;;  %v704_v30 = vadd.f32 %v658_v41, %v561_v8  ;;  %v803_v57 = vadd.f32 %v757_v16, %v703_v1  ;;  %v1044_v58 = vsel %vm3060_vm5, %v993_v3, 0.0  ;;  %v1117_v32 = vld [vmem:[%s5492_s0 + $0xee] sm:$0xff]  ;;  %v1118_v6 = vld [vmem:[%s5492_s0 + $0xf6] sm:$0xff] }
  0xb6   :  { %v1186_v35 = vsel %vm3083_vm6, %v1135_v20, 0.0  ;;  %v1187_v5 = vsel %vm3083_vm6, %v1136_v59, 0.0  ;;  %v115_v14 = vsel %vm83_vm1, %v4911_v17, 0.0  ;;  %v116_v11 = vsel %vm83_vm1, %v4916_v9, 0.0  ;;  %v66_v8 = vld [vmem:[%s5492_s0 + $0xf0] sm:$0xff]  ;;  %v5008_v1 = vld [vmem:[%s5492_s0 + $0xf8] sm:$0xff] }
  0xb7   :  { %v1246_v46 = vpack.c.bf16 %v1213_v0, %v1212_v10  ;;  %v804_v53 = vadd.f32 %v758_v51, %v704_v30  ;;  %v946_v15 = vadd.f32 %v900_v52, %v803_v57  ;;  %v212_v34 = vsel %vm2920_vm8, %v161_v45, 0.0  ;;  %v163_v10 = vld [vmem:[%s5492_s0 + $0xf1] sm:$0xff]  ;;  %v304_v52 = vld [vmem:[%s5492_s0 + $0xe2] sm:$0xff]  ;;  %v164_v57 = vld [vmem:[%s5492_s0 + $0xf9] sm:$0xff] }
  0xb8   :  { %v213_v28 = vsel %vm2920_vm8, %v162_v21, 0.0  ;;  %v353_v27 = vsel %vm2944_vm11, %v302_v19, 0.0  ;;  %v354_v29 = vsel %vm2944_vm11, %v303_v13, 0.0  ;;  %v496_v26 = vsel %vm2963_vm13, %v4850_v23, 0.0 }
  0xb9   :  { %2613 = vmatmul.mubr.bf16.gmra.mrb[48].mxu0 %v1246_v46  ;;  %v947_v48 = vadd.f32 %v901_v56, %v804_v53  ;;  %v1089_v37 = vadd.f32 %v1043_v63, %v946_v15  ;;  %v399_v12 = vadd.f32 %v353_v27, %v4798_v61  ;;  %v400_v39 = vadd.f32 %v354_v29, %v4800_v60  ;;  %v832_v60 = vld [vmem:[%s5492_s0 + $0xf4] sm:$0xff]  ;;  %v305_v56 = vld [vmem:[%s5492_s0 + $0xea] sm:$0xff] }
  0xba   :  { %2616 = vmatprep.mubr.msk.bf16.mxu0 %vm2798_vm0, %v2797_v2  ;;  %v258_v44 = vadd.f32 %v212_v34, %v115_v14  ;;  %v497_v42 = vsel %vm2963_vm13, %v4864_v36, 0.0  ;;  %v639_v23 = vsel %vm2986_vm14, %v588_v40, 0.0  ;;  %v640_v61 = vsel %vm2986_vm14, %v589_v25, 0.0  ;;  %v975_v36 = vld [vmem:[%s5492_s0 + $0xf5] sm:$0xff] }
  0xbb   :  { %v1090_v33 = vadd.f32 %v1044_v58, %v947_v48  ;;  %v1232_v22 = vadd.f32 %v1186_v35, %v1089_v37  ;;  %v542_v47 = vadd.f32 %v496_v26, %v399_v12  ;;  %v543_v50 = vadd.f32 %v497_v42, %v400_v39  ;;  %v590_v35 = vld [vmem:[%s5492_s0 + $0xef] sm:$0xff]  ;;  %v591_v53 = vld [vmem:[%s5492_s0 + $0xf7] sm:$0xff] }
  0xbc   :  { %v259_v41 = vadd.f32 %v213_v28, %v116_v11  ;;  %v739_v16 = vsel %vm3015_vm10, %v4911_v17, 0.0  ;;  %v740_v3 = vsel %vm3015_vm10, %v4916_v9, 0.0  ;;  %v882_v20 = vsel %vm3040_vm12, %v831_v43, 0.0  ;;  %v833_v43 = vld [vmem:[%s5492_s0 + $0xfc] sm:$0xff] }
  0xbd   :  { %v1233_v51 = vadd.f32 %v1187_v5, %v1090_v33  ;;  %v685_v59 = vadd.f32 %v639_v23, %v542_v47  ;;  %v686_v17 = vadd.f32 %v640_v61, %v543_v50  ;;  %v883_v9 = vsel %vm3040_vm12, %v832_v60, 0.0  ;;  %v976_v42 = vld [vmem:[%s5492_s0 + $0xfd] sm:$0xff]  ;;  %v306_v47 = vld [vmem:[%s5492_s0 + $0xf2] sm:$0xff] }
  0xbe   :  { %v1025_v63 = vsel %vm3060_vm5, %v974_v54, 0.0  ;;  %v1026_v45 = vsel %vm3060_vm5, %v975_v36, 0.0  ;;  %v1168_v0 = vsel %vm3083_vm6, %v1117_v32, 0.0  ;;  %v1169_v30 = vsel %vm3083_vm6, %v1118_v6, 0.0 }
  0xbf   :  { %v1256_v58 = vpack.c.bf16 %v1233_v51, %v1232_v22  ;;  %v785_v21 = vadd.f32 %v739_v16, %v685_v59  ;;  %v786_v19 = vadd.f32 %v740_v3, %v686_v17  ;;  %v117_v13 = vsel %vm83_vm1, %v66_v8, 0.0  ;;  %v977_v22 = vld [vmem:[%s5492_s0 + $0x105] sm:$0xff]  ;;  %v307_v16 = vld [vmem:[%s5492_s0 + $0xfa] sm:$0xff] }
  0xc0   :  { %v118_v5 = vsel %vm83_vm1, %v5008_v1, 0.0  ;;  %v214_v14 = vsel %vm2920_vm8, %v163_v10, 0.0  ;;  %v355_v11 = vsel %vm2944_vm11, %v304_v52, 0.0  ;;  %v356_v46 = vsel %vm2944_vm11, %v305_v56, 0.0  ;;  %v592_v51 = vld [vmem:[%s5492_s0 + $0xff] sm:$0xff]  ;;  %v593_v52 = vld [vmem:[%s5492_s0 + $0x107] sm:$0xff] }
  0xc1   :  { %2653 = vmatmul.mubr.bf16.gmra.mrb[24].mxu1 %v1256_v58  ;;  %v928_v15 = vadd.f32 %v882_v20, %v785_v21  ;;  %v929_v34 = vadd.f32 %v883_v9, %v786_v19  ;;  %v215_v40 = vsel %vm2920_vm8, %v164_v57, 0.0  ;;  %v401_v25 = vadd.f32 %v355_v11, %v258_v44  ;;  %v834_v44 = vld [vmem:[%s5492_s0 + $0x104] sm:$0xff] }
  0xc2   :  { %v402_v28 = vadd.f32 %v356_v46, %v259_v41  ;;  %v498_v27 = vsel %vm2963_vm13, %v1117_v32, 0.0  ;;  %v499_v29 = vsel %vm2963_vm13, %v1118_v6, 0.0  ;;  %v641_v26 = vsel %vm2986_vm14, %v590_v35, 0.0  ;;  %v1119_v41 = vld [vmem:[%s5492_s0 + $0xfe] sm:$0xff] }
  0xc3   :  { %v1071_v48 = vadd.f32 %v1025_v63, %v928_v15  ;;  %v1072_v37 = vadd.f32 %v1026_v45, %v929_v34  ;;  %v544_v12 = vadd.f32 %v498_v27, %v401_v25  ;;  %v642_v39 = vsel %vm2986_vm14, %v591_v53, 0.0  ;;  %v2771_v15 = vld [vmem:[%s5492_s0 + $0x100] sm:$0xff]  ;;  %v2772_v27 = vld [vmem:[%s5492_s0 + $0x108] sm:$0xff] }
  0xc4   :  { %v260_v23 = vadd.f32 %v214_v14, %v117_v13  ;;  %v261_v61 = vadd.f32 %v215_v40, %v118_v5  ;;  %v545_v60 = vadd.f32 %v499_v29, %v402_v28  ;;  %v741_v33 = vsel %vm3015_vm10, %v66_v8, 0.0  ;;  %v835_v14 = vld [vmem:[%s5492_s0 + $0x10c] sm:$0xff]  ;;  %v836_v40 = vld [vmem:[%s5492_s0 + $0x114] sm:$0xff] }
  0xc5   :  { %v1214_v50 = vadd.f32 %v1168_v0, %v1071_v48  ;;  %v1215_v54 = vadd.f32 %v1169_v30, %v1072_v37  ;;  %v687_v36 = vadd.f32 %v641_v26, %v544_v12  ;;  %v742_v32 = vsel %vm3015_vm10, %v5008_v1, 0.0  ;;  %v1120_v1 = vld [vmem:[%s5492_s0 + $0x106] sm:$0xff] }
  0xc6   :  { %v688_v3 = vadd.f32 %v642_v39, %v545_v60  ;;  %v884_v20 = vsel %vm3040_vm12, %v833_v43, 0.0  ;;  %v885_v6 = vsel %vm3040_vm12, %v834_v44, 0.0  ;;  %v1027_v8 = vsel %vm3060_vm5, %v976_v42, 0.0  ;;  %v978_v26 = vld [vmem:[%s5492_s0 + $0x10d] sm:$0xff]  ;;  %v979_v39 = vld [vmem:[%s5492_s0 + $0x115] sm:$0xff] }
  0xc7   :  { %v1247_v59 = vpack.c.bf16 %v1215_v54, %v1214_v50  ;;  %v787_v17 = vadd.f32 %v741_v33, %v687_v36  ;;  %v1028_v9 = vsel %vm3060_vm5, %v977_v22, 0.0  ;;  %v357_v10 = vsel %vm2944_vm11, %v306_v47, 0.0  ;;  %v1122_v33 = vld [vmem:[%s5492_s0 + $0x116] sm:$0xff] }
  0xc8   :  { %v788_v56 = vadd.f32 %v742_v32, %v688_v3  ;;  %v358_v63 = vsel %vm2944_vm11, %v307_v16, 0.0  ;;  %v403_v45 = vadd.f32 %v357_v10, %v260_v23  ;;  %v500_v0 = vsel %vm2963_vm13, %v1119_v41, 0.0  ;;  %v1121_v23 = vld [vmem:[%s5492_s0 + $0x10e] sm:$0xff] }
  0xc9   :  { %2617 = vmatmul.mubr.bf16.gmra.mrb[52].mxu0 %v1247_v59  ;;  %v930_v30 = vadd.f32 %v884_v20, %v787_v17  ;;  %v404_v57 = vadd.f32 %v358_v63, %v261_v61  ;;  %v501_v58 = vsel %vm2963_vm13, %v1120_v1, 0.0  ;;  %v643_v21 = vsel %vm2986_vm14, %v592_v51, 0.0 }
  0xca   :  { %2620 = vmatprep.mubr.msk.bf16.mxu0 %vm2798_vm0, %v2797_v2  ;;  %v931_v19 = vadd.f32 %v885_v6, %v788_v56  ;;  %v1170_v13 = vsel %vm3083_vm6, %v1119_v41, 0.0  ;;  %v546_v35 = vadd.f32 %v500_v0, %v403_v45  ;;  %v644_v5 = vsel %vm2986_vm14, %v593_v52, 0.0 }
  0xcb   :  { %v1073_v11 = vadd.f32 %v1027_v8, %v930_v30  ;;  %v1171_v46 = vsel %vm3083_vm6, %v1120_v1, 0.0  ;;  %v547_v53 = vadd.f32 %v501_v58, %v404_v57  ;;  %v743_v34 = vsel %vm3015_vm10, %v2771_v15, 0.0  ;;  %v5165_v8 = vld [vmem:[%s5494_s2] ss:$0 sm:$0xff] }
  0xcc   :  { %v1074_v25 = vadd.f32 %v1028_v9, %v931_v19  ;;  %v689_v28 = vadd.f32 %v643_v21, %v546_v35  ;;  %v744_v29 = vsel %vm3015_vm10, %v2772_v27, 0.0  ;;  %v886_v12 = vsel %vm3040_vm12, %v835_v14, 0.0 }
  0xcd   :  { %v1216_v48 = vadd.f32 %v1170_v13, %v1073_v11  ;;  %v690_v37 = vadd.f32 %v644_v5, %v547_v53  ;;  %v887_v42 = vsel %vm3040_vm12, %v836_v40, 0.0  ;;  %v1029_v60 = vsel %vm3060_vm5, %v978_v26, 0.0 }
  0xce   :  { %v1217_v43 = vadd.f32 %v1171_v46, %v1074_v25  ;;  %v789_v44 = vadd.f32 %v743_v34, %v689_v28  ;;  %v1030_v50 = vsel %vm3060_vm5, %v979_v39, 0.0  ;;  %v1172_v36 = vsel %vm3083_vm6, %v1121_v23, 0.0 }
  0xcf   :  { %v790_v61 = vadd.f32 %v744_v29, %v690_v37  ;;  %v1173_v41 = vsel %vm3083_vm6, %v1122_v33, 0.0  ;;  %vm5522_vm9 = vcmp.ge.s32.totalorder %v2860_v4, 16 }
  0xd0   :  { %v1248_v22 = vpack.c.bf16 %v1217_v43, %v1216_v48  ;;  %v932_v47 = vadd.f32 %v886_v12, %v789_v44 }
  0xd1   :  { %v933_v54 = vadd.f32 %v887_v42, %v790_v61 }
  0xd2   :  { %2621 = vmatmul.mubr.bf16.gmra.mrb[56].mxu0 %v1248_v22  ;;  %v1075_v32 = vadd.f32 %v1029_v60, %v932_v47 }
  0xd3   :  { %2624 = vmatprep.mubr.msk.bf16.mxu0 %vm2798_vm0, %v2797_v2  ;;  %v1076_v16 = vadd.f32 %v1030_v50, %v933_v54 }
  0xd4   :  { %v1218_v3 = vadd.f32 %v1172_v36, %v1075_v32 }
  0xd5   :  { %v1219_v20 = vadd.f32 %v1173_v41, %v1076_v16 }
  0xd7   :  { %v1249_v6 = vpack.c.bf16 %v1219_v20, %v1218_v3 }
  0xda   :  { %2625 = vmatmul.mubr.bf16.gmra.mrb[60].mxu0 %v1249_v6 }
  0xf4   :  { %v1362_v1 = vpop.f32.mrb[0].mxu0 }
  0xf5   :  { %v1363_v51 = vadd.f32 %v5165_v8, %v1362_v1  ;;  %v2566_v59 = vpop.f32.mrb[1].mxu0 }
  0xf6   :  { %v1365_v17 = vpop.f32.mrb[2].mxu0 }
  0xf7   :  { %v1545_v9 = vmax.f32 %v1363_v51, 0.0  ;;  %v1366_v10 = vadd.f32 %v5165_v8, %v1365_v17  ;;  %v2567_v52 = vpop.f32.mrb[3].mxu0 }
  0xf9   :  { %1591 = vst [vmem:[#allocation2] sm:$0xff] %v1545_v9  ;;  %v1546_v56 = vmax.f32 %v1366_v10, 0.0 }
  0xfb   :  { %1592 = vst [vmem:[#allocation2 + $0x8] sm:$0xff] %v1546_v56 }
  0xfc   :  { %v1370_v63 = vpop.f32.mrb[4].mxu0 }
  0xfd   :  { %v1371_v45 = vadd.f32 %v5165_v8, %v1370_v63  ;;  %v2570_v0 = vpop.f32.mrb[5].mxu0 }
  0xfe   :  { %v1373_v30 = vpop.f32.mrb[6].mxu0 }
  0xff   :  { %v1547_v57 = vmax.f32 %v1371_v45, 0.0  ;;  %v1374_v58 = vadd.f32 %v5165_v8, %v1373_v30  ;;  %v2571_v21 = vpop.f32.mrb[7].mxu0 }
 0x101   :  { %1593 = vst [vmem:[#allocation2 + $0x10] sm:$0xff] %v1547_v57  ;;  %v1548_v19 = vmax.f32 %v1374_v58, 0.0 }
 0x102   :  { %v1637_v15 = vld [vmem:[#allocation2] ss:$2 sm:$0x3f]  ;;  %v1639_v34 = vld [vmem:[#allocation2 + $0x1] ss:$2 sm:$0x3f] }
 0x103   :  { %1594 = vst [vmem:[#allocation2 + $0x18] sm:$0xff] %v1548_v19  ;;  %v1644_v27 = vmax.f32 %v1637_v15, %v1639_v34  ;;  %v2747_v15 = vld [vmem:[%s5495_s3] sm:$0xff]  }
 0x104   :  { %v1378_v13 = vpop.f32.mrb[8].mxu0  ;;  %2656 = vmatprep.subr.bf16.mxu1 %v2747_v15 }
 0x105   :  { %v1379_v35 = vadd.f32 %v5165_v8, %v1378_v13  ;;  %v2574_v5 = vpop.f32.mrb[9].mxu0  ;;  %2657 = vmatpush3.bf16.msra.mxu1 %v2747_v15 }
 0x106   :  { %v1381_v14 = vpop.f32.mrb[10].mxu0 }
 0x107   :  { %v1549_v11 = vmax.f32 %v1379_v35, 0.0  ;;  %v1382_v46 = vadd.f32 %v5165_v8, %v1381_v14  ;;  %v2575_v53 = vpop.f32.mrb[11].mxu0 }
 0x109   :  { %1595 = vst [vmem:[#allocation2 + $0x20] sm:$0xff] %v1549_v11  ;;  %v1550_v40 = vmax.f32 %v1382_v46, 0.0 }
 0x10a   :  { %v1641_v25 = vld [vmem:[#allocation2 + $0xe] ss:$2 sm:$0x3f]  ;;  %v1643_v28 = vld [vmem:[#allocation2 + $0xf] ss:$2 sm:$0x3f] }
 0x10b   :  { %v1645_v29 = vmax.f32 %v1641_v25, %v1643_v28  ;;  %1596 = vst [vmem:[#allocation2 + $0x28] sm:$0xff] %v1550_v40 }
 0x10c   :  { %v1386_v26 = vpop.f32.mrb[12].mxu0 }
 0x10d   :  { %v1646_v48 = vmax.f32 %v1644_v27, %v1645_v29  ;;  %v1387_v37 = vadd.f32 %v5165_v8, %v1386_v26  ;;  %v2578_v12 = vpop.f32.mrb[13].mxu0 }
 0x10e   :  { %v1389_v39 = vpop.f32.mrb[14].mxu0 }
 0x10f   :  { %1647 = vst [vmem:[#allocation3] sm:$0x3f] %v1646_v48  ;;  %v1551_v43 = vmax.f32 %v1387_v37, 0.0  ;;  %v1390_v44 = vadd.f32 %v5165_v8, %v1389_v39  ;;  %v2579_v42 = vpop.f32.mrb[15].mxu0  ;;  %v2748_v39 = vld [vmem:[%s5495_s3 + $0x8] sm:$0xff]  }
 0x110   :  { %v1649_v60 = vld [vmem:[#allocation2 + $0x1c] ss:$2 sm:$0x3f]  ;;  %v1651_v47 = vld [vmem:[#allocation2 + $0x1d] ss:$2 sm:$0x3f]  ;;  %2658 = vmatprep.subr.bf16.mxu1 %v2748_v39 }
 0x111   :  { %1597 = vst [vmem:[#allocation2 + $0x30] sm:$0xff] %v1551_v43  ;;  %v1552_v23 = vmax.f32 %v1390_v44, 0.0  ;;  %v1656_v3 = vmax.f32 %v1649_v60, %v1651_v47  ;;  %2659 = vmatpush3.bf16.msra.mxu1 %v2748_v39 }
 0x113   :  { %1598 = vst [vmem:[#allocation2 + $0x38] sm:$0xff] %v1552_v23 }
 0x114   :  { %v1394_v61 = vpop.f32.mrb[16].mxu0 }
 0x115   :  { %v1395_v33 = vadd.f32 %v5165_v8, %v1394_v61  ;;  %v2582_v22 = vpop.f32.mrb[17].mxu0 }
 0x116   :  { %v1397_v50 = vpop.f32.mrb[18].mxu0 }
 0x117   :  { %v1553_v54 = vmax.f32 %v1395_v33, 0.0  ;;  %v1398_v36 = vadd.f32 %v5165_v8, %v1397_v50  ;;  %v2583_v32 = vpop.f32.mrb[19].mxu0  ;;  %v2749_v50 = vld [vmem:[%s5495_s3 + $0x10] sm:$0xff]  }
 0x118   :  { %v1653_v41 = vld [vmem:[#allocation2 + $0x2a] ss:$2 sm:$0x3f]  ;;  %v1655_v16 = vld [vmem:[#allocation2 + $0x2b] ss:$2 sm:$0x3f]  ;;  %2660 = vmatprep.subr.bf16.mxu1 %v2749_v50 }
 0x119   :  { %v1657_v20 = vmax.f32 %v1653_v41, %v1655_v16  ;;  %1599 = vst [vmem:[#allocation2 + $0x40] sm:$0xff] %v1553_v54  ;;  %v1554_v6 = vmax.f32 %v1398_v36, 0.0  ;;  %2661 = vmatpush3.bf16.msra.mxu1 %v2749_v50 }
 0x11b   :  { %v1658_v1 = vmax.f32 %v1656_v3, %v1657_v20  ;;  %1600 = vst [vmem:[#allocation2 + $0x48] sm:$0xff] %v1554_v6  ;;  %v2750_v3 = vld [vmem:[%s5495_s3 + $0x18] sm:$0xff]  }
 0x11c   :  { %v1402_v51 = vpop.f32.mrb[20].mxu0  ;;  %2662 = vmatprep.subr.bf16.mxu1 %v2750_v3 }
 0x11d   :  { %1659 = vst [vmem:[#allocation3 + $0x6] sm:$0x3f] %v1658_v1  ;;  %v1403_v59 = vadd.f32 %v5165_v8, %v1402_v51  ;;  %v2586_v17 = vpop.f32.mrb[21].mxu0  ;;  %2663 = vmatpush3.bf16.msra.mxu1 %v2750_v3 }
 0x11e   :  { %v1405_v9 = vpop.f32.mrb[22].mxu0 }
 0x11f   :  { %v1406_v10 = vadd.f32 %v5165_v8, %v1405_v9  ;;  %v1555_v52 = vmax.f32 %v1403_v59, 0.0  ;;  %v2587_v56 = vpop.f32.mrb[23].mxu0  ;;  %v2751_v59 = vld [vmem:[%s5495_s3 + $0x20] sm:$0xff]  }
 0x120   :  { %v1661_v0 = vld [vmem:[#allocation2 + $0x38] ss:$2 sm:$0x3f]  ;;  %v1663_v58 = vld [vmem:[#allocation2 + $0x39] ss:$2 sm:$0x3f]  ;;  %2664 = vmatprep.subr.bf16.mxu1 %v2751_v59 }
 0x121   :  { %v1556_v63 = vmax.f32 %v1406_v10, 0.0  ;;  %1601 = vst [vmem:[#allocation2 + $0x50] sm:$0xff] %v1555_v52  ;;  %v1668_v11 = vmax.f32 %v1661_v0, %v1663_v58  ;;  %v2752_v52 = vld [vmem:[%s5495_s3 + $0x28] sm:$0xff]   ;;  %2665 = vmatpush3.bf16.msra.mxu1 %v2751_v59 }
 0x122   :  { %2666 = vmatprep.subr.bf16.mxu1 %v2752_v52 }
 0x123   :  { %1602 = vst [vmem:[#allocation2 + $0x58] sm:$0xff] %v1556_v63  ;;  %v2753_v63 = vld [vmem:[%s5495_s3 + $0x30] sm:$0xff]  }
 0x124   :  { %v1410_v45 = vpop.f32.mrb[24].mxu0  ;;  %v1780_v58 = vld [vmem:[#allocation3] sm:$0xff] }
 0x125   :  { %v1411_v30 = vadd.f32 %v5165_v8, %v1410_v45  ;;  %v2590_v57 = vpop.f32.mrb[25].mxu0  ;;  %2667 = vmatpush3.bf16.msra.mxu1 %v2752_v52 }
 0x126   :  { %v1413_v21 = vpop.f32.mrb[26].mxu0  ;;  %2668 = vmatprep.subr.bf16.mxu1 %v2753_v63 }
 0x127   :  { %v1557_v19 = vmax.f32 %v1411_v30, 0.0  ;;  %v1414_v13 = vadd.f32 %v5165_v8, %v1413_v21  ;;  %v2591_v35 = vpop.f32.mrb[27].mxu0  ;;  %v1796_v21 = vld [vmem:[#allocation3 + $0x1] sm:$0xff] }
 0x128   :  { %v1665_v5 = vld [vmem:[#allocation2 + $0x46] ss:$2 sm:$0x3f]  ;;  %v1667_v14 = vld [vmem:[#allocation2 + $0x47] ss:$2 sm:$0x3f] }
 0x129   :  { %v1669_v46 = vmax.f32 %v1665_v5, %v1667_v14  ;;  %1603 = vst [vmem:[#allocation2 + $0x60] sm:$0xff] %v1557_v19  ;;  %v1558_v53 = vmax.f32 %v1414_v13, 0.0  ;;  %v2754_v19 = vld [vmem:[%s5495_s3 + $0x38] sm:$0xff]   ;;  %2669 = vmatpush3.bf16.msra.mxu1 %v2753_v63 }
 0x12a   :  { %v1673_v27 = vld [vmem:[#allocation2 + $0x54] ss:$2 sm:$0x3f]  ;;  %v1675_v26 = vld [vmem:[#allocation2 + $0x55] ss:$2 sm:$0x3f]  ;;  %2670 = vmatprep.subr.bf16.mxu1 %v2754_v19 }
 0x12b   :  { %v1670_v34 = vmax.f32 %v1668_v11, %v1669_v46  ;;  %1604 = vst [vmem:[#allocation2 + $0x68] sm:$0xff] %v1558_v53  ;;  %v1680_v42 = vmax.f32 %v1673_v27, %v1675_v26  ;;  %v1788_v11 = vsel %vm83_vm1, %v1780_v58, 0.0  ;;  %v1804_v46 = vsel %vm2920_vm8, %v1796_v21, 0.0 }
 0x12c   :  { %v1490_v40 = vpop.f32.mrb[0].mxu1 }
 0x12d   :  { %1671 = vst [vmem:[#allocation3 + $0xc] sm:$0x3f] %v1670_v34  ;;  %v1491_v25 = vadd.f32 %v5165_v8, %v1490_v40  ;;  %v2630_v28 = vpop.f32.mrb[1].mxu1  ;;  %v1812_v34 = vadd.f32 %v1804_v46, %v1788_v11  ;;  %v1820_v40 = vld [vmem:[#allocation3 + $0x2] sm:$0xff]  ;;  %2671 = vmatpush3.bf16.msra.mxu1 %v2754_v19 }
 0x12e   :  { %v1493_v29 = vpop.f32.mrb[2].mxu1  ;;  %2680 = vmatprep.subr.bf16.mxu1 %v2797_v2  ;;  %v1828_v39 = vsel %vm2944_vm11, %v1820_v40, 0.0 }
 0x12f   :  { %v1577_v48 = vmax.f32 %v1491_v25, 0.0  ;;  %v1494_v37 = vadd.f32 %v5165_v8, %v1493_v29  ;;  %v2631_v12 = vpop.f32.mrb[3].mxu1 }
 0x131   :  { %1623 = vst [vmem:[#allocation2 + $0x100] sm:$0xff] %v1577_v48  ;;  %v1578_v61 = vmax.f32 %v1494_v37, 0.0 }
 0x132   :  { %v1677_v43 = vld [vmem:[#allocation2 + $0x62] ss:$2 sm:$0x3f]  ;;  %v1679_v44 = vld [vmem:[#allocation2 + $0x63] ss:$2 sm:$0x3f] }
 0x133   :  { %v1681_v23 = vmax.f32 %v1677_v43, %v1679_v44  ;;  %1624 = vst [vmem:[#allocation2 + $0x108] sm:$0xff] %v1578_v61 }
 0x134   :  { %v1418_v33 = vpop.f32.mrb[28].mxu0  ;;  %v1781_v53 = vld [vmem:[#allocation3 + $0x8] sm:$0xff] }
 0x135   :  { %v1682_v60 = vmax.f32 %v1680_v42, %v1681_v23  ;;  %v1419_v22 = vadd.f32 %v5165_v8, %v1418_v33  ;;  %v2594_v47 = vpop.f32.mrb[29].mxu0  ;;  %v1797_v15 = vld [vmem:[#allocation3 + $0x9] sm:$0xff]  ;;  %v1789_v26 = vsel %vm83_vm1, %v1781_v53, 0.0  ;;  %v1894_v21 = vsel %vm3015_vm10, %v1781_v53, 0.0 }
 0x136   :  { %v1421_v54 = vpop.f32.mrb[30].mxu0  ;;  %v1844_v25 = vld [vmem:[#allocation3 + $0x6] sm:$0xff]  ;;  %v1805_v48 = vsel %vm2920_vm8, %v1797_v15, 0.0 }
 0x137   :  { %1683 = vst [vmem:[#allocation3 + $0x12] sm:$0x3f] %v1682_v60  ;;  %v1559_v36 = vmax.f32 %v1419_v22, 0.0  ;;  %v1422_v32 = vadd.f32 %v5165_v8, %v1421_v54  ;;  %v2595_v41 = vpop.f32.mrb[31].mxu0  ;;  %v1852_v43 = vsel %vm2963_vm13, %v1844_v25, 0.0  ;;  %v1836_v60 = vadd.f32 %v1828_v39, %v1812_v34  ;;  %v1821_v22 = vld [vmem:[#allocation3 + $0xa] sm:$0xff] }
 0x138   :  { %v1813_v33 = vadd.f32 %v1805_v48, %v1789_v26  ;;  %v1868_v50 = vld [vmem:[#allocation3 + $0x7] sm:$0xff] }
 0x139   :  { %1605 = vst [vmem:[#allocation2 + $0x70] sm:$0xff] %v1559_v36  ;;  %v1560_v16 = vmax.f32 %v1422_v32, 0.0  ;;  %v1860_v32 = vadd.f32 %v1852_v43, %v1836_v60  ;;  %v1876_v59 = vsel %vm2986_vm14, %v1868_v50, 0.0 }
 0x13b   :  { %1606 = vst [vmem:[#allocation2 + $0x78] sm:$0xff] %v1560_v16 }
 0x13e   :  { %v1498_v20 = vpop.f32.mrb[4].mxu1  ;;  %v5228_v47 = vld [vmem:[#allocation3 + $0xe] sm:$0xff] }
 0x13f   :  { %v1499_v6 = vadd.f32 %v5165_v8, %v1498_v20  ;;  %v2634_v1 = vpop.f32.mrb[5].mxu1  ;;  %v1829_v20 = vsel %vm2944_vm11, %v1821_v22, 0.0  ;;  %v1934_v15 = vld [vmem:[#allocation3 + $0xd] sm:$0xff] }
 0x140   :  { %v1501_v51 = vpop.f32.mrb[6].mxu1  ;;  %v1942_v39 = vsel %vm3060_vm5, %v1934_v15, 0.0 }
 0x141   :  { %v1579_v17 = vmax.f32 %v1499_v6, 0.0  ;;  %v1502_v9 = vadd.f32 %v5165_v8, %v1501_v51  ;;  %v2635_v10 = vpop.f32.mrb[7].mxu1  ;;  %v1853_v6 = vsel %vm2963_vm13, %v5228_v47, 0.0  ;;  %v1837_v51 = vadd.f32 %v1829_v20, %v1813_v33 }
 0x142   :  { %v1685_v37 = vld [vmem:[#allocation2 + $0x70] ss:$2 sm:$0x3f]  ;;  %v1687_v44 = vld [vmem:[#allocation2 + $0x71] ss:$2 sm:$0x3f] }
 0x143   :  { %1625 = vst [vmem:[#allocation2 + $0x110] sm:$0xff] %v1579_v17  ;;  %v1580_v56 = vmax.f32 %v1502_v9, 0.0  ;;  %v1692_v41 = vmax.f32 %v1685_v37, %v1687_v44  ;;  %v1884_v9 = vadd.f32 %v1876_v59, %v1860_v32  ;;  %v1910_v10 = vld [vmem:[#allocation3 + $0xc] sm:$0xff]  ;;  %v1861_v63 = vadd.f32 %v1853_v6, %v1837_v51 }
 0x144   :  { %v1918_v19 = vsel %vm3040_vm12, %v1910_v10, 0.0  ;;  %v1966_v6 = vsel %vm3083_vm6, %v5228_v47, 0.0 }
 0x145   :  { %1626 = vst [vmem:[#allocation2 + $0x118] sm:$0xff] %v1580_v56 }
 0x146   :  { %v1426_v45 = vpop.f32.mrb[32].mxu0 }
 0x147   :  { %v1427_v0 = vadd.f32 %v5165_v8, %v1426_v45  ;;  %v2598_v30 = vpop.f32.mrb[33].mxu0  ;;  %v1869_v45 = vld [vmem:[#allocation3 + $0xf] sm:$0xff] }
 0x148   :  { %v1429_v57 = vpop.f32.mrb[34].mxu0 }
 0x149   :  { %v1561_v13 = vmax.f32 %v1427_v0, 0.0  ;;  %v1430_v35 = vadd.f32 %v5165_v8, %v1429_v57  ;;  %v2599_v5 = vpop.f32.mrb[35].mxu0 }
 0x14b   :  { %1607 = vst [vmem:[#allocation2 + $0x80] sm:$0xff] %v1561_v13  ;;  %v1562_v14 = vmax.f32 %v1430_v35, 0.0  ;;  %v1877_v13 = vsel %vm2986_vm14, %v1869_v45, 0.0  ;;  %v1902_v35 = vadd.f32 %v1894_v21, %v1884_v9 }
 0x14c   :  { %v1885_v11 = vadd.f32 %v1877_v13, %v1861_v63 }
 0x14d   :  { %1608 = vst [vmem:[#allocation2 + $0x88] sm:$0xff] %v1562_v14  ;;  %v1782_v14 = vld [vmem:[#allocation3 + $0x10] sm:$0xff]  ;;  %v1926_v46 = vadd.f32 %v1918_v19, %v1902_v35 }
 0x14e   :  { %v1790_v40 = vsel %vm83_vm1, %v1782_v14, 0.0 }
 0x14f   :  { %v1506_v28 = vpop.f32.mrb[8].mxu1 }
 0x150   :  { %v1507_v27 = vadd.f32 %v5165_v8, %v1506_v28  ;;  %v2638_v29 = vpop.f32.mrb[9].mxu1  ;;  %v1895_v28 = vsel %vm3015_vm10, %v1782_v14, 0.0 }
 0x151   :  { %v1509_v12 = vpop.f32.mrb[10].mxu1  ;;  %v1903_v48 = vadd.f32 %v1895_v28, %v1885_v11 }
 0x152   :  { %v1581_v42 = vmax.f32 %v1507_v27, 0.0  ;;  %v1510_v23 = vadd.f32 %v5165_v8, %v1509_v12  ;;  %v2639_v61 = vpop.f32.mrb[11].mxu1 }
 0x153   :  { %v1950_v61 = vadd.f32 %v1942_v39, %v1926_v46 }
 0x154   :  { %v1689_v54 = vld [vmem:[#allocation2 + $0x7e] ss:$2 sm:$0x3f]  ;;  %v1691_v36 = vld [vmem:[#allocation2 + $0x7f] ss:$2 sm:$0x3f] }
 0x155   :  { %1627 = vst [vmem:[#allocation2 + $0x120] sm:$0xff] %v1581_v42  ;;  %v1693_v16 = vmax.f32 %v1689_v54, %v1691_v36  ;;  %v1582_v3 = vmax.f32 %v1510_v23, 0.0  ;;  %v1974_v51 = vadd.f32 %v1966_v6, %v1950_v61 }
 0x157   :  { %v1694_v1 = vmax.f32 %v1692_v41, %v1693_v16  ;;  %1628 = vst [vmem:[#allocation2 + $0x128] sm:$0xff] %v1582_v3 }
 0x158   :  { %v1434_v17 = vpop.f32.mrb[36].mxu0 }
 0x159   :  { %1695 = vst [vmem:[#allocation3 + $0x18] sm:$0x3f] %v1694_v1  ;;  %v1435_v52 = vadd.f32 %v5165_v8, %v1434_v17  ;;  %v2602_v56 = vpop.f32.mrb[37].mxu0 }
 0x15a   :  { %v1437_v0 = vpop.f32.mrb[38].mxu0 }
 0x15b   :  { %v1563_v30 = vmax.f32 %v1435_v52, 0.0  ;;  %v1438_v57 = vadd.f32 %v5165_v8, %v1437_v0  ;;  %v2603_v58 = vpop.f32.mrb[39].mxu0 }
 0x15c   :  { %v1745_v17 = vld [vmem:[#allocation2 + $0x118] ss:$2 sm:$0x3f]  ;;  %v1747_v10 = vld [vmem:[#allocation2 + $0x119] ss:$2 sm:$0x3f] }
 0x15d   :  { %1609 = vst [vmem:[#allocation2 + $0x90] sm:$0xff] %v1563_v30  ;;  %v1564_v5 = vmax.f32 %v1438_v57, 0.0  ;;  %v1752_v30 = vmax.f32 %v1745_v17, %v1747_v10 }
 0x15f   :  { %1610 = vst [vmem:[#allocation2 + $0x98] sm:$0xff] %v1564_v5 }
 0x160   :  { %v1514_v34 = vpop.f32.mrb[12].mxu1  ;;  %v1798_v25 = vld [vmem:[#allocation3 + $0x11] sm:$0xff] }
 0x161   :  { %v1822_v53 = vld [vmem:[#allocation3 + $0x12] sm:$0xff]  ;;  %v1515_v27 = vadd.f32 %v5165_v8, %v1514_v34  ;;  %v2642_v29 = vpop.f32.mrb[13].mxu1  ;;  %v1806_v26 = vsel %vm2920_vm8, %v1798_v25, 0.0 }
 0x162   :  { %v1911_v37 = vld [vmem:[#allocation3 + $0x14] sm:$0xff]  ;;  %v1517_v43 = vpop.f32.mrb[14].mxu1  ;;  %v1814_v44 = vadd.f32 %v1806_v26, %v1790_v40  ;;  %v1830_v50 = vsel %vm2944_vm11, %v1822_v53, 0.0 }
 0x163   :  { %v1935_v12 = vld [vmem:[#allocation3 + $0x15] sm:$0xff]  ;;  %v1919_v23 = vsel %vm3040_vm12, %v1911_v37, 0.0  ;;  %v1583_v60 = vmax.f32 %v1515_v27, 0.0  ;;  %v1518_v33 = vadd.f32 %v5165_v8, %v1517_v43  ;;  %v2643_v22 = vpop.f32.mrb[15].mxu1 }
 0x164   :  { %v1846_v42 = vld [vmem:[#allocation3 + $0x16] sm:$0xff]  ;;  %v1927_v54 = vadd.f32 %v1919_v23, %v1903_v48  ;;  %v1838_v36 = vadd.f32 %v1830_v50, %v1814_v44  ;;  %v1943_v32 = vsel %vm3060_vm5, %v1935_v12, 0.0 }
 0x165   :  { %1629 = vst [vmem:[#allocation2 + $0x130] sm:$0xff] %v1583_v60  ;;  %v1584_v41 = vmax.f32 %v1518_v33, 0.0  ;;  %v1854_v16 = vsel %vm2963_vm13, %v1846_v42, 0.0  ;;  %v1967_v1 = vsel %vm3083_vm6, %v1846_v42, 0.0 }
 0x166   :  { %v1951_v3 = vadd.f32 %v1943_v32, %v1927_v54  ;;  %v5263_v20 = vadd.f32 %v1854_v16, %v1838_v36  ;;  %v1697_v13 = vld [vmem:[#allocation2 + $0x8c] ss:$2 sm:$0x3f]  ;;  %v1699_v5 = vld [vmem:[#allocation2 + $0x8d] ss:$2 sm:$0x3f] }
 0x167   :  { %1630 = vst [vmem:[#allocation2 + $0x138] sm:$0xff] %v1584_v41  ;;  %v1704_v25 = vmax.f32 %v1697_v13, %v1699_v5 }
 0x168   :  { %v1975_v59 = vadd.f32 %v1967_v1, %v1951_v3 }
 0x169   :  { %v1442_v9 = vpop.f32.mrb[40].mxu0 }
 0x16a   :  { %v1982_v52 = vpack.c.bf16 %v1975_v59, %v1974_v51  ;;  %v1443_v56 = vadd.f32 %v5165_v8, %v1442_v9  ;;  %v2606_v63 = vpop.f32.mrb[41].mxu0 }
 0x16b   :  { %v1445_v45 = vpop.f32.mrb[42].mxu0 }
 0x16c   :  { %2672 = vmatprep.mubr.bf16.mxu1 %v1982_v52  ;;  %v1565_v0 = vmax.f32 %v1443_v56, 0.0  ;;  %v2607_v57 = vpop.f32.mrb[43].mxu0  ;;  %v1749_v58 = vld [vmem:[#allocation2 + $0x126] ss:$2 sm:$0x3f] }
 0x16d   :  { %v1751_v47 = vld [vmem:[#allocation2 + $0x127] ss:$2 sm:$0x3f] }
 0x16e   :  { %1611 = vst [vmem:[#allocation2 + $0xa0] sm:$0xff] %v1565_v0  ;;  %v1753_v21 = vmax.f32 %v1749_v58, %v1751_v47  ;;  %v1757_v37 = vld [vmem:[#allocation2 + $0x134] ss:$2 sm:$0x3f] }
 0x16f   :  { %v1759_v39 = vld [vmem:[#allocation2 + $0x135] ss:$2 sm:$0x3f] }
 0x170   :  { %v1754_v19 = vmax.f32 %v1752_v30, %v1753_v21  ;;  %v1764_v42 = vmax.f32 %v1757_v37, %v1759_v39 }
 0x172   :  { %1755 = vst [vmem:[#allocation3 + $0x36] sm:$0x3f] %v1754_v19  ;;  %v1522_v35 = vpop.f32.mrb[16].mxu1 }
 0x173   :  { %v1523_v14 = vadd.f32 %v5165_v8, %v1522_v35  ;;  %v2646_v11 = vpop.f32.mrb[17].mxu1 }
 0x174   :  { %v1525_v46 = vpop.f32.mrb[18].mxu1 }
 0x175   :  { %v1701_v15 = vld [vmem:[#allocation2 + $0x9a] ss:$2 sm:$0x3f]  ;;  %v1703_v34 = vld [vmem:[#allocation2 + $0x9b] ss:$2 sm:$0x3f]  ;;  %v1526_v40 = vadd.f32 %v5165_v8, %v1525_v46 }
 0x176   :  { %v1705_v53 = vmax.f32 %v1701_v15, %v1703_v34  ;;  %v1585_v28 = vmax.f32 %v1523_v14, 0.0  ;;  %v2647_v27 = vpop.f32.mrb[19].mxu1 }
 0x177   :  { %v1586_v29 = vmax.f32 %v1526_v40, 0.0 }
 0x178   :  { %v1706_v26 = vmax.f32 %v1704_v25, %v1705_v53  ;;  %1631 = vst [vmem:[#allocation2 + $0x140] sm:$0xff] %v1585_v28 }
 0x179   :  { %1632 = vst [vmem:[#allocation2 + $0x148] sm:$0xff] %v1586_v29 }
 0x17a   :  { %1707 = vst [vmem:[#allocation3 + $0x1e] sm:$0x3f] %v1706_v26 }
 0x17b   :  { %v1450_v48 = vpop.f32.mrb[44].mxu0 }
 0x17c   :  { %v2610_v12 = vpop.f32.mrb[45].mxu0 }
 0x17d   :  { %v1453_v43 = vpop.f32.mrb[46].mxu0 }
 0x17e   :  { %v2611_v44 = vpop.f32.mrb[47].mxu0 }
 0x180   :  { %v1761_v23 = vld [vmem:[#allocation2 + $0x142] ss:$2 sm:$0x3f]  ;;  %v1763_v61 = vld [vmem:[#allocation2 + $0x143] ss:$2 sm:$0x3f] }
 0x181   :  { %v1765_v60 = vmax.f32 %v1761_v23, %v1763_v61 }
 0x182   :  { %v1530_v33 = vpop.f32.mrb[20].mxu1 }
 0x183   :  { %v1531_v22 = vadd.f32 %v5165_v8, %v1530_v33  ;;  %v2650_v50 = vpop.f32.mrb[21].mxu1  ;;  %v1766_v54 = vmax.f32 %v1764_v42, %v1765_v60 }
 0x184   :  { %v1533_v36 = vpop.f32.mrb[22].mxu1 }
 0x185   :  { %v1587_v32 = vmax.f32 %v1531_v22, 0.0  ;;  %v1534_v41 = vadd.f32 %v5165_v8, %v1533_v36  ;;  %v2651_v16 = vpop.f32.mrb[23].mxu1  ;;  %1767 = vst [vmem:[#allocation3 + $0x3c] sm:$0x3f] %v1766_v54 }
 0x187   :  { %1633 = vst [vmem:[#allocation2 + $0x150] sm:$0xff] %v1587_v32  ;;  %v1588_v3 = vmax.f32 %v1534_v41, 0.0 }
 0x189   :  { %1634 = vst [vmem:[#allocation2 + $0x158] sm:$0xff] %v1588_v3 }
 0x18c   :  { %v1458_v6 = vpop.f32.mrb[48].mxu0 }
 0x18d   :  { %v1459_v1 = vadd.f32 %v5165_v8, %v1458_v6  ;;  %v2614_v51 = vpop.f32.mrb[49].mxu0 }
 0x18e   :  { %v1461_v59 = vpop.f32.mrb[50].mxu0  ;;  %v1783_v51 = vld [vmem:[#allocation3 + $0x18] sm:$0xff] }
 0x18f   :  { %v1569_v17 = vmax.f32 %v1459_v1, 0.0  ;;  %v1462_v9 = vadd.f32 %v5165_v8, %v1461_v59  ;;  %v2615_v10 = vpop.f32.mrb[51].mxu0  ;;  %v1799_v59 = vld [vmem:[#allocation3 + $0x19] sm:$0xff] }
 0x190   :  { %v1769_v19 = vld [vmem:[#allocation2 + $0x150] ss:$2 sm:$0x3f]  ;;  %v1771_v5 = vld [vmem:[#allocation2 + $0x151] ss:$2 sm:$0x3f] }
 0x191   :  { %1615 = vst [vmem:[#allocation2 + $0xc0] sm:$0xff] %v1569_v17  ;;  %v1570_v52 = vmax.f32 %v1462_v9, 0.0  ;;  %v1776_v34 = vmax.f32 %v1769_v19, %v1771_v5  ;;  %v1787_v17 = vld [vmem:[#allocation3 + $0x38] sm:$0x3]  ;;  %v1791_v10 = vsel %vm83_vm1, %v1783_v51, 0.0 }
 0x192   :  { %v1803_v9 = vld [vmem:[#allocation3 + $0x39] sm:$0x3] }
 0x193   :  { %1616 = vst [vmem:[#allocation2 + $0xc8] sm:$0xff] %v1570_v52  ;;  %v1807_v52 = vsel %vm2920_vm8, %v1799_v59, 0.0 }
 0x194   :  { %v1538_v56 = vpop.f32.mrb[24].mxu1  ;;  %v1815_v19 = vadd.f32 %v1807_v52, %v1791_v10 }
 0x195   :  { %v1539_v63 = vadd.f32 %v5165_v8, %v1538_v56  ;;  %v2654_v45 = vpop.f32.mrb[25].mxu1  ;;  %v1827_v56 = vld [vmem:[#allocation3 + $0x3a] sm:$0x3] }
 0x196   :  { %v1541_v0 = vpop.f32.mrb[26].mxu1 }
 0x197   :  { %v1589_v30 = vmax.f32 %v1539_v63, 0.0  ;;  %v1542_v57 = vadd.f32 %v5165_v8, %v1541_v0  ;;  %v2655_v58 = vpop.f32.mrb[27].mxu1  ;;  %v1823_v63 = vld [vmem:[#allocation3 + $0x1a] sm:$0xff] }
 0x198   :  { %v1870_v0 = vld [vmem:[#allocation3 + $0x17] sm:$0xff]  ;;  %v1811_v58 = vsel %vm2920_vm8, %v1803_v9, 0.0 }
 0x199   :  { %1635 = vst [vmem:[#allocation2 + $0x160] sm:$0xff] %v1589_v30  ;;  %v1590_v47 = vmax.f32 %v1542_v57, 0.0  ;;  %v1739_v30 = vld [vmem:[#allocation2 + $0x10b] ss:$2 sm:$0x3f]  ;;  %v1795_v57 = vsel %vm83_vm1, %v1787_v17, 0.0 }
 0x19a   :  { %v1709_v37 = vld [vmem:[#allocation2 + $0xc4] ss:$2 sm:$0x3f]  ;;  %v1711_v39 = vld [vmem:[#allocation2 + $0xc5] ss:$2 sm:$0x3f] }
 0x19b   :  { %1636 = vst [vmem:[#allocation2 + $0x168] sm:$0x3] %v1590_v47  ;;  %v1716_v60 = vmax.f32 %v1709_v37, %v1711_v39  ;;  %v1878_v5 = vsel %vm2986_vm14, %v1870_v0, 0.0  ;;  %v1893_v17 = vld [vmem:[#allocation3 + $0x40] sm:$0x3] }
 0x19c   :  { %v1466_v21 = vpop.f32.mrb[52].mxu0 }
 0x19d   :  { %v1467_v13 = vadd.f32 %v5165_v8, %v1466_v21  ;;  %v2618_v35 = vpop.f32.mrb[53].mxu0 }
 0x19e   :  { %v1469_v14 = vpop.f32.mrb[54].mxu0 }
 0x19f   :  { %v1571_v11 = vmax.f32 %v1467_v13, 0.0  ;;  %v1470_v46 = vadd.f32 %v5165_v8, %v1469_v14  ;;  %v2619_v15 = vpop.f32.mrb[55].mxu0  ;;  %v1831_v13 = vsel %vm2944_vm11, %v1823_v63, 0.0  ;;  %v1835_v14 = vsel %vm2944_vm11, %v1827_v56, 0.0 }
 0x1a0   :  { %v1819_v15 = vadd.f32 %v1811_v58, %v1795_v57 }
 0x1a1   :  { %1617 = vst [vmem:[#allocation2 + $0xd0] sm:$0xff] %v1571_v11  ;;  %v1572_v40 = vmax.f32 %v1470_v46, 0.0 }
 0x1a2   :  { %v1773_v25 = vld [vmem:[#allocation2 + $0x15e] ss:$2 sm:$0x3f]  ;;  %v1775_v53 = vld [vmem:[#allocation2 + $0x15f] ss:$2 sm:$0x3f] }
 0x1a3   :  { %v1777_v28 = vmax.f32 %v1773_v25, %v1775_v53  ;;  %1618 = vst [vmem:[#allocation2 + $0xd8] sm:$0xff] %v1572_v40 }
 0x1a5   :  { %v1778_v27 = vmax.f32 %v1776_v34, %v1777_v28  ;;  %v1474_v29 = vpop.f32.mrb[56].mxu0 }
 0x1a6   :  { %v1475_v26 = vadd.f32 %v5165_v8, %v1474_v29  ;;  %v2622_v48 = vpop.f32.mrb[57].mxu0  ;;  %v1839_v29 = vadd.f32 %v1831_v13, %v1815_v19 }
 0x1a7   :  { %1779 = vst [vmem:[#allocation3 + $0x42] sm:$0x3f] %v1778_v27  ;;  %v1477_v12 = vpop.f32.mrb[58].mxu0 }
 0x1a8   :  { %v1573_v43 = vmax.f32 %v1475_v26, 0.0  ;;  %v1478_v44 = vadd.f32 %v5165_v8, %v1477_v12  ;;  %v2623_v42 = vpop.f32.mrb[59].mxu0  ;;  %v1851_v26 = vld [vmem:[#allocation3 + $0x3e] sm:$0x3]  ;;  %v1886_v12 = vadd.f32 %v1878_v5, %v5263_v20 }
 0x1a9   :  { %v1875_v20 = vld [vmem:[#allocation3 + $0x3f] sm:$0x3] }
 0x1aa   :  { %v1713_v23 = vld [vmem:[#allocation2 + $0xd2] ss:$2 sm:$0x3f]  ;;  %v1715_v61 = vld [vmem:[#allocation2 + $0xd3] ss:$2 sm:$0x3f] }
 0x1ab   :  { %1619 = vst [vmem:[#allocation2 + $0xe0] sm:$0xff] %v1573_v43  ;;  %v1717_v33 = vmax.f32 %v1713_v23, %v1715_v61  ;;  %v1574_v22 = vmax.f32 %v1478_v44, 0.0  ;;  %v1843_v23 = vadd.f32 %v1835_v14, %v1819_v15  ;;  %v1859_v61 = vsel %vm2963_vm13, %v1851_v26, 0.0 }
 0x1ad   :  { %v1718_v50 = vmax.f32 %v1716_v60, %v1717_v33  ;;  %1620 = vst [vmem:[#allocation2 + $0xe8] sm:$0xff] %v1574_v22  ;;  %v1482_v54 = vpop.f32.mrb[60].mxu0  ;;  %v1896_v60 = vsel %vm3015_vm10, %v1783_v51, 0.0 }
 0x1ae   :  { %v1483_v36 = vadd.f32 %v5165_v8, %v1482_v54  ;;  %v2626_v32 = vpop.f32.mrb[61].mxu0  ;;  %v1904_v54 = vadd.f32 %v1896_v60, %v1886_v12 }
 0x1af   :  { %1719 = vst [vmem:[#allocation3 + $0x24] sm:$0x3f] %v1718_v50  ;;  %v1485_v41 = vpop.f32.mrb[62].mxu0 }
 0x1b0   :  { %v1575_v16 = vmax.f32 %v1483_v36, 0.0  ;;  %v1486_v3 = vadd.f32 %v5165_v8, %v1485_v41  ;;  %v2627_v6 = vpop.f32.mrb[63].mxu0  ;;  %v1737_v8 = vld [vmem:[#allocation2 + $0x10a] ss:$2 sm:$0x3f] }
 0x1b1   :  { %v1741_v28 = vmax.f32 %v1737_v8, %v1739_v30  ;;  %v1912_v36 = vld [vmem:[#allocation3 + $0x1c] sm:$0xff] }
 0x1b2   :  { %1621 = vst [vmem:[#allocation2 + $0xf0] sm:$0xff] %v1575_v16  ;;  %v1576_v1 = vmax.f32 %v1486_v3, 0.0  ;;  %v1867_v16 = vadd.f32 %v1859_v61, %v1843_v23  ;;  %v1920_v51 = vsel %vm3040_vm12, %v1912_v36, 0.0  ;;  %v1917_v36 = vld [vmem:[#allocation3 + $0x44] sm:$0x3] }
 0x1b3   :  { %v1928_v10 = vadd.f32 %v1920_v51, %v1904_v54  ;;  %v1963_v54 = vld [vmem:[#allocation3 + $0x36] sm:$0xff]  ;;  %v1925_v24 = vsel %vm3040_vm12, %v1917_v36, 0.0 }
 0x1b4   :  { %1622 = vst [vmem:[#allocation2 + $0xf8] sm:$0xff] %v1576_v1  ;;  %v1721_v47 = vld [vmem:[#allocation2 + $0xe0] ss:$2 sm:$0x3f]  ;;  %v1883_v1 = vsel %vm2986_vm14, %v1875_v20, 0.0 }
 0x1b5   :  { %v1723_v21 = vld [vmem:[#allocation2 + $0xe1] ss:$2 sm:$0x3f]  ;;  %v1891_v30 = vadd.f32 %v1883_v1, %v1867_v16 }
 0x1b6   :  { %v5289_v45 = vld [vmem:[#allocation3 + $0x1e] sm:$0xff]  ;;  %v1728_v34 = vmax.f32 %v1721_v47, %v1723_v21 }
 0x1b7   :  { %v1855_v35 = vsel %vm2963_vm13, %v5289_v45, 0.0  ;;  %v1784_v37 = vld [vmem:[#allocation3 + $0x20] sm:$0xff] }
 0x1b8   :  { %v1800_v39 = vld [vmem:[#allocation3 + $0x21] sm:$0xff]  ;;  %v1863_v44 = vadd.f32 %v1855_v35, %v1839_v29  ;;  %v1792_v33 = vsel %vm83_vm1, %v1784_v37, 0.0  ;;  %v1897_v9 = vsel %vm3015_vm10, %v1784_v37, 0.0  ;;  %v1901_v35 = vsel %vm3015_vm10, %v1893_v17, 0.0 }
 0x1b9   :  { %v1871_v42 = vld [vmem:[#allocation3 + $0x1f] sm:$0xff]  ;;  %v1808_v22 = vsel %vm2920_vm8, %v1800_v39, 0.0 }
 0x1ba   :  { %v1879_v50 = vsel %vm2986_vm14, %v1871_v42, 0.0  ;;  %v1936_v32 = vld [vmem:[#allocation3 + $0x1d] sm:$0xff]  ;;  %v1816_v3 = vadd.f32 %v1808_v22, %v1792_v33 }
 0x1bb   :  { %v1725_v11 = vld [vmem:[#allocation2 + $0xee] ss:$2 sm:$0x3f]  ;;  %v1727_v46 = vld [vmem:[#allocation2 + $0xef] ss:$2 sm:$0x3f]  ;;  %v1887_v41 = vadd.f32 %v1879_v50, %v1863_v44 }
 0x1bc   :  { %v1729_v40 = vmax.f32 %v1725_v11, %v1727_v46  ;;  %v1733_v25 = vld [vmem:[#allocation2 + $0xfc] ss:$2 sm:$0x3f]  ;;  %v1735_v53 = vld [vmem:[#allocation2 + $0xfd] ss:$2 sm:$0x3f] }
 0x1bd   :  { %v1740_v27 = vmax.f32 %v1733_v25, %v1735_v53  ;;  %v1824_v6 = vld [vmem:[#allocation3 + $0x22] sm:$0xff]  ;;  %v1944_v59 = vsel %vm3060_vm5, %v1936_v32, 0.0  ;;  %v1905_v52 = vadd.f32 %v1897_v9, %v1887_v41  ;;  %v1874_v9 = vld [vmem:[#allocation3 + $0x37] sm:$0xff] }
 0x1be   :  { %v1730_v48 = vmax.f32 %v1728_v34, %v1729_v40  ;;  %v1832_v8 = vsel %vm2944_vm11, %v1824_v6, 0.0  ;;  %v1952_v58 = vadd.f32 %v1944_v59, %v1928_v10  ;;  %v1909_v10 = vadd.f32 %v1901_v35, %v1891_v30 }
 0x1bf   :  { %v1742_v43 = vmax.f32 %v1740_v27, %v1741_v28  ;;  %v1840_v13 = vadd.f32 %v1832_v8, %v1816_v3 }
 0x1c0   :  { %1731 = vst [vmem:[#allocation3 + $0x2a] sm:$0x3f] %v1730_v48  ;;  %v1968_v48 = vsel %vm3083_vm6, %v5289_v45, 0.0 }
 0x1c1   :  { %1743 = vst [vmem:[#allocation3 + $0x30] sm:$0x3f] %v1742_v43  ;;  %v1976_v61 = vadd.f32 %v1968_v48, %v1952_v58  ;;  %v1892_v58 = vld [vmem:[#allocation3 + $0x38] sm:$0xff] }
 0x1c7   :  { %v1913_v56 = vld [vmem:[#allocation3 + $0x24] sm:$0xff] }
 0x1c8   :  { %v1937_v63 = vld [vmem:[#allocation3 + $0x25] sm:$0xff]  ;;  %v1921_v57 = vsel %vm3040_vm12, %v1913_v56, 0.0  ;;  %v1786_v21 = vld [vmem:[#allocation3 + $0x30] sm:$0xff] }
 0x1c9   :  { %v1961_v0 = vld [vmem:[#allocation3 + $0x26] sm:$0xff]  ;;  %v1929_v5 = vadd.f32 %v1921_v57, %v1905_v52  ;;  %v1794_v11 = vsel %vm83_vm1, %v1786_v21, 0.0  ;;  %v1802_v46 = vld [vmem:[#allocation3 + $0x31] sm:$0xff]  ;;  %v1945_v40 = vsel %vm3060_vm5, %v1937_v63, 0.0  ;;  %v1899_v52 = vsel %vm3015_vm10, %v1786_v21, 0.0 }
 0x1ca   :  { %v1785_v47 = vld [vmem:[#allocation3 + $0x28] sm:$0xff]  ;;  %v1810_v25 = vsel %vm2920_vm8, %v1802_v46, 0.0  ;;  %v1856_v27 = vsel %vm2963_vm13, %v1961_v0, 0.0  ;;  %v1969_v39 = vsel %vm3083_vm6, %v1961_v0, 0.0  ;;  %v1826_v23 = vld [vmem:[#allocation3 + $0x32] sm:$0xff]  ;;  %v1858_v63 = vsel %vm2963_vm13, %v1963_v54, 0.0 }
 0x1cb   :  { %v1801_v19 = vld [vmem:[#allocation3 + $0x29] sm:$0xff]  ;;  %v1793_v14 = vsel %vm83_vm1, %v1785_v47, 0.0  ;;  %v1953_v26 = vadd.f32 %v1945_v40, %v1929_v5  ;;  %v1864_v12 = vadd.f32 %v1856_v27, %v1840_v13  ;;  %v1818_v18 = vadd.f32 %v1810_v25, %v1794_v11  ;;  %v1915_v1 = vld [vmem:[#allocation3 + $0x34] sm:$0xff]  ;;  %v1916_v5 = vld [vmem:[#allocation3 + $0x3c] sm:$0xff] }
 0x1cc   :  { %v1809_v15 = vsel %vm2920_vm8, %v1801_v19, 0.0  ;;  %v1825_v34 = vld [vmem:[#allocation3 + $0x2a] sm:$0xff]  ;;  %v1898_v50 = vsel %vm3015_vm10, %v1785_v47, 0.0  ;;  %v1834_v3 = vsel %vm2944_vm11, %v1826_v23, 0.0  ;;  %v1939_v8 = vld [vmem:[#allocation3 + $0x35] sm:$0xff]  ;;  %v1923_v19 = vsel %vm3040_vm12, %v1915_v1, 0.0  ;;  %vm2192_vm1 = vmand %vm322_vm4, %vm466_vm7 }
 0x1cd   :  { %v1817_v53 = vadd.f32 %v1809_v15, %v1793_v14  ;;  %v1849_v28 = vld [vmem:[#allocation3 + $0x2e] sm:$0xff]  ;;  %v1833_v37 = vsel %vm2944_vm11, %v1825_v34, 0.0  ;;  %v1977_v60 = vadd.f32 %v1969_v39, %v1953_v26  ;;  %v1842_v17 = vadd.f32 %v1834_v3, %v1818_v18  ;;  %v1941_v47 = vld [vmem:[#allocation3 + $0x45] sm:$0x3]  ;;  %v1940_v25 = vld [vmem:[#allocation3 + $0x3d] sm:$0xff] }
 0x1ce   :  { %v1872_v29 = vld [vmem:[#allocation3 + $0x27] sm:$0xff]  ;;  %v1873_v44 = vld [vmem:[#allocation3 + $0x2f] sm:$0xff]  ;;  %v1857_v33 = vsel %vm2963_vm13, %v1849_v28, 0.0  ;;  %v1882_v21 = vsel %vm2986_vm14, %v1874_v9, 0.0  ;;  %v1933_v14 = vadd.f32 %v1925_v24, %v1909_v10  ;;  %v1947_v11 = vsel %vm3060_vm5, %v1939_v8, 0.0 }
 0x1cf   :  { %v1841_v43 = vadd.f32 %v1833_v37, %v1817_v53  ;;  %v1880_v42 = vsel %vm2986_vm14, %v1872_v29, 0.0  ;;  %v1914_v22 = vld [vmem:[#allocation3 + $0x2c] sm:$0xff]  ;;  %v1983_v32 = vpack.c.bf16 %v1977_v60, %v1976_v61  ;;  %v1881_v41 = vsel %vm2986_vm14, %v1873_v44, 0.0  ;;  %v1965_v53 = vld [vmem:[#allocation3 + $0x46] sm:$0x3]  ;;  %vm2206_vm14 = vmand %vm851_vm2, %vm995_vm3 }
 0x1d0   :  { %v1888_v45 = vadd.f32 %v1880_v42, %v1864_v12  ;;  %v1922_v51 = vsel %vm3040_vm12, %v1914_v22, 0.0  ;;  %v1938_v59 = vld [vmem:[#allocation3 + $0x2d] sm:$0xff]  ;;  %v1866_v57 = vadd.f32 %v1858_v63, %v1842_v17  ;;  %v1900_v46 = vsel %vm3015_vm10, %v1892_v58, 0.0  ;;  %v1964_v12 = vld [vmem:[#allocation3 + $0x3e] sm:$0xff] }
 0x1d1   :  { %v1865_v20 = vadd.f32 %v1857_v33, %v1841_v43  ;;  %2673 = vmatmul.mubr.bf16.vlgmr.msra.gmra.mrb[28].mxu1 %v1983_v32  ;;  %v1946_v30 = vsel %vm3060_vm5, %v1938_v59, 0.0  ;;  %v1949_v15 = vsel %vm3060_vm5, %v1941_v47, 0.0  ;;  %v1970_v38 = vsel %vm3083_vm6, %v1849_v28, 0.0  ;;  %v2757_v61 = vld [vmem:[%s5497_s5 + $0x10] sm:$0xff]   ;;  %v2758_v60 = vld [vmem:[%s5497_s5 + $0x18] sm:$0xff]   ;;  %v2759_v33 = vld [vmem:[%s5497_s5 + $0x20] sm:$0xff]  }
 0x1d2   :  { %v1906_v16 = vadd.f32 %v1898_v50, %v1888_v45  ;;  %v1890_v35 = vadd.f32 %v1882_v21, %v1866_v57  ;;  %v1971_v27 = vsel %vm3083_vm6, %v1963_v54, 0.0  ;;  %v1924_v29 = vsel %vm3040_vm12, %v1916_v5, 0.0  ;;  %2681 = vmatpush3.bf16.msra.mxu1 %v2755_v62  ;;  %v2760_v45 = vld [vmem:[%s5497_s5 + $0x28] sm:$0xff]   ;;  %v2761_v22 = vld [vmem:[%s5497_s5 + $0x30] sm:$0xff]   ;;  %v2460_v50 = vld [vmem:[%s5496_s4] ss:$0 sm:$0xff] }
 0x1d3   :  { %v1889_v6 = vadd.f32 %v1881_v41, %v1865_v20  ;;  %v1957_v37 = vadd.f32 %v1949_v15, %v1933_v14  ;;  %v1948_v39 = vsel %vm3060_vm5, %v1940_v25, 0.0  ;;  %v1973_v18 = vsel %vm3083_vm6, %v1965_v53, 0.0  ;;  %2682 = vmatprep.subr.bf16.mxu1 %v2797_v2  ;;  %v2762_v20 = vld [vmem:[%s5497_s5 + $0x38] sm:$0xff]  }
 0x1d4   :  { %v1930_v56 = vadd.f32 %v1922_v51, %v1906_v16  ;;  %v1908_v40 = vadd.f32 %v1900_v46, %v1890_v35  ;;  %v1972_v28 = vsel %vm3083_vm6, %v1964_v12, 0.0  ;;  %vm5521_vm8 = vcmp.lt.s32.totalorder %v2860_v4, 24 }
 0x1d5   :  { %v1907_v0 = vadd.f32 %v1899_v52, %v1889_v6  ;;  %v1981_v55 = vadd.f32 %v1973_v18, %v1957_v37  ;;  %vm2199_vm11 = vmand %vm5522_vm9, %vm5521_vm8  ;;  %vm5523_vm13 = vcmp.lt.s32.totalorder %v2860_v4, 8  ;;  %v2765_v4 = vld [vmem:[%s5499_s7 + $0x10] sm:$0xff]  }
 0x1d6   :  { %v1954_v31 = vadd.f32 %v1946_v30, %v1930_v56  ;;  %v1932_v49 = vadd.f32 %v1924_v29, %v1908_v40  ;;  %2683 = vmatpush3.bf16.msra.mxu1 %v2756_v7 }
 0x1d7   :  { %v1931_v13 = vadd.f32 %v1923_v19, %v1907_v0  ;;  %2684 = vmatprep.subr.bf16.mxu1 %v2797_v2 }
 0x1d8   :  { %v1978_v26 = vadd.f32 %v1970_v38, %v1954_v31  ;;  %v1956_v44 = vadd.f32 %v1948_v39, %v1932_v49 }
 0x1d9   :  { %v1955_v34 = vadd.f32 %v1947_v11, %v1931_v13 }
 0x1da   :  { %v1980_v42 = vadd.f32 %v1972_v28, %v1956_v44  ;;  %2685 = vmatpush3.bf16.msra.mxu1 %v2757_v61 }
 0x1db   :  { %v1979_v48 = vadd.f32 %v1971_v27, %v1955_v34  ;;  %2686 = vmatprep.subr.bf16.mxu1 %v2797_v2 }
 0x1dc   :  { %v1985_v23 = vpack.c.bf16 %v1981_v55, %v1980_v42 }
 0x1dd   :  { %v1984_v43 = vpack.c.bf16 %v1979_v48, %v1978_v26 }
 0x1de   :  { %2687 = vmatpush3.bf16.msra.mxu1 %v2758_v60 }
 0x1df   :  { %2676 = vmatprep.mubr.bf16.mxu1 %v1984_v43  ;;  %2688 = vmatprep.subr.bf16.mxu1 %v2797_v2 }
 0x1e0   :  { %2677 = vmatmul.mubr.bf16.gmra.mrb[32].mxu1 %v1985_v23 }
 0x1e1   :  { %2696 = vmatprep.mubr.msk.bf16.mxu1 %vm2798_vm0, %v2797_v2 }
 0x1e2   :  { %2689 = vmatpush3.bf16.msra.mxu1 %v2759_v33 }
 0x1e3   :  { %2690 = vmatprep.subr.bf16.mxu1 %v2797_v2 }
 0x1e6   :  { %2691 = vmatpush3.bf16.msra.mxu1 %v2760_v45 }
 0x1e7   :  { %2692 = vmatprep.subr.bf16.mxu1 %v2797_v2 }
 0x1ea   :  { %2693 = vmatpush3.bf16.msra.mxu1 %v2761_v22 }
 0x1eb   :  { %2694 = vmatprep.subr.bf16.mxu1 %v2797_v2 }
 0x1ee   :  { %2695 = vmatpush3.bf16.msra.mxu1 %v2762_v20 }
 0x1ef   :  { %2700 = vmatprep.subr.bf16.mxu1 %v2797_v2 }
 0x2a4   :  { %v2674_v54 = vpop.f32.mrb[28].mxu1 }
 0x2a5   :  { %v2100_v36 = vadd.f32 %v2674_v54, %v2460_v50  ;;  %v2091_v32 = vpop.f32.mrb[29].mxu1 }
 0x2a6   :  { %v2092_v41 = vadd.f32 %v2460_v50, %v2091_v32  ;;  %v2675_v16 = vpop.f32.mrb[30].mxu1  ;;  %v2766_v32 = vld [vmem:[%s5499_s7 + $0x18] sm:$0xff]  }
 0x2a7   :  { %v2124_v3 = vmax.f32 %v2100_v36, 0.0  ;;  %v2094_v6 = vpop.f32.mrb[31].mxu1  ;;  %v2764_v36 = vld [vmem:[%s5499_s7 + $0x8] sm:$0xff]  }
 0x2a8   :  { %v2122_v1 = vmax.f32 %v2092_v41, 0.0  ;;  %v2095_v51 = vadd.f32 %v2460_v50, %v2094_v6  ;;  %v2767_v41 = vld [vmem:[%s5499_s7 + $0x20] sm:$0xff]   ;;  %v2768_v16 = vld [vmem:[%s5499_s7 + $0x28] sm:$0xff]   ;;  %v2770_v6 = vld [vmem:[%s5499_s7 + $0x38] sm:$0xff]  }
 0x2a9   :  { %2132 = vst [vmem:[#allocation4 + $0x10] sm:$0xff] %v2124_v3  ;;  %v2769_v3 = vld [vmem:[%s5499_s7 + $0x30] sm:$0xff]  }
 0x2aa   :  { %2130 = vst [vmem:[#allocation4] sm:$0xff] %v2122_v1  ;;  %v2123_v59 = vmax.f32 %v2095_v51, 0.0  ;;  %v2469_v1 = vld [vmem:[%s5498_s6] ss:$0 sm:$0xff]  ;;  %s2773_s6 = scalar_lea.vmem %s2444_s13, 32 }
 0x2ab   :  { %p2774_p0 = scmp.ne.s32.totalorder %s2444_s13, %s2773_s6  ;;  %p2779_p2 = scmp.lt.s32.totalorder %s2773_s6, %s2773_s6 }
 0x2ac   :  { %2131 = vst [vmem:[#allocation4 + $0x8] sm:$0xff] %v2123_v59 }
 0x2ad   :  { %p2780_p3 = por %p2779_p2, %p2778_p1 }
 0x2af   :  { %p2781_p4 = pnand %p2780_p3, %p2774_p0 }
 0x2b0   :  { %v2154_v10 = vld [vmem:[#allocation4 + $0x12] ss:$2 sm:$0x3]  ;;  %v2156_v52 = vld [vmem:[#allocation4 + $0x13] ss:$2 sm:$0x3] }
 0x2b1   :  { %v2138_v17 = vld [vmem:[#allocation4] ss:$2 sm:$0x3]  ;;  %v2140_v9 = vld [vmem:[#allocation4 + $0x1] ss:$2 sm:$0x3]  ;;  %v2158_v58 = vmax.f32 %v2154_v10, %v2156_v52 }
 0x2b2   :  { %v2145_v24 = vmax.f32 %v2138_v17, %v2140_v9 }
 0x2b3   :  { %v2142_v56 = vld [vmem:[#allocation4 + $0x6] ss:$2 sm:$0x3]  ;;  %v2144_v63 = vld [vmem:[#allocation4 + $0x7] ss:$2 sm:$0x3] }
 0x2b4   :  { %v2146_v0 = vmax.f32 %v2142_v56, %v2144_v63  ;;  %v2150_v8 = vld [vmem:[#allocation4 + $0xc] ss:$2 sm:$0x3]  ;;  %v2152_v57 = vld [vmem:[#allocation4 + $0xd] ss:$2 sm:$0x3] }
 0x2b5   :  { %v2157_v47 = vmax.f32 %v2150_v8, %v2152_v57  ;;  %v2678_v19 = vpop.f32.mrb[32].mxu1 }
 0x2b6   :  { %v2147_v30 = vmax.f32 %v2145_v24, %v2146_v0  ;;  %v2116_v21 = vadd.f32 %v2678_v19, %v2460_v50  ;;  %v2107_v13 = vpop.f32.mrb[33].mxu1 }
 0x2b7   :  { %v2159_v31 = vmax.f32 %v2157_v47, %v2158_v58  ;;  %v2108_v35 = vadd.f32 %v2460_v50, %v2107_v13  ;;  %v2679_v5 = vpop.f32.mrb[34].mxu1 }
 0x2b8   :  { %2148 = vst [vmem:[#allocation5] sm:$0x3] %v2147_v30  ;;  %v2128_v14 = vmax.f32 %v2116_v21, 0.0  ;;  %v2119_v11 = vadd.f32 %v2679_v5, %v2460_v50  ;;  %v2110_v46 = vpop.f32.mrb[35].mxu1 }
 0x2b9   :  { %2160 = vst [vmem:[#allocation5 + $0x2] sm:$0x3] %v2159_v31  ;;  %v2126_v15 = vmax.f32 %v2108_v35, 0.0  ;;  %v2111_v34 = vadd.f32 %v2460_v50, %v2110_v46  ;;  %v2763_v50 = vld [vmem:[%s5499_s7] sm:$0xff]  }
 0x2ba   :  { %2136 = vst [vmem:[#allocation4 + $0x30] sm:$0xff] %v2128_v14  ;;  %v2129_v40 = vmax.f32 %v2119_v11, 0.0 }
 0x2bb   :  { %2134 = vst [vmem:[#allocation4 + $0x20] sm:$0xff] %v2126_v15  ;;  %v2127_v25 = vmax.f32 %v2111_v34, 0.0 }
 0x2bc   :  { %2137 = vst [vmem:[#allocation4 + $0x38] sm:$0x3] %v2129_v40 }
 0x2bd   :  { %2135 = vst [vmem:[#allocation4 + $0x28] sm:$0xff] %v2127_v25 }
 0x2c1   :  { %v2174_v53 = vld [vmem:[#allocation4 + $0x30] ss:$2 sm:$0x3]  ;;  %v2176_v38 = vld [vmem:[#allocation4 + $0x31] ss:$2 sm:$0x3] }
 0x2c2   :  { %v2162_v27 = vld [vmem:[#allocation4 + $0x24] ss:$2 sm:$0x3]  ;;  %v2164_v29 = vld [vmem:[#allocation4 + $0x25] ss:$2 sm:$0x3]  ;;  %v2181_v49 = vmax.f32 %v2174_v53, %v2176_v38 }
 0x2c3   :  { %v2178_v26 = vld [vmem:[#allocation4 + $0x36] ss:$2 sm:$0x3]  ;;  %v2180_v48 = vld [vmem:[#allocation4 + $0x37] ss:$2 sm:$0x3]  ;;  %v2169_v18 = vmax.f32 %v2162_v27, %v2164_v29 }
 0x2c4   :  { %v2182_v37 = vmax.f32 %v2178_v26, %v2180_v48  ;;  %v2166_v12 = vld [vmem:[#allocation4 + $0x2a] ss:$2 sm:$0x3]  ;;  %v2168_v39 = vld [vmem:[#allocation4 + $0x2b] ss:$2 sm:$0x3] }
 0x2c5   :  { %v2170_v43 = vmax.f32 %v2166_v12, %v2168_v39 }
 0x2c6   :  { %v2183_v44 = vmax.f32 %v2181_v49, %v2182_v37 }
 0x2c7   :  { %v2171_v28 = vmax.f32 %v2169_v18, %v2170_v43 }
 0x2c8   :  { %2184 = vst [vmem:[#allocation5 + $0x6] sm:$0x3] %v2183_v44 }
 0x2c9   :  { %2172 = vst [vmem:[#allocation5 + $0x4] sm:$0x3] %v2171_v28 }
 0x2cf   :  { %v2198_v42 = vld [vmem:[#allocation5 + $0x2] ss:$4 sm:$0x3]  ;;  %v2205_v60 = vld [vmem:[#allocation5 + $0x3] ss:$4 sm:$0x3] }
 0x2d0   :  { %v2185_v55 = vld [vmem:[#allocation5] ss:$4 sm:$0x3]  ;;  %v2191_v23 = vld [vmem:[#allocation5 + $0x1] ss:$4 sm:$0x3] }
 0x2d1   :  { %v2189_v62 = vsel %vm5523_vm13, %v2185_v55, 0.0  ;;  %v2195_v7 = vsel %vm2192_vm1, %v2191_v23, 0.0  ;;  %v2202_v33 = vsel %vm2199_vm11, %v2198_v42, 0.0  ;;  %v2209_v22 = vsel %vm2206_vm14, %v2205_v60, 0.0 }
 0x2d2   :  { %v2196_v61 = vadd.f32 %v2195_v7, %v2189_v62 }
 0x2d4   :  { %v2203_v45 = vadd.f32 %v2202_v33, %v2196_v61 }
 0x2d6   :  { %v2210_v20 = vadd.f32 %v2209_v22, %v2203_v45 }
 0x2d8   :  { %v2211_v54 = vpack.c.bf16 %v2210_v20, %v2210_v20 }
 0x2da   :  { %2697 = vmatmul.mubr.bf16.vlgmr.msra.gmra.mrb[36].mxu1 %v2211_v54 }
 0x2db   :  { %2701 = vmatpush3.bf16.msra.mxu1 %v2763_v50  ;;  %2716 = vmatprep.mubr.msk.bf16.mxu1 %vm2798_vm0, %v2797_v2 }
 0x2dc   :  { %2702 = vmatprep.subr.bf16.mxu1 %v2797_v2 }
 0x2df   :  { %2703 = vmatpush3.bf16.msra.mxu1 %v2764_v36 }
 0x2e0   :  { %2704 = vmatprep.subr.bf16.mxu1 %v2797_v2 }
 0x2e3   :  { %2705 = vmatpush3.bf16.msra.mxu1 %v2765_v4 }
 0x2e4   :  { %2706 = vmatprep.subr.bf16.mxu1 %v2797_v2 }
 0x2e7   :  { %2707 = vmatpush3.bf16.msra.mxu1 %v2766_v32 }
 0x2e8   :  { %2708 = vmatprep.subr.bf16.mxu1 %v2797_v2 }
 0x2eb   :  { %2709 = vmatpush3.bf16.msra.mxu1 %v2767_v41 }
 0x2ec   :  { %2710 = vmatprep.subr.bf16.mxu1 %v2797_v2 }
 0x2ef   :  { %2711 = vmatpush3.bf16.msra.mxu1 %v2768_v16 }
 0x2f0   :  { %2712 = vmatprep.subr.bf16.mxu1 %v2797_v2 }
 0x2f3   :  { %2713 = vmatpush3.bf16.msra.mxu1 %v2769_v3 }
 0x2f4   :  { %2714 = vmatprep.subr.bf16.mxu1 %v2797_v2  ;;  %v2478_v2 = vld [vmem:[%s5500_s8] ss:$0 sm:$0xff] }
 0x2f7   :  { %2715 = vmatpush3.bf16.msra.mxu1 %v2770_v6 }
 0x3ad   :  { %v2317_v51 = vpop.f32.mrb[36].mxu1 }
 0x3ae   :  { %v2318_v59 = vadd.f32 %v2469_v1, %v2317_v51  ;;  %v2698_v17 = vpop.f32.mrb[37].mxu1 }
 0x3af   :  { %v2320_v9 = vpop.f32.mrb[38].mxu1 }
 0x3b0   :  { %v2323_v10 = vmax.f32 %v2318_v59, 0.0  ;;  %v2699_v52 = vpop.f32.mrb[39].mxu1 }
 0x3b2   :  { %v2324_v56 = vpack.c.bf16 %v2323_v10, %v2323_v10 }
 0x3b4   :  { %2717 = vmatmul.mubr.bf16.vlgmr.msra.gmra.mrb[40].mxu1 %v2324_v56 }
 0x487   :  { %v2430_v63 = vpop.f32.mrb[40].mxu1 }
 0x488   :  { %v2431_v24 = vadd.f32 %v2478_v2, %v2430_v63  ;;  %v2718_v0 = vpop.f32.mrb[41].mxu1 }
 0x489   :  { %v2433_v8 = vpop.f32.mrb[42].mxu1 }
 0x48a   :  { %2436 = vst [vmem:[#allocation6] sm:$0x3] %v2431_v24  ;;  %v2719_v57 = vpop.f32.mrb[43].mxu1 }
 0x48b   :  { %2784 = shalt.err (!%p2781_p4)
}
 0x48c   :  { %s2785_s8 = scalar_lea.hbm %s5501_s9, 32 }
 0x48d   :  { %p2786_p5 = scmp.ne.s32.totalorder %s5501_s9, %s2785_s8  ;;  %p2789_p6 = scmp.lt.u32.totalorder %s2785_s8, %s5501_s9 }
 0x48f   :  { %p2791_p7 = pnand %p2789_p6, %p2786_p5 }
 0x491   :  { %2794 = shalt.err (!%p2791_p7)
}
 0x492   :  { %2446 = dma.vmem_to_hbm [thread:$0]  %s2444_s13, 32, %s5501_s9, [#allocation7]  }
 0x493   :  { %2795 = dma.done.wait [#allocation7], 32  }
 0x494   :  { %2796 = vsyncadd [#allocation7], 4294967264 }
 0x495   :  { %2450 = vsyncpa [#allocation7], 1 }

</bundles_post_ra>
